<compile_context>
chip_gen: v5e
topology: v5e:2x2
jax: 0.10.0
libtpu: 0.0.40
codegen_flags: <defaults>
</compile_context>

<pallas_src>
import functools

import jax
import jax.numpy as jnp
from jax.experimental import pallas as pl
from jax.experimental.pallas import tpu as pltpu


def _linear_relu_kernel(x_ref, w_ref, b_ref, o_ref):
    # bf16 x bf16 -> f32 accumulate on the MXU; the x cast is tiny (tm x D).
    # Bias add + ReLU fused into the store (lane-dense tn-wide output tile).
    x_bf = x_ref[...].astype(jnp.bfloat16)
    y = jnp.dot(x_bf, w_ref[...], preferred_element_type=jnp.float32)
    o_ref[...] = jnp.maximum(y + b_ref[...], 0.0).astype(o_ref.dtype)


@functools.partial(jax.jit, static_argnames=("tm", "tn"))
def linear_relu(x2d, w_blk, b, *, tm, tn):
    """y = relu(x2d @ w + b).

    x2d:   (B, D)     float32
    w_blk: (G, D, tn) bfloat16  (pre-blocked weight, N = G * tn)
    b:     (1, N)     float32
    returns (B, N) float32
    """
    B, D = x2d.shape
    G, Dw, tnw = w_blk.shape
    N = G * tn
    assert D == Dw and tnw == tn
    assert B % tm == 0 and b.shape == (1, N)

    grid = (B // tm, G)

    # VMEM footprint guard (matters on v7x: 64 MiB physical / 32 MiB scoped default).
    est_vmem = (
        2 * tm * D * 4      # x block (worst case double-buffered)
        + 2 * D * tn * 2    # bf16 weight slab, double-buffered
        + 2 * tm * tn * 4   # output block
        + 2 * tn * 4        # bias tile
    )
    vmem_limit = None
    if est_vmem > 30 * 1024 * 1024:
        vmem_limit = min(int(est_vmem * 5 // 4), 100 * 1024 * 1024)

    return pl.pallas_call(
        _linear_relu_kernel,
        out_shape=jax.ShapeDtypeStruct((B, N), x2d.dtype),
        grid_spec=pltpu.PrefetchScalarGridSpec(
            num_scalar_prefetch=0,
            grid=grid,
            in_specs=[
                # x: one block per batch tile, constant over the N axis -> fetched once.
                pl.BlockSpec((tm, D), lambda i, j: (i, 0)),
                # w: contiguous pre-blocked slab j, streamed over the N tiles.
                pl.BlockSpec((pl.Squeezed(), D, tn), lambda i, j: (j, 0, 0)),
                # bias tile for this N slab.
                pl.BlockSpec((1, tn), lambda i, j: (0, j)),
            ],
            out_specs=pl.BlockSpec((tm, tn), lambda i, j: (i, j)),
        ),
        compiler_params=pltpu.CompilerParams(
            dimension_semantics=("parallel", "parallel"),
            vmem_limit_bytes=vmem_limit,
        ),
    )(x2d, w_blk, b)


def _pick_tn(N):
    """Largest lane-aligned N-tile that keeps >= 2 tiles (never collapse the grid)."""
    if N >= 256:
        for cand in (1024, 512, 256, 128):
            if cand <= N // 2 and N % cand == 0:
                return cand
    # Tiny or awkward N: single full-width tile (correctness first).
    return N


def _pick_tm(B):
    """Tile the batch only when it is large enough to threaten VMEM (v7x guard)."""
    if B < 128:
        return B
    for cand in (256, 128):
        if B % cand == 0:
            return cand
    return B


class CustomModuleNTo2048:
    """JAX/Pallas port of CustomModuleN_to_2048.

    Parameters are created deterministically the first time a given input_dim is
    seen (mirroring the lazy re-init of nn.Linear in the PyTorch forward).
    Weights are stored pre-blocked in bfloat16 for streaming; an f32 copy is kept
    only for reference checking.
    """

    def __init__(self, output_dim=2048, seed=0):
        self.output_dim = output_dim
        self.seed = seed
        self._in_features = None
        self._tn = _pick_tn(output_dim)
        self._w_blocked = None   # (G, D, tn) bf16
        self._w_ref = None       # (D, N) f32, reference only
        self._b = None           # (1, N) f32

    def _maybe_init(self, input_dim):
        if self._in_features == input_dim:
            return
        key = jax.random.PRNGKey(self.seed)
        kw, kb = jax.random.split(key)
        # Deterministic init mimicking nn.Linear's uniform(-1/sqrt(D), 1/sqrt(D)).
        bound = 1.0 / jnp.sqrt(jnp.float32(input_dim))
        w_pt = jax.random.uniform(
            kw, (self.output_dim, input_dim), jnp.float32, -bound, bound
        )  # PyTorch layout (N, D)
        b_pt = jax.random.uniform(kb, (self.output_dim,), jnp.float32, -bound, bound)

        w = jnp.transpose(w_pt)                       # (D, N) for x @ w
        tn = self._tn
        G = self.output_dim // tn
        # Pre-block into contiguous per-tile slabs: (D, N) -> (G, D, tn), bf16 stream.
        w_blocked = (
            w.reshape(input_dim, G, tn)
            .transpose(1, 0, 2)
            .astype(jnp.bfloat16)
        )
        self._w_blocked = w_blocked
        self._w_ref = w                                # f32, for checks only
        self._b = b_pt.reshape(1, self.output_dim)     # (1, N) f32
        self._in_features = input_dim

    def __call__(self, x):
        B = x.shape[0]
        x2d = x.reshape(B, -1).astype(jnp.float32)
        D = x2d.shape[1]
        self._maybe_init(D)
        tm = _pick_tm(B)
        return linear_relu(x2d, self._w_blocked, self._b, tm=tm, tn=self._tn)


if __name__ == "__main__":
    key = jax.random.PRNGKey(0)
    # Small NCHW-style input, consistent with the module's flatten-then-linear.
    x = jax.random.normal(key, (2, 4, 16, 16), dtype=jnp.float32)  # -> D = 1024

    model = CustomModuleNTo2048(output_dim=2048, seed=0)
    y = model(x)
    y = jax.block_until_ready(y)

    # Reference checks (pure JAX, glue-level).
    x2d = x.reshape(x.shape[0], -1)
    # bf16-weight reference (matches kernel numerics closely).
    y_ref_bf16 = jnp.maximum(
        jnp.dot(
            x2d.astype(jnp.bfloat16),
            model._w_ref.astype(jnp.bfloat16),
            preferred_element_type=jnp.float32,
        )
        + model._b,
        0.0,
    )
    # Full f32 reference (PyTorch semantics) with bf16-appropriate tolerance.
    y_ref_f32 = jnp.maximum(x2d @ model._w_ref + model._b, 0.0)

    assert y.shape == (2, 2048)
    assert bool(jnp.all(y >= 0.0))
    assert jnp.allclose(y, y_ref_bf16, atol=1e-3, rtol=1e-3)
    assert jnp.allclose(y, y_ref_f32, atol=2e-2, rtol=2e-2)

    print("KERNEL_OK")
</pallas_src>

<mosaic_0001>
module attributes {stable_mosaic.version = 11 : i64} {
  func.func @_linear_relu_kernel(%arg0: i32, %arg1: i32, %arg2: memref<2x1024xf32, #tpu.memory_space<vmem>>, %arg3: memref<1x1024x1024xbf16, #tpu.memory_space<vmem>>, %arg4: memref<1x1024xf32, #tpu.memory_space<vmem>>, %arg5: memref<2x1024xf32, #tpu.memory_space<vmem>>) attributes {dimension_semantics = [#tpu.dimension_semantics<parallel>, #tpu.dimension_semantics<parallel>], iteration_bounds = array<i64: 1, 2>, scalar_prefetch = 0 : i64, scratch_operands = 0 : i64, tpu.core_type = #tpu.core_type<tc>, window_params = [{transform_indices = @transform_0, window_bounds = array<i64: 2, 1024>}, {transform_indices = @transform_1, window_bounds = array<i64: 1, 1024, 1024>}, {transform_indices = @transform_2, window_bounds = array<i64: 1, 1024>}, {transform_indices = @transform_3, window_bounds = array<i64: 2, 1024>}]} {
    %c0 = arith.constant 0 : index
    %c0_0 = arith.constant 0 : index
    %0 = vector.load %arg2[%c0, %c0_0] : memref<2x1024xf32, #tpu.memory_space<vmem>>, vector<2x1024xf32>
    %1 = arith.truncf %0 : vector<2x1024xf32> to vector<2x1024xbf16>
    %c0_1 = arith.constant 0 : index
    %c0_2 = arith.constant 0 : index
    %c0_3 = arith.constant 0 : index
    %2 = vector.load %arg3[%c0_1, %c0_2, %c0_3] : memref<1x1024x1024xbf16, #tpu.memory_space<vmem>>, vector<1x1024x1024xbf16>
    %3 = vector.shape_cast %2 : vector<1x1024x1024xbf16> to vector<1024x1024xbf16>
    %cst = arith.constant dense<0.000000e+00> : vector<2x1024xf32>
    %4 = tpu.matmul %1, %3, %cst {dimension_numbers = #tpu.dot_dimension_numbers<[1], [0], [0], [1], [0, 0, 1, 1], [], []>} : vector<2x1024xbf16>, vector<1024x1024xbf16>, vector<2x1024xf32> -> vector<2x1024xf32>
    %c0_4 = arith.constant 0 : index
    %c0_5 = arith.constant 0 : index
    %5 = vector.load %arg4[%c0_4, %c0_5] : memref<1x1024xf32, #tpu.memory_space<vmem>>, vector<1x1024xf32>
    %6 = vector.broadcast %5 : vector<1x1024xf32> to vector<2x1024xf32>
    %7 = arith.addf %4, %6 : vector<2x1024xf32>
    %cst_6 = arith.constant 0.000000e+00 : f32
    %8 = vector.broadcast %cst_6 : f32 to vector<2x1024xf32>
    %9 = arith.maximumf %7, %8 : vector<2x1024xf32>
    %c0_7 = arith.constant 0 : index
    %c0_8 = arith.constant 0 : index
    %10 = vector.load %arg5[%c0_7, %c0_8] : memref<2x1024xf32, #tpu.memory_space<vmem>>, vector<2x1024xf32>
    tpu.vector_store %arg5[%c0_7, %c0_8], %9 {strides = array<i32>} : memref<2x1024xf32, #tpu.memory_space<vmem>>, vector<2x1024xf32>,
    return
  }
  func.func @transform_0(%arg0: i32, %arg1: i32) -> (i32, i32) {
    %c0_i32 = arith.constant 0 : i32
    %c0_i32_0 = arith.constant 0 : i32
    return %arg0, %c0_i32 : i32, i32
  }
  func.func @transform_1(%arg0: i32, %arg1: i32) -> (i32, i32, i32) {
    %c0_i32 = arith.constant 0 : i32
    %c0_i32_0 = arith.constant 0 : i32
    %c0_i32_1 = arith.constant 0 : i32
    return %arg1, %c0_i32, %c0_i32_0 : i32, i32, i32
  }
  func.func @transform_2(%arg0: i32, %arg1: i32) -> (i32, i32) {
    %c0_i32 = arith.constant 0 : i32
    %c0_i32_0 = arith.constant 0 : i32
    return %c0_i32, %arg1 : i32, i32
  }
  func.func @transform_3(%arg0: i32, %arg1: i32) -> (i32, i32) {
    %c0_i32 = arith.constant 0 : i32
    return %arg0, %arg1 : i32, i32
  }
}

</mosaic_0001>

<bundles_post_ra>
// kernel: linear_relu.1
= control target key start
LH: loop header
LB: loop body
LE: loop exit
PB: predicated region body
PF: predicated region fallthrough
CT: control target
= control target key end

     0   :  { %8 = vsyncpa [#allocation3], 0  ;;  %s8606_s0 = inlined_call_operand.hbm [shape: f32[2,1024], index: 0, kind: input, shape index: {}]   ;;  %s8607_s1 = inlined_call_operand.hbm [shape: bf16[2,1024,1024], index: 1, kind: input, shape index: {}]   ;;  %s8608_s2 = inlined_call_operand.hbm [shape: f32[1,2048], index: 2, kind: input, shape index: {}]   ;;  %s8609_s3 = inlined_call_operand.hbm [shape: f32[2,2048], index: 3, kind: output, shape index: {}]  }
   0x1   :  { %9 = vsyncpa [#allocation6], 0 }
   0x2   :  { %11 = vsyncpa [#allocation6 + $0x1], 0 }
   0x3   :  { %12 = vsyncpa [#allocation4], 0 }
   0x4   :  { %14 = vsyncpa [#allocation4 + $0x1], 0  ;;  %s7253_s12 = smov 0   ;;  %s7255_s13 = smov 0  }
   0x5   :  { %s7257_s14 = smov 0   ;;  %s7259_s15 = smov 0  }
   0x6   :  { %s7261_s16 = smov 0   ;;  %s7263_s17 = smov 0  }
   0x7 LB: > { %s29_s18 = sadd.s32 1, %s7224_s16  ;;  %s65_s19 = sadd.s32 1, %s7216_s14  ;;  %s7228_s17 = sphi %s7263_s17, %s20_s17   ;;  %s7224_s16 = sphi %s7261_s16, %s8620_s16   ;;  %s7220_s15 = sphi %s7259_s15, %s8619_s15   ;;  %s7216_s14 = sphi %s7257_s14, %s8618_s14   ;;  %s7212_s13 = sphi %s7255_s13, %s8617_s13   ;;  %s7208_s12 = sphi %s7253_s12, %s8616_s12  }
   0x8   : > { %p30_p0 = scmp.ge.s32.totalorder %s29_s18, 2  ;;  %p72_p1 = scmp.ne.s32.totalorder %s7216_s14, %s7212_s13 }
   0x9   : > { %p73_p2 = scmp.eq.s32.totalorder %s7228_s17, 0  ;;  %p4392_p3 = scmp.ge.s32.totalorder %s7228_s17, 2 }
   0xa   : > { %s8622_s18 = smov (%p30_p0, %s29_s18), 0  ;;  %p6996_p5 = scmp.lt.s32.totalorder %s7228_s17, 2 }
   0xb   : > { %p7294_p4 = por %p73_p2, %p72_p1  ;;  %s62_s21 = ssub.s32 %s7224_s16, %s8622_s18 }
   0xc   : > { %s171_s22 = sand.u32 1, %s7228_s17   ;;  %p63_p6 = scmp.eq.s32.totalorder %s62_s21, 0 }
   0xd   : > { %s173_s23 = sand.u32 1, %s7216_s14   ;;  %s6456_s24 = sshll.u32 %s7224_s16, 12 }
   0xe   : > { %s7305_s25 = scalar_select %p63_p6, %s7216_s14, %s65_s19  }
   0xf   : > { %s4393_s26 = sshll.u32 %s173_s23, 12  ;;  %s180_s29 = scalar_lea.hbm %s8607_s1, %s6456_s24 }
  0x10   : > { %s181_s30 = sshll.u32 %s180_s29, 4  ;;  %s175_s4 = scalar_lea.vmem [#allocation5], %s4393_s26  ;;  %s182_s30 = int_to_ptr.hbm [resolvable:$true] %s181_s30 }
  0x11   : > { %s183_s5 = sshll.u32 %s175_s4, 4  ;;  %p7314_p7 = pnand %p6996_p5, %p7294_p4  ;;  %s184_s5 = int_to_ptr.vmem [resolvable:$true] %s183_s5 }
  0x12   : > { %s7318_s7 = scalar_lea.sflag [#allocation6], %s171_s22  ;;  %s7230_s8 = smov 512  }
  0x13   : > { %s7231_s9 = smov 32   ;;  %s7324_s10 = sadd.s32 4294967295, %s7228_s17  }
  0x14   : > { %6987 = dma.hbm_to_vmem [thread:$0]  (!%p7314_p7), %s182_s30, 65536, %s184_s5, %s7318_s7, %s7230_s8, %s7230_s8, %s7231_s9  }
  0x15   : > { %s4389_s11 = sadd.s32 4294967294, %s7228_s17   ;;  %p78_p8 = scmp.ne.s32.totalorder %s7212_s13, %s7208_s12 }
  0x16   : > { %p79_p9 = scmp.eq.s32.totalorder %s7324_s10, 0  ;;  %p130_p10 = scmp.eq.s32.totalorder %s7324_s10, 1 }
  0x17   : > { %p136_p11 = scmp.eq.s32.totalorder %s4389_s11, 1  ;;  %p4390_p12 = scmp.ge.s32.totalorder %s7228_s17, 1 }
  0x18   : > { %p7334_p13 = por %p79_p9, %p78_p8  ;;  %p7341_p0 = por %p130_p10, %p72_p1 }
  0x19   : > { %p7345_p2 = por %p136_p11, %p78_p8  ;;  %p143_p4 = scmp.lt.s32.totalorder %s7228_s17, 3 }
  0x1a   : > { %s158_s26 = sshll.u32 %s8606_s0, 4  ;;  %s4396_s28 = sshll.u32 %s173_s23, 3  ;;  %s159_s26 = int_to_ptr.hbm [resolvable:$true] %s158_s26 }
  0x1b   : > { %p7353_p5 = pnand %p4390_p12, %p143_p4  ;;  %s7232_s29 = smov [#allocation2]  }
  0x1c   : > { %s160_s30 = sshll.u32 %s7232_s29, 4  ;;  %s4397_s4 = sshll.u32 %s7224_s16, 3  ;;  %s161_s30 = int_to_ptr.vmem [resolvable:$true] %s160_s30 }
  0x1d   : > { %p6980_p1 = pneg %p7353_p5  ;;  %s201_s9 = scalar_lea.hbm %s8608_s2, %s4397_s4 }
  0x1e   : > { %s197_s11 = scalar_lea.vmem [#allocation7], %s4396_s28  ;;  %s203_s24 = sshll.u32 %s201_s9, 4  ;;  %s204_s24 = int_to_ptr.hbm [resolvable:$true] %s203_s24 }
  0x1f   : > { %p6981_p6 = pnand %p6980_p1, %p79_p9  ;;  %s205_s22 = sshll.u32 %s197_s11, 4  ;;  %s206_s22 = int_to_ptr.vmem [resolvable:$true] %s205_s22 }
  0x20   : > { %6990 = dma.hbm_to_vmem [thread:$0]  (!%p7314_p7), %s204_s24, 128, %s206_s22, %s7318_s7  }
  0x21   : > { %6983 = dma.hbm_to_vmem [thread:$0]  (!%p6981_p6), %s159_s26, 256, %s161_s30, [#allocation3]  }
  0x22   : > { %214 = sbr.rel (%p7353_p5) target bundleno = 967 (0x3c7), region = 32 }
  0x27   : > { %7195 = dma.done.wait (%p79_p9), [#allocation3], 256  }
  0x28   : > { %7197 = vsyncadd (%p79_p9), [#allocation3], 4294967040  ;;  %s221_s23 = sand.u32 1, %s7324_s10   ;;  %s7376_s28 = sand.u32 1, %s7212_s13  }
  0x29   : > { %s4400_s26 = sshll.u32 %s7376_s28, 12  ;;  %s222_s29 = scalar_lea.sflag [#allocation6], %s221_s23 }
  0x2a   : > { %s7379_s6 = scalar_lea.vmem [#allocation5], %s4400_s26 }
  0x2b   : > { %7199 = dma.done.wait (%p7334_p13), %s222_s29, 65664  }
  0x2c   : > { %7201 = vsyncadd (%p7334_p13), %s222_s29, 4294901632  ;;  %v4629_v0 = vld [vmem:[%s7379_s6 + $0x1c0] sm:$0xf]  ;;  %s4401_s7 = sshll.u32 %s7376_s28, 3  ;;  %vm4241_vm0 = vcmask 1041408   ;;  %s4402_s19 = sshll.u32 %s7376_s28, 4 }
  0x2d   : > { %v6517_v1 = vld [vmem:[%s7379_s6 + $0x1dc] sm:$0xf0]  ;;  %s7788_s10 = scalar_lea.vmem [#allocation7], %s4401_s7  ;;  %vm4243_vm1 = vcmask 1045508   ;;  %vm4245_vm2 = vcmask 1043456   ;;  %s8342_s27 = scalar_lea.vmem [#allocation8], %s4402_s19 }
  0x2e   : > { %v4885_v2 = vld [vmem:[%s7379_s6 + $0x3c0] sm:$0xf]  ;;  %v4630_v3 = vor.u32 %v6517_v1, %v4629_v0  ;;  %s6969_s30 = sshll.u32 %s7220_s15, 4  ;;  %s4270_s9 = sshll.u32 %s8342_s27, 4  ;;  %s4271_s9 = int_to_ptr.vmem [resolvable:$true] %s4270_s9 }
  0x2f   : > { %v6581_v4 = vld [vmem:[%s7379_s6 + $0x3dc] sm:$0xf0]  ;;  %s4268_s8 = scalar_lea.hbm %s8609_s3, %s6969_s30  ;;  %s4255_s15 = scalar_lea.sflag [#allocation4], %s7376_s28 }
  0x30   : > { %v5141_v5 = vld [vmem:[%s7379_s6 + $0x5c0] sm:$0xf]  ;;  %v4886_v7 = vor.u32 %v6581_v4, %v4885_v2  ;;  %3387 = vmatpush.bf16.msra.mxu0 %v4630_v3  ;;  %s4272_s11 = sshll.u32 %s4268_s8, 4  ;;  %s7162_s29 = scalar_lea.hbm %s8609_s3, 32  ;;  %s4273_s11 = int_to_ptr.hbm [resolvable:$true] %s4272_s11 }
  0x31   : > { %v6645_v6 = vld [vmem:[%s7379_s6 + $0x5dc] sm:$0xf0]  ;;  %s7156_s22 = sshra.s32 %s4273_s11, 4  ;;  %s7157_s22 = int_to_ptr.hbm [resolvable:$true] %s7156_s22 }
  0x32   : > { %v5142_v8 = vor.u32 %v6645_v6, %v5141_v5  ;;  %v5397_v9 = vld [vmem:[%s7379_s6 + $0x7c0] sm:$0xf]  ;;  %3400 = vmatpush.bf16.msra.mxu1 %v4886_v7  ;;  %s7158_s24 = scalar_lea.hbm %s7157_s22, 16  ;;  %p7163_p10 = scmp.lt.s32.totalorder %s7157_s22, %s8609_s3 }
  0x33   : > { %v6709_v10 = vld [vmem:[%s7379_s6 + $0x7dc] sm:$0xf0]  ;;  %p7159_p7 = scmp.ne.s32.totalorder %s7157_s22, %s7158_s24  ;;  %p7164_p11 = scmp.lt.s32.totalorder %s7162_s29, %s7158_s24 }
  0x34   : > { %v4597_v11 = vld [vmem:[%s7379_s6 + $0x180] sm:$0xf]  ;;  %v5398_v12 = vor.u32 %v6709_v10, %v5397_v9  ;;  %3413 = vmatpush.bf16.msra.mxu2 %v5142_v8 }
  0x35   : > { %v6509_v13 = vld [vmem:[%s7379_s6 + $0x19c] sm:$0xf0]  ;;  %p7160_p8 = pnand %p7159_p7, %p7341_p0  ;;  %p7165_p12 = por %p7164_p11, %p7163_p10 }
  0x36   : > { %v4853_v14 = vld [vmem:[%s7379_s6 + $0x380] sm:$0xf]  ;;  %v4598_v16 = vor.u32 %v6509_v13, %v4597_v11  ;;  %3426 = vmatpush.bf16.msra.mxu3 %v5398_v12 }
  0x37   : > { %v6573_v15 = vld [vmem:[%s7379_s6 + $0x39c] sm:$0xf0]  ;;  %p7161_p9 = pneg %p7160_p8 }
  0x38   : > { %v4854_v17 = vor.u32 %v6573_v15, %v4853_v14  ;;  %v5109_v18 = vld [vmem:[%s7379_s6 + $0x580] sm:$0xf]  ;;  %3388 = vmatpush.bf16.msra.mxu0 %v4598_v16 }
  0x39   : > { %v6637_v19 = vld [vmem:[%s7379_s6 + $0x59c] sm:$0xf0]  ;;  %p7166_p13 = pnand %p7165_p12, %p7161_p9 }
  0x3a   : > { %v5365_v20 = vld [vmem:[%s7379_s6 + $0x780] sm:$0xf]  ;;  %v5110_v21 = vor.u32 %v6637_v19, %v5109_v18  ;;  %3401 = vmatpush.bf16.msra.mxu1 %v4854_v17 }
  0x3b   : > { %v6701_v22 = vld [vmem:[%s7379_s6 + $0x79c] sm:$0xf0] }
  0x3c   : > { %v4565_v23 = vld [vmem:[%s7379_s6 + $0x140] sm:$0xf]  ;;  %v5366_v25 = vor.u32 %v6701_v22, %v5365_v20  ;;  %3414 = vmatpush.bf16.msra.mxu2 %v5110_v21 }
  0x3d   : > { %v6501_v24 = vld [vmem:[%s7379_s6 + $0x15c] sm:$0xf0] }
  0x3e   : > { %v4821_v26 = vld [vmem:[%s7379_s6 + $0x340] sm:$0xf]  ;;  %v4566_v29 = vor.u32 %v6501_v24, %v4565_v23  ;;  %3427 = vmatpush.bf16.msra.mxu3 %v5366_v25 }
  0x3f   : > { %v6565_v27 = vld [vmem:[%s7379_s6 + $0x35c] sm:$0xf0] }
  0x40   : > { %v5077_v28 = vld [vmem:[%s7379_s6 + $0x540] sm:$0xf]  ;;  %v4822_v33 = vor.u32 %v6565_v27, %v4821_v26  ;;  %3389 = vmatpush.bf16.msra.mxu0 %v4566_v29 }
  0x41   : > { %v6629_v30 = vld [vmem:[%s7379_s6 + $0x55c] sm:$0xf0] }
  0x42   : > { %v5333_v31 = vld [vmem:[%s7379_s6 + $0x740] sm:$0xf]  ;;  %v5078_v34 = vor.u32 %v6629_v30, %v5077_v28  ;;  %3402 = vmatpush.bf16.msra.mxu1 %v4822_v33 }
  0x43   : > { %v6693_v32 = vld [vmem:[%s7379_s6 + $0x75c] sm:$0xf0] }
  0x44   : > { %v4533_v35 = vld [vmem:[%s7379_s6 + $0x100] sm:$0xf]  ;;  %v5334_v38 = vor.u32 %v6693_v32, %v5333_v31  ;;  %3415 = vmatpush.bf16.msra.mxu2 %v5078_v34 }
  0x45   : > { %v6493_v36 = vld [vmem:[%s7379_s6 + $0x11c] sm:$0xf0] }
  0x46   : > { %v4789_v37 = vld [vmem:[%s7379_s6 + $0x300] sm:$0xf]  ;;  %v4534_v44 = vor.u32 %v6493_v36, %v4533_v35  ;;  %3428 = vmatpush.bf16.msra.mxu3 %v5334_v38 }
  0x47   : > { %v6557_v39 = vld [vmem:[%s7379_s6 + $0x31c] sm:$0xf0] }
  0x48   : > { %v5045_v40 = vld [vmem:[%s7379_s6 + $0x500] sm:$0xf]  ;;  %v4790_v45 = vor.u32 %v6557_v39, %v4789_v37  ;;  %3390 = vmatpush.bf16.msra.mxu0 %v4534_v44 }
  0x49   : > { %v6621_v41 = vld [vmem:[%s7379_s6 + $0x51c] sm:$0xf0] }
  0x4a   : > { %v5301_v42 = vld [vmem:[%s7379_s6 + $0x700] sm:$0xf]  ;;  %v5046_v46 = vor.u32 %v6621_v41, %v5045_v40  ;;  %3403 = vmatpush.bf16.msra.mxu1 %v4790_v45 }
  0x4b   : > { %v6685_v43 = vld [vmem:[%s7379_s6 + $0x71c] sm:$0xf0] }
  0x4c   : > { %v4501_v47 = vld [vmem:[%s7379_s6 + $0xc0] sm:$0xf]  ;;  %v5302_v50 = vor.u32 %v6685_v43, %v5301_v42  ;;  %3416 = vmatpush.bf16.msra.mxu2 %v5046_v46 }
  0x4d   : > { %v6485_v48 = vld [vmem:[%s7379_s6 + $0xdc] sm:$0xf0] }
  0x4e   : > { %v4757_v49 = vld [vmem:[%s7379_s6 + $0x2c0] sm:$0xf]  ;;  %v4502_v56 = vor.u32 %v6485_v48, %v4501_v47  ;;  %3429 = vmatpush.bf16.msra.mxu3 %v5302_v50 }
  0x4f   : > { %v6549_v51 = vld [vmem:[%s7379_s6 + $0x2dc] sm:$0xf0] }
  0x50   : > { %v5013_v52 = vld [vmem:[%s7379_s6 + $0x4c0] sm:$0xf]  ;;  %v4758_v57 = vor.u32 %v6549_v51, %v4757_v49  ;;  %3391 = vmatpush.bf16.msra.mxu0 %v4502_v56 }
  0x51   : > { %v6613_v53 = vld [vmem:[%s7379_s6 + $0x4dc] sm:$0xf0] }
  0x52   : > { %v5269_v54 = vld [vmem:[%s7379_s6 + $0x6c0] sm:$0xf]  ;;  %v5014_v58 = vor.u32 %v6613_v53, %v5013_v52  ;;  %3404 = vmatpush.bf16.msra.mxu1 %v4758_v57 }
  0x53   : > { %v6677_v55 = vld [vmem:[%s7379_s6 + $0x6dc] sm:$0xf0] }
  0x54   : > { %v4469_v59 = vld [vmem:[%s7379_s6 + $0x80] sm:$0xf]  ;;  %v5270_v62 = vor.u32 %v6677_v55, %v5269_v54  ;;  %3417 = vmatpush.bf16.msra.mxu2 %v5014_v58 }
  0x55   : > { %v6477_v60 = vld [vmem:[%s7379_s6 + $0x9c] sm:$0xf0] }
  0x56   : > { %v4725_v61 = vld [vmem:[%s7379_s6 + $0x280] sm:$0xf]  ;;  %v4470_v4 = vor.u32 %v6477_v60, %v4469_v59  ;;  %3430 = vmatpush.bf16.msra.mxu3 %v5270_v62 }
  0x57   : > { %v6541_v63 = vld [vmem:[%s7379_s6 + $0x29c] sm:$0xf0] }
  0x58   : > { %v4981_v0 = vld [vmem:[%s7379_s6 + $0x480] sm:$0xf]  ;;  %v4726_v5 = vor.u32 %v6541_v63, %v4725_v61  ;;  %3392 = vmatpush.bf16.msra.mxu0 %v4470_v4 }
  0x59   : > { %v6605_v1 = vld [vmem:[%s7379_s6 + $0x49c] sm:$0xf0] }
  0x5a   : > { %v5237_v2 = vld [vmem:[%s7379_s6 + $0x680] sm:$0xf]  ;;  %v4982_v6 = vor.u32 %v6605_v1, %v4981_v0  ;;  %3405 = vmatpush.bf16.msra.mxu1 %v4726_v5 }
  0x5b   : > { %v6669_v3 = vld [vmem:[%s7379_s6 + $0x69c] sm:$0xf0] }
  0x5c   : > { %v4437_v7 = vld [vmem:[%s7379_s6 + $0x40] sm:$0xf]  ;;  %v5238_v10 = vor.u32 %v6669_v3, %v5237_v2  ;;  %3418 = vmatpush.bf16.msra.mxu2 %v4982_v6  ;;  %v266_v2 = vld [vmem:[#allocation2] sm:$0xff] }
  0x5d   : > { %v6469_v8 = vld [vmem:[%s7379_s6 + $0x5c] sm:$0xf0]  ;;  %270 = vst [vmem:[#allocation1] ss:$4 sm:$0xff] %v266_v2 }
  0x5e   : > { %v4693_v9 = vld [vmem:[%s7379_s6 + $0x240] sm:$0xf]  ;;  %v4438_v16 = vor.u32 %v6469_v8, %v4437_v7  ;;  %3431 = vmatpush.bf16.msra.mxu3 %v5238_v10 }
  0x5f   : > { %v6533_v11 = vld [vmem:[%s7379_s6 + $0x25c] sm:$0xf0] }
  0x60   : > { %v4949_v12 = vld [vmem:[%s7379_s6 + $0x440] sm:$0xf]  ;;  %v4694_v19 = vor.u32 %v6533_v11, %v4693_v9  ;;  %3393 = vmatpush.bf16.msra.mxu0 %v4438_v16 }
  0x61   : > { %v6597_v13 = vld [vmem:[%s7379_s6 + $0x45c] sm:$0xf0] }
  0x62   : > { %v5205_v14 = vld [vmem:[%s7379_s6 + $0x640] sm:$0xf]  ;;  %v4950_v20 = vor.u32 %v6597_v13, %v4949_v12  ;;  %3406 = vmatpush.bf16.msra.mxu1 %v4694_v19 }
  0x63   : > { %v6661_v15 = vld [vmem:[%s7379_s6 + $0x65c] sm:$0xf0] }
  0x64   : > { %v4405_v17 = vld [vmem:[%s7379_s6] sm:$0xf]  ;;  %v5206_v24 = vor.u32 %v6661_v15, %v5205_v14  ;;  %3419 = vmatpush.bf16.msra.mxu2 %v4950_v20 }
  0x65   : > { %v6461_v18 = vld [vmem:[%s7379_s6 + $0x1c] sm:$0xf0] }
  0x66   : > { %v4661_v21 = vld [vmem:[%s7379_s6 + $0x200] sm:$0xf]  ;;  %v4406_v31 = vor.u32 %v6461_v18, %v4405_v17  ;;  %3432 = vmatpush.bf16.msra.mxu3 %v5206_v24 }
  0x67   : > { %v6525_v22 = vld [vmem:[%s7379_s6 + $0x21c] sm:$0xf0] }
  0x68   : > { %v4917_v23 = vld [vmem:[%s7379_s6 + $0x400] sm:$0xf]  ;;  %v4662_v35 = vor.u32 %v6525_v22, %v4661_v21  ;;  %3394 = vmatpush.bf16.msra.mxu0 %v4406_v31  ;;  %v273_v31 = vld.sshfl [vmem:[#allocation1] sm:$0xff pattern:$0x73625140] }
  0x69   : > { %v6589_v25 = vld [vmem:[%s7379_s6 + $0x41c] sm:$0xf0] }
  0x6a   : > { %v5173_v26 = vld [vmem:[%s7379_s6 + $0x600] sm:$0xf]  ;;  %v4918_v36 = vor.u32 %v6589_v25, %v4917_v23  ;;  %3407 = vmatpush.bf16.msra.mxu1 %v4662_v35 }
  0x6b   : > { %v6653_v27 = vld [vmem:[%s7379_s6 + $0x61c] sm:$0xf0] }
  0x6c   : > { %v5653_v28 = vld [vmem:[%s7379_s6 + $0x9c0] sm:$0xf]  ;;  %v5174_v39 = vor.u32 %v6653_v27, %v5173_v26  ;;  %3420 = vmatpush.bf16.msra.mxu2 %v4918_v36  ;;  %v274_v36 = vld.sshfl [vmem:[#allocation1 + $0x8] sm:$0xff pattern:$0x73625140] }
  0x6d   : > { %v6773_v29 = vld [vmem:[%s7379_s6 + $0x9dc] sm:$0xf0] }
  0x6e   : > { %v5909_v30 = vld [vmem:[%s7379_s6 + $0xbc0] sm:$0xf]  ;;  %v5654_v40 = vor.u32 %v6773_v29, %v5653_v28  ;;  %3433 = vmatpush.bf16.msra.mxu3 %v5174_v39 }
  0x6f   : > { %v6837_v32 = vld [vmem:[%s7379_s6 + $0xbdc] sm:$0xf0] }
  0x70   : > { %v6165_v33 = vld [vmem:[%s7379_s6 + $0xdc0] sm:$0xf]  ;;  %v5910_v41 = vor.u32 %v6837_v32, %v5909_v30  ;;  %3439 = vmatpush.bf16.msrb.mxu0 %v5654_v40  ;;  %v275_v30 = vld.sshfl [vmem:[#allocation1 + $0x10] sm:$0xff pattern:$0x73625140] }
  0x71   : > { %v6901_v34 = vld [vmem:[%s7379_s6 + $0xddc] sm:$0xf0] }
  0x72   : > { %v6421_v37 = vld [vmem:[%s7379_s6 + $0xfc0] sm:$0xf]  ;;  %v6166_v42 = vor.u32 %v6901_v34, %v6165_v33  ;;  %3452 = vmatpush.bf16.msrb.mxu1 %v5910_v41  ;;  %v7492_v33 = vpack.c.bf16 %v275_v30, %v275_v30  ;;  %v7494_v34 = vpack.c.bf16 %v273_v31, %v273_v31  ;;  %v6633_v30 = vld [vmem:[%s7379_s6 + $0x584] sm:$0xf] }
  0x73   : > { %v6965_v38 = vld [vmem:[%s7379_s6 + $0xfdc] sm:$0xf0]  ;;  %v5111_v31 = vld [vmem:[%s7379_s6 + $0x5a0] sm:$0xf0] }
  0x74   : > { %v5621_v43 = vld [vmem:[%s7379_s6 + $0x980] sm:$0xf]  ;;  %v6422_v46 = vor.u32 %v6965_v38, %v6421_v37  ;;  %3465 = vmatpush.bf16.msrb.mxu2 %v6166_v42  ;;  %v7501_v42 = vpack.c.bf16 %v274_v36, %v274_v36  ;;  %3395 = vmatmul.bf16.vlgmr.msra.gmra.mxu0 %v7494_v34  ;;  %v5367_v36 = vld [vmem:[%s7379_s6 + $0x7a0] sm:$0xf0] }
  0x75   : > { %v6765_v44 = vld [vmem:[%s7379_s6 + $0x99c] sm:$0xf0]  ;;  %3421 = vmatmul.bf16.vlgmr.msra.gmra.mxu2 %v7492_v33 }
  0x76   : > { %v5877_v45 = vld [vmem:[%s7379_s6 + $0xb80] sm:$0xf]  ;;  %v5622_v52 = vor.u32 %v6765_v44, %v5621_v43  ;;  %3478 = vmatpush.bf16.msrb.mxu3 %v6422_v46  ;;  %3408 = vmatmul.bf16.vlgmr.msra.gmra.mxu1 %v7501_v42 }
  0x77   : > { %v6829_v47 = vld [vmem:[%s7379_s6 + $0xb9c] sm:$0xf0] }
  0x78   : > { %v6133_v48 = vld [vmem:[%s7379_s6 + $0xd80] sm:$0xf]  ;;  %v5878_v53 = vor.u32 %v6829_v47, %v5877_v45  ;;  %3440 = vmatpush.bf16.msrb.mxu0 %v5622_v52  ;;  %v267_v52 = vld [vmem:[#allocation2 + $0x8] sm:$0xff] }
  0x79   : > { %v6893_v49 = vld [vmem:[%s7379_s6 + $0xd9c] sm:$0xf0]  ;;  %272 = vst [vmem:[#allocation1 + $0x20] ss:$4 sm:$0xff] %v267_v52  ;;  %v6689_v52 = vld [vmem:[%s7379_s6 + $0x744] sm:$0xf] }
  0x7a   : > { %v6389_v50 = vld [vmem:[%s7379_s6 + $0xf80] sm:$0xf]  ;;  %v6134_v54 = vor.u32 %v6893_v49, %v6133_v48  ;;  %3453 = vmatpush.bf16.msrb.mxu1 %v5878_v53 }
  0x7b   : > { %v6957_v51 = vld [vmem:[%s7379_s6 + $0xf9c] sm:$0xf0] }
  0x7c   : > { %v5589_v55 = vld [vmem:[%s7379_s6 + $0x940] sm:$0xf]  ;;  %v6390_v58 = vor.u32 %v6957_v51, %v6389_v50  ;;  %3466 = vmatpush.bf16.msrb.mxu2 %v6134_v54 }
  0x7d   : > { %v6757_v56 = vld [vmem:[%s7379_s6 + $0x95c] sm:$0xf0] }
  0x7e   : > { %v5845_v57 = vld [vmem:[%s7379_s6 + $0xb40] sm:$0xf]  ;;  %v5590_v0 = vor.u32 %v6757_v56, %v5589_v55  ;;  %3479 = vmatpush.bf16.msrb.mxu3 %v6390_v58 }
  0x7f   : > { %v6821_v59 = vld [vmem:[%s7379_s6 + $0xb5c] sm:$0xf0] }
  0x80   : > { %v6101_v60 = vld [vmem:[%s7379_s6 + $0xd40] sm:$0xf]  ;;  %v5846_v3 = vor.u32 %v6821_v59, %v5845_v57  ;;  %3441 = vmatpush.bf16.msrb.mxu0 %v5590_v0 }
  0x81   : > { %v6885_v61 = vld [vmem:[%s7379_s6 + $0xd5c] sm:$0xf0] }
  0x82   : > { %v6357_v62 = vld [vmem:[%s7379_s6 + $0xf40] sm:$0xf]  ;;  %v6102_v4 = vor.u32 %v6885_v61, %v6101_v60  ;;  %3454 = vmatpush.bf16.msrb.mxu1 %v5846_v3 }
  0x83   : > { %v6949_v63 = vld [vmem:[%s7379_s6 + $0xf5c] sm:$0xf0] }
  0x84   : > { %v5557_v1 = vld [vmem:[%s7379_s6 + $0x900] sm:$0xf]  ;;  %v6358_v7 = vor.u32 %v6949_v63, %v6357_v62  ;;  %3467 = vmatpush.bf16.msrb.mxu2 %v6102_v4 }
  0x85   : > { %v6749_v5 = vld [vmem:[%s7379_s6 + $0x91c] sm:$0xf0] }
  0x86   : > { %v5813_v6 = vld [vmem:[%s7379_s6 + $0xb00] sm:$0xf]  ;;  %v5558_v13 = vor.u32 %v6749_v5, %v5557_v1  ;;  %3480 = vmatpush.bf16.msrb.mxu3 %v6358_v7  ;;  %v4631_v7 = vld [vmem:[%s7379_s6 + $0x1e0] sm:$0xf0] }
  0x87   : > { %v6813_v8 = vld [vmem:[%s7379_s6 + $0xb1c] sm:$0xf0] }
  0x88   : > { %v6069_v9 = vld [vmem:[%s7379_s6 + $0xd00] sm:$0xf]  ;;  %v5814_v15 = vor.u32 %v6813_v8, %v5813_v6  ;;  %3442 = vmatpush.bf16.msrb.mxu0 %v5558_v13  ;;  %v6513_v6 = vld [vmem:[%s7379_s6 + $0x1c4] sm:$0xf] }
  0x89   : > { %v6877_v10 = vld [vmem:[%s7379_s6 + $0xd1c] sm:$0xf0]  ;;  %v6577_v8 = vld [vmem:[%s7379_s6 + $0x3c4] sm:$0xf] }
  0x8a   : > { %v6325_v11 = vld [vmem:[%s7379_s6 + $0xf00] sm:$0xf]  ;;  %v6070_v16 = vor.u32 %v6877_v10, %v6069_v9  ;;  %3455 = vmatpush.bf16.msrb.mxu1 %v5814_v15  ;;  %v4887_v9 = vld [vmem:[%s7379_s6 + $0x3e0] sm:$0xf0] }
  0x8b   : > { %v6941_v12 = vld [vmem:[%s7379_s6 + $0xf1c] sm:$0xf0]  ;;  %v6641_v10 = vld [vmem:[%s7379_s6 + $0x5c4] sm:$0xf] }
  0x8c   : > { %v5525_v14 = vld [vmem:[%s7379_s6 + $0x8c0] sm:$0xf]  ;;  %v6326_v20 = vor.u32 %v6941_v12, %v6325_v11  ;;  %3468 = vmatpush.bf16.msrb.mxu2 %v6070_v16  ;;  %v5143_v12 = vld [vmem:[%s7379_s6 + $0x5e0] sm:$0xf0] }
  0x8d   : > { %v6741_v17 = vld [vmem:[%s7379_s6 + $0x8dc] sm:$0xf0]  ;;  %v6705_v13 = vld [vmem:[%s7379_s6 + $0x7c4] sm:$0xf] }
  0x8e   : > { %v5781_v18 = vld [vmem:[%s7379_s6 + $0xac0] sm:$0xf]  ;;  %v5526_v27 = vor.u32 %v6741_v17, %v5525_v14  ;;  %3481 = vmatpush.bf16.msrb.mxu3 %v6326_v20  ;;  %v5399_v14 = vld [vmem:[%s7379_s6 + $0x7e0] sm:$0xf0] }
  0x8f   : > { %v6805_v19 = vld [vmem:[%s7379_s6 + $0xadc] sm:$0xf0]  ;;  %v6505_v17 = vld [vmem:[%s7379_s6 + $0x184] sm:$0xf] }
  0x90   : > { %v6037_v21 = vld [vmem:[%s7379_s6 + $0xcc0] sm:$0xf]  ;;  %v5782_v28 = vor.u32 %v6805_v19, %v5781_v18  ;;  %3443 = vmatpush.bf16.msrb.mxu0 %v5526_v27  ;;  %v4599_v18 = vld [vmem:[%s7379_s6 + $0x1a0] sm:$0xf0] }
  0x91   : > { %v6869_v22 = vld [vmem:[%s7379_s6 + $0xcdc] sm:$0xf0]  ;;  %v279_v19 = vld.sshfl [vmem:[#allocation1 + $0x30] sm:$0xff pattern:$0x73625140] }
  0x92   : > { %v6293_v23 = vld [vmem:[%s7379_s6 + $0xec0] sm:$0xf]  ;;  %v6038_v32 = vor.u32 %v6869_v22, %v6037_v21  ;;  %3456 = vmatpush.bf16.msrb.mxu1 %v5782_v28  ;;  %v4634_v21 = vor.u32 %v6513_v6, %v4631_v7  ;;  %v277_v22 = vld.sshfl [vmem:[#allocation1 + $0x20] sm:$0xff pattern:$0x73625140]  ;;  %v5402_v28 = vor.u32 %v6705_v13, %v5399_v14 }
  0x93   : > { %v6933_v24 = vld [vmem:[%s7379_s6 + $0xedc] sm:$0xf0]  ;;  %v278_v27 = vld.sshfl [vmem:[#allocation1 + $0x28] sm:$0xff pattern:$0x73625140] }
  0x94   : > { %v5493_v25 = vld [vmem:[%s7379_s6 + $0x880] sm:$0xf]  ;;  %v6294_v37 = vor.u32 %v6933_v24, %v6293_v23  ;;  %3469 = vmatpush.bf16.msrb.mxu2 %v6038_v32  ;;  %v4890_v24 = vor.u32 %v6577_v8, %v4887_v9  ;;  %v7539_v32 = vpack.c.bf16 %v279_v19, %v279_v19  ;;  %v4503_v6 = vld [vmem:[%s7379_s6 + $0xe0] sm:$0xf0] }
  0x95   : > { %v6733_v26 = vld [vmem:[%s7379_s6 + $0x89c] sm:$0xf0]  ;;  %v6545_v7 = vld [vmem:[%s7379_s6 + $0x2c4] sm:$0xf] }
  0x96   : > { %v5749_v29 = vld [vmem:[%s7379_s6 + $0xa80] sm:$0xf]  ;;  %v5494_v45 = vor.u32 %v6733_v26, %v5493_v25  ;;  %3482 = vmatpush.bf16.msrb.mxu3 %v6294_v37  ;;  %v5146_v25 = vor.u32 %v6641_v10, %v5143_v12  ;;  %v6569_v26 = vld [vmem:[%s7379_s6 + $0x384] sm:$0xf]  ;;  %v7543_v37 = vpack.c.bf16 %v277_v22, %v277_v22 }
  0x97   : > { %v276_v35 = vld.sshfl [vmem:[#allocation1 + $0x18] sm:$0xff pattern:$0x73625140] }
  0x98   : > { %v6797_v38 = vld [vmem:[%s7379_s6 + $0xa9c] sm:$0xf0]  ;;  %v7499_v41 = vpack.c.bf16 %v276_v35, %v276_v35  ;;  %3444 = vmatpush.bf16.msrb.mxu0 %v5494_v45  ;;  %v6697_v35 = vld [vmem:[%s7379_s6 + $0x784] sm:$0xf] }
  0x99   : > { %v6005_v39 = vld [vmem:[%s7379_s6 + $0xc80] sm:$0xf]  ;;  %v5750_v48 = vor.u32 %v6797_v38, %v5749_v29  ;;  %v4855_v29 = vld [vmem:[%s7379_s6 + $0x3a0] sm:$0xf0] }
  0x9a   : > { %v6861_v40 = vld [vmem:[%s7379_s6 + $0xc9c] sm:$0xf0]  ;;  %3434 = vmatmul.bf16.vlgmr.msra.gmra.mxu3 %v7499_v41  ;;  %v6497_v45 = vld [vmem:[%s7379_s6 + $0x144] sm:$0xf] }
  0x9b   : > { %v6261_v43 = vld [vmem:[%s7379_s6 + $0xe80] sm:$0xf]  ;;  %v6006_v49 = vor.u32 %v6861_v40, %v6005_v39  ;;  %3457 = vmatpush.bf16.msrb.mxu1 %v5750_v48  ;;  %v4602_v39 = vor.u32 %v6505_v17, %v4599_v18  ;;  %v7547_v40 = vpack.c.bf16 %v278_v27, %v278_v27  ;;  %v5370_v48 = vor.u32 %v6697_v35, %v5367_v36  ;;  %v4759_v9 = vld [vmem:[%s7379_s6 + $0x2e0] sm:$0xf0] }
  0x9c   : > { %v6925_v44 = vld [vmem:[%s7379_s6 + $0xe9c] sm:$0xf0]  ;;  %v6609_v10 = vld [vmem:[%s7379_s6 + $0x4c4] sm:$0xf] }
  0x9d   : > { %v5461_v46 = vld [vmem:[%s7379_s6 + $0x840] sm:$0xf]  ;;  %v6262_v53 = vor.u32 %v6925_v44, %v6261_v43  ;;  %3470 = vmatpush.bf16.msrb.mxu2 %v6006_v49  ;;  %v4858_v43 = vor.u32 %v6569_v26, %v4855_v29  ;;  %v5114_v44 = vor.u32 %v6633_v30, %v5111_v31  ;;  %v4823_v49 = vld [vmem:[%s7379_s6 + $0x360] sm:$0xf0] }
  0x9e   : > { %v6725_v47 = vld [vmem:[%s7379_s6 + $0x85c] sm:$0xf0]  ;;  %v6673_v12 = vld [vmem:[%s7379_s6 + $0x6c4] sm:$0xf] }
  0x9f   : > { %v5717_v50 = vld [vmem:[%s7379_s6 + $0xa40] sm:$0xf]  ;;  %v5462_v59 = vor.u32 %v6725_v47, %v5461_v46  ;;  %3483 = vmatpush.bf16.msrb.mxu3 %v6262_v53  ;;  %v4567_v46 = vld [vmem:[%s7379_s6 + $0x160] sm:$0xf0] }
  0xa0   : > { %v6789_v51 = vld [vmem:[%s7379_s6 + $0xa5c] sm:$0xf0]  ;;  %v6561_v47 = vld [vmem:[%s7379_s6 + $0x344] sm:$0xf] }
  0xa1   : > { %v5973_v54 = vld [vmem:[%s7379_s6 + $0xc40] sm:$0xf]  ;;  %v5718_v63 = vor.u32 %v6789_v51, %v5717_v50  ;;  %3445 = vmatpush.bf16.msrb.mxu0 %v5462_v59  ;;  %v6625_v50 = vld [vmem:[%s7379_s6 + $0x544] sm:$0xf] }
  0xa2   : > { %v6853_v55 = vld [vmem:[%s7379_s6 + $0xc5c] sm:$0xf0]  ;;  %v5079_v51 = vld [vmem:[%s7379_s6 + $0x560] sm:$0xf0] }
  0xa3   : > { %v6229_v56 = vld [vmem:[%s7379_s6 + $0xe40] sm:$0xf]  ;;  %v5974_v0 = vor.u32 %v6853_v55, %v5973_v54  ;;  %3458 = vmatpush.bf16.msrb.mxu1 %v5718_v63  ;;  %v5335_v53 = vld [vmem:[%s7379_s6 + $0x760] sm:$0xf0]  ;;  %v4570_v54 = vor.u32 %v6497_v45, %v4567_v46  ;;  %v4826_v55 = vor.u32 %v6561_v47, %v4823_v49 }
  0xa4   : > { %v6917_v57 = vld [vmem:[%s7379_s6 + $0xe5c] sm:$0xf0]  ;;  %v6553_v59 = vld [vmem:[%s7379_s6 + $0x304] sm:$0xf] }
  0xa5   : > { %v5429_v58 = vld [vmem:[%s7379_s6 + $0x800] sm:$0xf]  ;;  %v6230_v4 = vor.u32 %v6917_v57, %v6229_v56  ;;  %3471 = vmatpush.bf16.msrb.mxu2 %v5974_v0  ;;  %v5082_v56 = vor.u32 %v6625_v50, %v5079_v51  ;;  %v6489_v57 = vld [vmem:[%s7379_s6 + $0x104] sm:$0xf] }
  0xa6   : > { %v6717_v60 = vld [vmem:[%s7379_s6 + $0x81c] sm:$0xf0]  ;;  %v5047_v63 = vld [vmem:[%s7379_s6 + $0x520] sm:$0xf0] }
  0xa7   : > { %v5685_v61 = vld [vmem:[%s7379_s6 + $0xa00] sm:$0xf]  ;;  %v5430_v11 = vor.u32 %v6717_v60, %v5429_v58  ;;  %3484 = vmatpush.bf16.msrb.mxu3 %v6230_v4  ;;  %v4535_v58 = vld [vmem:[%s7379_s6 + $0x120] sm:$0xf0]  ;;  %v5338_v60 = vor.u32 %v6689_v52, %v5335_v53 }
  0xa8   : > { %v6781_v62 = vld [vmem:[%s7379_s6 + $0xa1c] sm:$0xf0]  ;;  %v6681_v0 = vld [vmem:[%s7379_s6 + $0x704] sm:$0xf] }
  0xa9   : > { %v5941_v1 = vld [vmem:[%s7379_s6 + $0xc00] sm:$0xf]  ;;  %v5686_v15 = vor.u32 %v6781_v62, %v5685_v61  ;;  %3446 = vmatpush.bf16.msrb.mxu0 %v5430_v11  ;;  %v4791_v61 = vld [vmem:[%s7379_s6 + $0x320] sm:$0xf0] }
  0xaa   : > { %v6845_v2 = vld [vmem:[%s7379_s6 + $0xc1c] sm:$0xf0]  ;;  %v6617_v62 = vld [vmem:[%s7379_s6 + $0x504] sm:$0xf] }
  0xab   : > { %v6197_v3 = vld [vmem:[%s7379_s6 + $0xe00] sm:$0xf]  ;;  %v5942_v16 = vor.u32 %v6845_v2, %v5941_v1  ;;  %3459 = vmatpush.bf16.msrb.mxu1 %v5686_v15  ;;  %v5303_v1 = vld [vmem:[%s7379_s6 + $0x720] sm:$0xf0]  ;;  %v4538_v2 = vor.u32 %v6489_v57, %v4535_v58  ;;  %v5050_v4 = vor.u32 %v6617_v62, %v5047_v63  ;;  %v4762_v15 = vor.u32 %v6545_v7, %v4759_v9 }
  0xac   : > { %v6909_v5 = vld [vmem:[%s7379_s6 + $0xe1c] sm:$0xf0]  ;;  %3447 = vmatmul.bf16.vlgmr.msrb.gmra.mxu0 %v7543_v37  ;;  %v5306_v8 = vor.u32 %v6681_v0, %v5303_v1  ;;  %v5015_v11 = vld [vmem:[%s7379_s6 + $0x4e0] sm:$0xf0] }
  0xad   : > { %v6198_v20 = vor.u32 %v6909_v5, %v6197_v3  ;;  %v280_v23 = vld.sshfl [vmem:[#allocation1 + $0x38] sm:$0xff pattern:$0x73625140]  ;;  %3472 = vmatpush.bf16.msrb.mxu2 %v5942_v16  ;;  %3491 = vmatpush.bf16.msra.mxu0 %v4634_v21  ;;  %v4794_v3 = vor.u32 %v6553_v59, %v4791_v61  ;;  %v5018_v16 = vor.u32 %v6609_v10, %v5015_v11 }
  0xae   : > { %v7545_v38 = vpack.c.bf16 %v280_v23, %v280_v23  ;;  %3460 = vmatmul.bf16.vlgmr.msrb.gmra.mxu1 %v7547_v40  ;;  %v6481_v5 = vld [vmem:[%s7379_s6 + $0xc4] sm:$0xf] }
  0xaf   : > { %3485 = vmatpush.bf16.msrb.mxu3 %v6198_v20  ;;  %3504 = vmatpush.bf16.msra.mxu1 %v4890_v24  ;;  %v5271_v13 = vld [vmem:[%s7379_s6 + $0x6e0] sm:$0xf0]  ;;  %v4506_v14 = vor.u32 %v6481_v5, %v4503_v6 }
  0xb0   : > { %3473 = vmatmul.bf16.vlgmr.msrb.gmra.mxu2 %v7539_v32  ;;  %v6473_v17 = vld [vmem:[%s7379_s6 + $0x84] sm:$0xf]  ;;  %v5274_v20 = vor.u32 %v6673_v12, %v5271_v13 }
  0xb1   : > { %3517 = vmatpush.bf16.msra.mxu2 %v5146_v25  ;;  %3492 = vmatpush.bf16.msra.mxu0 %v4602_v39  ;;  %v4471_v18 = vld [vmem:[%s7379_s6 + $0xa0] sm:$0xf0] }
  0xb2   : > { %3486 = vmatmul.bf16.vlgmr.msrb.gmra.mxu3 %v7545_v38  ;;  %v6537_v19 = vld [vmem:[%s7379_s6 + $0x284] sm:$0xf]  ;;  %v4474_v26 = vor.u32 %v6473_v17, %v4471_v18 }
  0xb3   : > { %3530 = vmatpush.bf16.msra.mxu3 %v5402_v28  ;;  %3505 = vmatpush.bf16.msra.mxu1 %v4858_v43  ;;  %v4727_v21 = vld [vmem:[%s7379_s6 + $0x2a0] sm:$0xf0] }
  0xb4   : > { %v6601_v22 = vld [vmem:[%s7379_s6 + $0x484] sm:$0xf]  ;;  %v4730_v27 = vor.u32 %v6537_v19, %v4727_v21 }
  0xb5   : > { %3518 = vmatpush.bf16.msra.mxu2 %v5114_v44  ;;  %3493 = vmatpush.bf16.msra.mxu0 %v4570_v54  ;;  %v4983_v23 = vld [vmem:[%s7379_s6 + $0x4a0] sm:$0xf0] }
  0xb6   : > { %v6665_v24 = vld [vmem:[%s7379_s6 + $0x684] sm:$0xf]  ;;  %v4986_v28 = vor.u32 %v6601_v22, %v4983_v23 }
  0xb7   : > { %3531 = vmatpush.bf16.msra.mxu3 %v5370_v48  ;;  %3506 = vmatpush.bf16.msra.mxu1 %v4826_v55  ;;  %v5239_v25 = vld [vmem:[%s7379_s6 + $0x6a0] sm:$0xf0] }
  0xb8   : > { %v6465_v29 = vld [vmem:[%s7379_s6 + $0x44] sm:$0xf]  ;;  %v5242_v35 = vor.u32 %v6665_v24, %v5239_v25 }
  0xb9   : > { %3519 = vmatpush.bf16.msra.mxu2 %v5082_v56  ;;  %3494 = vmatpush.bf16.msra.mxu0 %v4538_v2  ;;  %v4439_v30 = vld [vmem:[%s7379_s6 + $0x60] sm:$0xf0] }
  0xba   : > { %v6529_v31 = vld [vmem:[%s7379_s6 + $0x244] sm:$0xf]  ;;  %v4442_v46 = vor.u32 %v6465_v29, %v4439_v30 }
  0xbb   : > { %3532 = vmatpush.bf16.msra.mxu3 %v5338_v60  ;;  %3507 = vmatpush.bf16.msra.mxu1 %v4794_v3  ;;  %v4695_v36 = vld [vmem:[%s7379_s6 + $0x260] sm:$0xf0] }
  0xbc   : > { %v6593_v39 = vld [vmem:[%s7379_s6 + $0x444] sm:$0xf]  ;;  %v4698_v49 = vor.u32 %v6529_v31, %v4695_v36 }
  0xbd   : > { %3520 = vmatpush.bf16.msra.mxu2 %v5050_v4  ;;  %3495 = vmatpush.bf16.msra.mxu0 %v4506_v14  ;;  %v4951_v43 = vld [vmem:[%s7379_s6 + $0x460] sm:$0xf0] }
  0xbe   : > { %v6657_v44 = vld [vmem:[%s7379_s6 + $0x644] sm:$0xf]  ;;  %v4954_v50 = vor.u32 %v6593_v39, %v4951_v43 }
  0xbf   : > { %3533 = vmatpush.bf16.msra.mxu3 %v5306_v8  ;;  %3508 = vmatpush.bf16.msra.mxu1 %v4762_v15  ;;  %v5207_v45 = vld [vmem:[%s7379_s6 + $0x660] sm:$0xf0] }
  0xc0   : > { %v6457_v47 = vld [vmem:[%s7379_s6 + $0x4] sm:$0xf]  ;;  %v5210_v54 = vor.u32 %v6657_v44, %v5207_v45 }
  0xc1   : > { %3521 = vmatpush.bf16.msra.mxu2 %v5018_v16  ;;  %3496 = vmatpush.bf16.msra.mxu0 %v4474_v26  ;;  %v4407_v48 = vld [vmem:[%s7379_s6 + $0x20] sm:$0xf0] }
  0xc2   : > { %v6521_v51 = vld [vmem:[%s7379_s6 + $0x204] sm:$0xf]  ;;  %v4410_v61 = vor.u32 %v6457_v47, %v4407_v48 }
  0xc3   : > { %3534 = vmatpush.bf16.msra.mxu3 %v5274_v20  ;;  %3509 = vmatpush.bf16.msra.mxu1 %v4730_v27  ;;  %v4663_v52 = vld [vmem:[%s7379_s6 + $0x220] sm:$0xf0] }
  0xc4   : > { %v6585_v53 = vld [vmem:[%s7379_s6 + $0x404] sm:$0xf]  ;;  %v4666_v1 = vor.u32 %v6521_v51, %v4663_v52 }
  0xc5   : > { %3522 = vmatpush.bf16.msra.mxu2 %v4986_v28  ;;  %v4919_v55 = vld [vmem:[%s7379_s6 + $0x420] sm:$0xf0]  ;;  %3497 = vmatpush.bf16.msra.mxu0 %v4442_v46 }
  0xc6   : > { %v6649_v56 = vld [vmem:[%s7379_s6 + $0x604] sm:$0xf]  ;;  %v4922_v2 = vor.u32 %v6585_v53, %v4919_v55 }
  0xc7   : > { %3535 = vmatpush.bf16.msra.mxu3 %v5242_v35  ;;  %v5175_v57 = vld [vmem:[%s7379_s6 + $0x620] sm:$0xf0]  ;;  %3510 = vmatpush.bf16.msra.mxu1 %v4698_v49 }
  0xc8   : > { %v6769_v58 = vld [vmem:[%s7379_s6 + $0x9c4] sm:$0xf]  ;;  %v5178_v5 = vor.u32 %v6649_v56, %v5175_v57 }
  0xc9   : > { %v5655_v59 = vld [vmem:[%s7379_s6 + $0x9e0] sm:$0xf0]  ;;  %3523 = vmatpush.bf16.msra.mxu2 %v4954_v50  ;;  %3498 = vmatpush.bf16.msra.mxu0 %v4410_v61 }
  0xca   : > { %v6833_v60 = vld [vmem:[%s7379_s6 + $0xbc4] sm:$0xf]  ;;  %v5658_v6 = vor.u32 %v6769_v58, %v5655_v59 }
  0xcb   : > { %v5911_v62 = vld [vmem:[%s7379_s6 + $0xbe0] sm:$0xf0]  ;;  %3536 = vmatpush.bf16.msra.mxu3 %v5210_v54  ;;  %3511 = vmatpush.bf16.msra.mxu1 %v4666_v1 }
  0xcc   : > { %v6897_v63 = vld [vmem:[%s7379_s6 + $0xdc4] sm:$0xf]  ;;  %v5914_v7 = vor.u32 %v6833_v60, %v5911_v62  ;;  %3499 = vmatmul.bf16.vlgmr.msra.gmra.mxu0 %v7494_v34 }
  0xcd   : > { %v6167_v0 = vld [vmem:[%s7379_s6 + $0xde0] sm:$0xf0]  ;;  %3524 = vmatpush.bf16.msra.mxu2 %v4922_v2  ;;  %3543 = vmatpush.bf16.msrb.mxu0 %v5658_v6 }
  0xce   : > { %v6961_v3 = vld [vmem:[%s7379_s6 + $0xfc4] sm:$0xf]  ;;  %v6170_v8 = vor.u32 %v6897_v63, %v6167_v0  ;;  %3512 = vmatmul.bf16.vlgmr.msra.gmra.mxu1 %v7501_v42 }
  0xcf   : > { %v6423_v4 = vld [vmem:[%s7379_s6 + $0xfe0] sm:$0xf0]  ;;  %3537 = vmatpush.bf16.msra.mxu3 %v5178_v5  ;;  %3556 = vmatpush.bf16.msrb.mxu1 %v5914_v7 }
  0xd0   : > { %v6761_v9 = vld [vmem:[%s7379_s6 + $0x984] sm:$0xf]  ;;  %v6426_v12 = vor.u32 %v6961_v3, %v6423_v4  ;;  %3525 = vmatmul.bf16.vlgmr.msra.gmra.mxu2 %v7492_v33 }
  0xd1   : > { %v5623_v10 = vld [vmem:[%s7379_s6 + $0x9a0] sm:$0xf0]  ;;  %3569 = vmatpush.bf16.msrb.mxu2 %v6170_v8 }
  0xd2   : > { %v6825_v11 = vld [vmem:[%s7379_s6 + $0xb84] sm:$0xf]  ;;  %v5626_v18 = vor.u32 %v6761_v9, %v5623_v10  ;;  %3538 = vmatmul.bf16.vlgmr.msra.gmra.mxu3 %v7499_v41 }
  0xd3   : > { %v5879_v13 = vld [vmem:[%s7379_s6 + $0xba0] sm:$0xf0]  ;;  %3582 = vmatpush.bf16.msrb.mxu3 %v6426_v12 }
  0xd4   : > { %v6889_v14 = vld [vmem:[%s7379_s6 + $0xd84] sm:$0xf]  ;;  %v5882_v19 = vor.u32 %v6825_v11, %v5879_v13  ;;  %3544 = vmatpush.bf16.msrb.mxu0 %v5626_v18 }
  0xd5   : > { %v6135_v15 = vld [vmem:[%s7379_s6 + $0xda0] sm:$0xf0] }
  0xd6   : > { %v6953_v16 = vld [vmem:[%s7379_s6 + $0xf84] sm:$0xf]  ;;  %v6138_v20 = vor.u32 %v6889_v14, %v6135_v15  ;;  %3557 = vmatpush.bf16.msrb.mxu1 %v5882_v19 }
  0xd7   : > { %v6391_v17 = vld [vmem:[%s7379_s6 + $0xfa0] sm:$0xf0] }
  0xd8   : > { %v6753_v21 = vld [vmem:[%s7379_s6 + $0x944] sm:$0xf]  ;;  %v6394_v24 = vor.u32 %v6953_v16, %v6391_v17  ;;  %3570 = vmatpush.bf16.msrb.mxu2 %v6138_v20 }
  0xd9   : > { %v5591_v22 = vld [vmem:[%s7379_s6 + $0x960] sm:$0xf0] }
  0xda   : > { %v6817_v23 = vld [vmem:[%s7379_s6 + $0xb44] sm:$0xf]  ;;  %v5594_v30 = vor.u32 %v6753_v21, %v5591_v22  ;;  %3583 = vmatpush.bf16.msrb.mxu3 %v6394_v24 }
  0xdb   : > { %v5847_v25 = vld [vmem:[%s7379_s6 + $0xb60] sm:$0xf0] }
  0xdc   : > { %v6881_v26 = vld [vmem:[%s7379_s6 + $0xd44] sm:$0xf]  ;;  %v5850_v31 = vor.u32 %v6817_v23, %v5847_v25  ;;  %3545 = vmatpush.bf16.msrb.mxu0 %v5594_v30 }
  0xdd   : > { %v6103_v27 = vld [vmem:[%s7379_s6 + $0xd60] sm:$0xf0] }
  0xde   : > { %v6945_v28 = vld [vmem:[%s7379_s6 + $0xf44] sm:$0xf]  ;;  %v6106_v35 = vor.u32 %v6881_v26, %v6103_v27  ;;  %3558 = vmatpush.bf16.msrb.mxu1 %v5850_v31 }
  0xdf   : > { %v6359_v29 = vld [vmem:[%s7379_s6 + $0xf60] sm:$0xf0] }
  0xe0   : > { %v6745_v36 = vld [vmem:[%s7379_s6 + $0x904] sm:$0xf]  ;;  %v6362_v44 = vor.u32 %v6945_v28, %v6359_v29  ;;  %3571 = vmatpush.bf16.msrb.mxu2 %v6106_v35 }
  0xe1   : > { %v5559_v39 = vld [vmem:[%s7379_s6 + $0x920] sm:$0xf0] }
  0xe2   : > { %v6809_v43 = vld [vmem:[%s7379_s6 + $0xb04] sm:$0xf]  ;;  %v5562_v50 = vor.u32 %v6745_v36, %v5559_v39  ;;  %3584 = vmatpush.bf16.msrb.mxu3 %v6362_v44  ;;  %v4637_v39 = vld [vmem:[%s7379_s6 + $0x1c8] sm:$0xf] }
  0xe3   : > { %v5815_v45 = vld [vmem:[%s7379_s6 + $0xb20] sm:$0xf0]  ;;  %v4893_v44 = vld [vmem:[%s7379_s6 + $0x3c8] sm:$0xf] }
  0xe4   : > { %v6873_v46 = vld [vmem:[%s7379_s6 + $0xd04] sm:$0xf]  ;;  %v5818_v51 = vor.u32 %v6809_v43, %v5815_v45  ;;  %3546 = vmatpush.bf16.msrb.mxu0 %v5562_v50  ;;  %v6518_v43 = vld [vmem:[%s7379_s6 + $0x1e4] sm:$0xf0] }
  0xe5   : > { %v6071_v47 = vld [vmem:[%s7379_s6 + $0xd20] sm:$0xf0] }
  0xe6   : > { %v6937_v48 = vld [vmem:[%s7379_s6 + $0xf04] sm:$0xf]  ;;  %v6074_v52 = vor.u32 %v6873_v46, %v6071_v47  ;;  %3559 = vmatpush.bf16.msrb.mxu1 %v5818_v51  ;;  %v6582_v46 = vld [vmem:[%s7379_s6 + $0x3e4] sm:$0xf0] }
  0xe7   : > { %v6327_v49 = vld [vmem:[%s7379_s6 + $0xf20] sm:$0xf0]  ;;  %v5149_v47 = vld [vmem:[%s7379_s6 + $0x5c8] sm:$0xf] }
  0xe8   : > { %v6737_v53 = vld [vmem:[%s7379_s6 + $0x8c4] sm:$0xf]  ;;  %v6330_v56 = vor.u32 %v6937_v48, %v6327_v49  ;;  %3572 = vmatpush.bf16.msrb.mxu2 %v6074_v52  ;;  %v6646_v48 = vld [vmem:[%s7379_s6 + $0x5e4] sm:$0xf0] }
  0xe9   : > { %v5527_v54 = vld [vmem:[%s7379_s6 + $0x8e0] sm:$0xf0]  ;;  %v5405_v51 = vld [vmem:[%s7379_s6 + $0x7c8] sm:$0xf] }
  0xea   : > { %v6801_v55 = vld [vmem:[%s7379_s6 + $0xac4] sm:$0xf]  ;;  %v5530_v62 = vor.u32 %v6737_v53, %v5527_v54  ;;  %3585 = vmatpush.bf16.msrb.mxu3 %v6330_v56  ;;  %v6710_v52 = vld [vmem:[%s7379_s6 + $0x7e4] sm:$0xf0]  ;;  %v4638_v54 = vor.u32 %v6518_v43, %v4637_v39  ;;  %v5150_v56 = vor.u32 %v6646_v48, %v5149_v47 }
  0xeb   : > { %v5783_v57 = vld [vmem:[%s7379_s6 + $0xae0] sm:$0xf0]  ;;  %v5021_v39 = vld [vmem:[%s7379_s6 + $0x4c8] sm:$0xf] }
  0xec   : > { %v6865_v58 = vld [vmem:[%s7379_s6 + $0xcc4] sm:$0xf]  ;;  %v5786_v63 = vor.u32 %v6801_v55, %v5783_v57  ;;  %3547 = vmatpush.bf16.msrb.mxu0 %v5530_v62  ;;  %v4894_v55 = vor.u32 %v6582_v46, %v4893_v44  ;;  %v4605_v57 = vld [vmem:[%s7379_s6 + $0x188] sm:$0xf] }
  0xed   : > { %v6039_v59 = vld [vmem:[%s7379_s6 + $0xce0] sm:$0xf0]  ;;  %v5117_v62 = vld [vmem:[%s7379_s6 + $0x588] sm:$0xf] }
  0xee   : > { %v6929_v60 = vld [vmem:[%s7379_s6 + $0xec4] sm:$0xf]  ;;  %v6042_v0 = vor.u32 %v6865_v58, %v6039_v59  ;;  %3560 = vmatpush.bf16.msrb.mxu1 %v5786_v63  ;;  %v6510_v58 = vld [vmem:[%s7379_s6 + $0x1a4] sm:$0xf0] }
  0xef   : > { %v6295_v61 = vld [vmem:[%s7379_s6 + $0xee0] sm:$0xf0]  ;;  %v4861_v59 = vld [vmem:[%s7379_s6 + $0x388] sm:$0xf] }
  0xf0   : > { %v6729_v1 = vld [vmem:[%s7379_s6 + $0x884] sm:$0xf]  ;;  %v6298_v4 = vor.u32 %v6929_v60, %v6295_v61  ;;  %3573 = vmatpush.bf16.msrb.mxu2 %v6042_v0  ;;  %v5406_v60 = vor.u32 %v6710_v52, %v5405_v51  ;;  %v6574_v61 = vld [vmem:[%s7379_s6 + $0x3a4] sm:$0xf0] }
  0xf1   : > { %v5495_v2 = vld [vmem:[%s7379_s6 + $0x8a0] sm:$0xf0]  ;;  %v6638_v63 = vld [vmem:[%s7379_s6 + $0x5a4] sm:$0xf0] }
  0xf2   : > { %v6793_v3 = vld [vmem:[%s7379_s6 + $0xa84] sm:$0xf]  ;;  %v5498_v10 = vor.u32 %v6729_v1, %v5495_v2  ;;  %3586 = vmatpush.bf16.msrb.mxu3 %v6298_v4  ;;  %v5373_v0 = vld [vmem:[%s7379_s6 + $0x788] sm:$0xf]  ;;  %v4606_v2 = vor.u32 %v6510_v58, %v4605_v57  ;;  %v5118_v4 = vor.u32 %v6638_v63, %v5117_v62 }
  0xf3   : > { %v5751_v5 = vld [vmem:[%s7379_s6 + $0xaa0] sm:$0xf0]  ;;  %v6702_v1 = vld [vmem:[%s7379_s6 + $0x7a4] sm:$0xf0] }
  0xf4   : > { %v6857_v6 = vld [vmem:[%s7379_s6 + $0xc84] sm:$0xf]  ;;  %v5754_v11 = vor.u32 %v6793_v3, %v5751_v5  ;;  %3548 = vmatpush.bf16.msrb.mxu0 %v5498_v10  ;;  %v4862_v3 = vor.u32 %v6574_v61, %v4861_v59  ;;  %v4573_v5 = vld [vmem:[%s7379_s6 + $0x148] sm:$0xf] }
  0xf5   : > { %v6007_v7 = vld [vmem:[%s7379_s6 + $0xca0] sm:$0xf0]  ;;  %v5085_v10 = vld [vmem:[%s7379_s6 + $0x548] sm:$0xf] }
  0xf6   : > { %v6921_v8 = vld [vmem:[%s7379_s6 + $0xe84] sm:$0xf]  ;;  %v6010_v12 = vor.u32 %v6857_v6, %v6007_v7  ;;  %3561 = vmatpush.bf16.msrb.mxu1 %v5754_v11  ;;  %v6502_v6 = vld [vmem:[%s7379_s6 + $0x164] sm:$0xf0] }
  0xf7   : > { %v6263_v9 = vld [vmem:[%s7379_s6 + $0xea0] sm:$0xf0]  ;;  %v4829_v7 = vld [vmem:[%s7379_s6 + $0x348] sm:$0xf] }
  0xf8   : > { %v6721_v13 = vld [vmem:[%s7379_s6 + $0x844] sm:$0xf]  ;;  %v6266_v16 = vor.u32 %v6921_v8, %v6263_v9  ;;  %3574 = vmatpush.bf16.msrb.mxu2 %v6010_v12  ;;  %v5374_v8 = vor.u32 %v6702_v1, %v5373_v0  ;;  %v6566_v9 = vld [vmem:[%s7379_s6 + $0x364] sm:$0xf0] }
  0xf9   : > { %v5463_v14 = vld [vmem:[%s7379_s6 + $0x860] sm:$0xf0]  ;;  %v6630_v11 = vld [vmem:[%s7379_s6 + $0x564] sm:$0xf0] }
  0xfa   : > { %v6785_v15 = vld [vmem:[%s7379_s6 + $0xa44] sm:$0xf]  ;;  %v5466_v22 = vor.u32 %v6721_v13, %v5463_v14  ;;  %3587 = vmatpush.bf16.msrb.mxu3 %v6266_v16  ;;  %v5341_v12 = vld [vmem:[%s7379_s6 + $0x748] sm:$0xf]  ;;  %v4574_v14 = vor.u32 %v6502_v6, %v4573_v5  ;;  %v5086_v16 = vor.u32 %v6630_v11, %v5085_v10 }
  0xfb   : > { %v5719_v17 = vld [vmem:[%s7379_s6 + $0xa60] sm:$0xf0]  ;;  %v6694_v13 = vld [vmem:[%s7379_s6 + $0x764] sm:$0xf0] }
  0xfc   : > { %v6849_v18 = vld [vmem:[%s7379_s6 + $0xc44] sm:$0xf]  ;;  %v5722_v25 = vor.u32 %v6785_v15, %v5719_v17  ;;  %3549 = vmatpush.bf16.msrb.mxu0 %v5466_v22  ;;  %v4830_v15 = vor.u32 %v6566_v9, %v4829_v7  ;;  %v4541_v17 = vld [vmem:[%s7379_s6 + $0x108] sm:$0xf] }
  0xfd   : > { %v5975_v19 = vld [vmem:[%s7379_s6 + $0xc60] sm:$0xf0]  ;;  %v5053_v22 = vld [vmem:[%s7379_s6 + $0x508] sm:$0xf] }
  0xfe   : > { %v6913_v20 = vld [vmem:[%s7379_s6 + $0xe44] sm:$0xf]  ;;  %v5978_v26 = vor.u32 %v6849_v18, %v5975_v19  ;;  %3562 = vmatpush.bf16.msrb.mxu1 %v5722_v25  ;;  %v6494_v18 = vld [vmem:[%s7379_s6 + $0x124] sm:$0xf0] }
  0xff   : > { %v6231_v21 = vld [vmem:[%s7379_s6 + $0xe60] sm:$0xf0]  ;;  %v4797_v19 = vld [vmem:[%s7379_s6 + $0x308] sm:$0xf] }
 0x100   : > { %v6713_v23 = vld [vmem:[%s7379_s6 + $0x804] sm:$0xf]  ;;  %v6234_v30 = vor.u32 %v6913_v20, %v6231_v21  ;;  %3575 = vmatpush.bf16.msrb.mxu2 %v5978_v26  ;;  %v5342_v20 = vor.u32 %v6694_v13, %v5341_v12  ;;  %v6558_v21 = vld [vmem:[%s7379_s6 + $0x324] sm:$0xf0]  ;;  %v4542_v26 = vor.u32 %v6494_v18, %v4541_v17 }
 0x101   : > { %v5431_v24 = vld [vmem:[%s7379_s6 + $0x820] sm:$0xf0]  ;;  %v6686_v25 = vld [vmem:[%s7379_s6 + $0x724] sm:$0xf0] }
 0x102   : > { %v6777_v27 = vld [vmem:[%s7379_s6 + $0xa04] sm:$0xf]  ;;  %v5434_v45 = vor.u32 %v6713_v23, %v5431_v24  ;;  %3588 = vmatpush.bf16.msrb.mxu3 %v6234_v30  ;;  %v6622_v23 = vld [vmem:[%s7379_s6 + $0x524] sm:$0xf0] }
 0x103   : > { %v5687_v28 = vld [vmem:[%s7379_s6 + $0xa20] sm:$0xf0]  ;;  %v5309_v24 = vld [vmem:[%s7379_s6 + $0x708] sm:$0xf] }
 0x104   : > { %v6841_v29 = vld [vmem:[%s7379_s6 + $0xc04] sm:$0xf]  ;;  %v5690_v49 = vor.u32 %v6777_v27, %v5687_v28  ;;  %3550 = vmatpush.bf16.msrb.mxu0 %v5434_v45  ;;  %v4798_v27 = vor.u32 %v6558_v21, %v4797_v19  ;;  %v5054_v28 = vor.u32 %v6622_v23, %v5053_v22  ;;  %v6486_v30 = vld [vmem:[%s7379_s6 + $0xe4] sm:$0xf0] }
 0x105   : > { %v5943_v31 = vld [vmem:[%s7379_s6 + $0xc20] sm:$0xf0]  ;;  %v6614_v43 = vld [vmem:[%s7379_s6 + $0x4e4] sm:$0xf0] }
 0x106   : > { %v6905_v35 = vld [vmem:[%s7379_s6 + $0xe04] sm:$0xf]  ;;  %v5946_v50 = vor.u32 %v6841_v29, %v5943_v31  ;;  %3563 = vmatpush.bf16.msrb.mxu1 %v5690_v49  ;;  %v4509_v29 = vld [vmem:[%s7379_s6 + $0xc8] sm:$0xf]  ;;  %v5022_v48 = vor.u32 %v6614_v43, %v5021_v39 }
 0x107   : > { %v6199_v36 = vld [vmem:[%s7379_s6 + $0xe20] sm:$0xf0]  ;;  %3551 = vmatmul.bf16.vlgmr.msrb.gmra.mxu0 %v7543_v37  ;;  %v4765_v31 = vld [vmem:[%s7379_s6 + $0x2c8] sm:$0xf]  ;;  %v4510_v46 = vor.u32 %v6486_v30, %v4509_v29 }
 0x108   : > { %v6202_v53 = vor.u32 %v6905_v35, %v6199_v36  ;;  %3576 = vmatpush.bf16.msrb.mxu2 %v5946_v50  ;;  %3595 = vmatpush.bf16.msra.mxu0 %v4638_v54  ;;  %v5310_v35 = vor.u32 %v6686_v25, %v5309_v24  ;;  %v6550_v36 = vld [vmem:[%s7379_s6 + $0x2e4] sm:$0xf0] }
 0x109   : > { %3564 = vmatmul.bf16.vlgmr.msrb.gmra.mxu1 %v7547_v40  ;;  %v5277_v44 = vld [vmem:[%s7379_s6 + $0x6c8] sm:$0xf]  ;;  %v4766_v47 = vor.u32 %v6550_v36, %v4765_v31 }
 0x10a   : > { %3589 = vmatpush.bf16.msrb.mxu3 %v6202_v53  ;;  %3608 = vmatpush.bf16.msra.mxu1 %v4894_v55  ;;  %v6678_v45 = vld [vmem:[%s7379_s6 + $0x6e4] sm:$0xf0] }
 0x10b   : > { %3577 = vmatmul.bf16.vlgmr.msrb.gmra.mxu2 %v7539_v32  ;;  %v4477_v49 = vld [vmem:[%s7379_s6 + $0x88] sm:$0xf]  ;;  %v5278_v52 = vor.u32 %v6678_v45, %v5277_v44 }
 0x10c   : > { %3621 = vmatpush.bf16.msra.mxu2 %v5150_v56  ;;  %3596 = vmatpush.bf16.msra.mxu0 %v4606_v2  ;;  %v6478_v50 = vld [vmem:[%s7379_s6 + $0xa4] sm:$0xf0] }
 0x10d   : > { %3590 = vmatmul.bf16.vlgmr.msrb.gmra.mxu3 %v7545_v38  ;;  %v4733_v51 = vld [vmem:[%s7379_s6 + $0x288] sm:$0xf]  ;;  %v4478_v58 = vor.u32 %v6478_v50, %v4477_v49 }
 0x10e   : > { %3634 = vmatpush.bf16.msra.mxu3 %v5406_v60  ;;  %3609 = vmatpush.bf16.msra.mxu1 %v4862_v3  ;;  %v6542_v53 = vld [vmem:[%s7379_s6 + $0x2a4] sm:$0xf0] }
 0x10f   : > { %v4989_v54 = vld [vmem:[%s7379_s6 + $0x488] sm:$0xf]  ;;  %v4734_v59 = vor.u32 %v6542_v53, %v4733_v51 }
 0x110   : > { %3622 = vmatpush.bf16.msra.mxu2 %v5118_v4  ;;  %3597 = vmatpush.bf16.msra.mxu0 %v4574_v14  ;;  %v6606_v55 = vld [vmem:[%s7379_s6 + $0x4a4] sm:$0xf0] }
 0x111   : > { %v5245_v56 = vld [vmem:[%s7379_s6 + $0x688] sm:$0xf]  ;;  %v4990_v60 = vor.u32 %v6606_v55, %v4989_v54 }
 0x112   : > { %3635 = vmatpush.bf16.msra.mxu3 %v5374_v8  ;;  %3610 = vmatpush.bf16.msra.mxu1 %v4830_v15  ;;  %v6670_v57 = vld [vmem:[%s7379_s6 + $0x6a4] sm:$0xf0] }
 0x113   : > { %v4445_v61 = vld [vmem:[%s7379_s6 + $0x48] sm:$0xf]  ;;  %v5246_v0 = vor.u32 %v6670_v57, %v5245_v56 }
 0x114   : > { %3623 = vmatpush.bf16.msra.mxu2 %v5086_v16  ;;  %3598 = vmatpush.bf16.msra.mxu0 %v4542_v26  ;;  %v6470_v62 = vld [vmem:[%s7379_s6 + $0x64] sm:$0xf0] }
 0x115   : > { %v4701_v63 = vld [vmem:[%s7379_s6 + $0x248] sm:$0xf]  ;;  %v4446_v6 = vor.u32 %v6470_v62, %v4445_v61 }
 0x116   : > { %3636 = vmatpush.bf16.msra.mxu3 %v5342_v20  ;;  %3611 = vmatpush.bf16.msra.mxu1 %v4798_v27  ;;  %v6534_v1 = vld [vmem:[%s7379_s6 + $0x264] sm:$0xf0] }
 0x117   : > { %v4957_v2 = vld [vmem:[%s7379_s6 + $0x448] sm:$0xf]  ;;  %v4702_v9 = vor.u32 %v6534_v1, %v4701_v63 }
 0x118   : > { %3624 = vmatpush.bf16.msra.mxu2 %v5054_v28  ;;  %3599 = vmatpush.bf16.msra.mxu0 %v4510_v46  ;;  %v6598_v3 = vld [vmem:[%s7379_s6 + $0x464] sm:$0xf0] }
 0x119   : > { %v5213_v4 = vld [vmem:[%s7379_s6 + $0x648] sm:$0xf]  ;;  %v4958_v10 = vor.u32 %v6598_v3, %v4957_v2 }
 0x11a   : > { %3637 = vmatpush.bf16.msra.mxu3 %v5310_v35  ;;  %3612 = vmatpush.bf16.msra.mxu1 %v4766_v47  ;;  %v6662_v5 = vld [vmem:[%s7379_s6 + $0x664] sm:$0xf0] }
 0x11b   : > { %v4413_v7 = vld [vmem:[%s7379_s6 + $0x8] sm:$0xf]  ;;  %v5214_v14 = vor.u32 %v6662_v5, %v5213_v4 }
 0x11c   : > { %3625 = vmatpush.bf16.msra.mxu2 %v5022_v48  ;;  %3600 = vmatpush.bf16.msra.mxu0 %v4478_v58  ;;  %v6462_v8 = vld [vmem:[%s7379_s6 + $0x24] sm:$0xf0] }
 0x11d   : > { %v4669_v11 = vld [vmem:[%s7379_s6 + $0x208] sm:$0xf]  ;;  %v4414_v21 = vor.u32 %v6462_v8, %v4413_v7 }
 0x11e   : > { %3638 = vmatpush.bf16.msra.mxu3 %v5278_v52  ;;  %3613 = vmatpush.bf16.msra.mxu1 %v4734_v59  ;;  %v6526_v12 = vld [vmem:[%s7379_s6 + $0x224] sm:$0xf0] }
 0x11f   : > { %v4925_v13 = vld [vmem:[%s7379_s6 + $0x408] sm:$0xf]  ;;  %v4670_v25 = vor.u32 %v6526_v12, %v4669_v11 }
 0x120   : > { %3626 = vmatpush.bf16.msra.mxu2 %v4990_v60  ;;  %v6590_v15 = vld [vmem:[%s7379_s6 + $0x424] sm:$0xf0]  ;;  %3601 = vmatpush.bf16.msra.mxu0 %v4446_v6 }
 0x121   : > { %v5181_v16 = vld [vmem:[%s7379_s6 + $0x608] sm:$0xf]  ;;  %v4926_v26 = vor.u32 %v6590_v15, %v4925_v13 }
 0x122   : > { %3639 = vmatpush.bf16.msra.mxu3 %v5246_v0  ;;  %v6654_v17 = vld [vmem:[%s7379_s6 + $0x624] sm:$0xf0]  ;;  %3614 = vmatpush.bf16.msra.mxu1 %v4702_v9 }
 0x123   : > { %v5661_v18 = vld [vmem:[%s7379_s6 + $0x9c8] sm:$0xf]  ;;  %v5182_v29 = vor.u32 %v6654_v17, %v5181_v16 }
 0x124   : > { %v6774_v19 = vld [vmem:[%s7379_s6 + $0x9e4] sm:$0xf0]  ;;  %3627 = vmatpush.bf16.msra.mxu2 %v4958_v10  ;;  %3602 = vmatpush.bf16.msra.mxu0 %v4414_v21 }
 0x125   : > { %v5917_v20 = vld [vmem:[%s7379_s6 + $0xbc8] sm:$0xf]  ;;  %v5662_v30 = vor.u32 %v6774_v19, %v5661_v18 }
 0x126   : > { %v6838_v22 = vld [vmem:[%s7379_s6 + $0xbe4] sm:$0xf0]  ;;  %3640 = vmatpush.bf16.msra.mxu3 %v5214_v14  ;;  %3615 = vmatpush.bf16.msra.mxu1 %v4670_v25 }
 0x127   : > { %v6173_v23 = vld [vmem:[%s7379_s6 + $0xdc8] sm:$0xf]  ;;  %v5918_v31 = vor.u32 %v6838_v22, %v5917_v20  ;;  %3603 = vmatmul.bf16.vlgmr.msra.gmra.mxu0 %v7494_v34 }
 0x128   : > { %v6902_v24 = vld [vmem:[%s7379_s6 + $0xde4] sm:$0xf0]  ;;  %3628 = vmatpush.bf16.msra.mxu2 %v4926_v26  ;;  %3647 = vmatpush.bf16.msrb.mxu0 %v5662_v30 }
 0x129   : > { %v6429_v27 = vld [vmem:[%s7379_s6 + $0xfc8] sm:$0xf]  ;;  %v6174_v35 = vor.u32 %v6902_v24, %v6173_v23  ;;  %3616 = vmatmul.bf16.vlgmr.msra.gmra.mxu1 %v7501_v42 }
 0x12a   : > { %v6966_v28 = vld [vmem:[%s7379_s6 + $0xfe4] sm:$0xf0]  ;;  %3641 = vmatpush.bf16.msra.mxu3 %v5182_v29  ;;  %3660 = vmatpush.bf16.msrb.mxu1 %v5918_v31 }
 0x12b   : > { %v5629_v36 = vld [vmem:[%s7379_s6 + $0x988] sm:$0xf]  ;;  %v6430_v44 = vor.u32 %v6966_v28, %v6429_v27  ;;  %3629 = vmatmul.bf16.vlgmr.msra.gmra.mxu2 %v7492_v33 }
 0x12c   : > { %v6766_v39 = vld [vmem:[%s7379_s6 + $0x9a4] sm:$0xf0]  ;;  %3673 = vmatpush.bf16.msrb.mxu2 %v6174_v35 }
 0x12d   : > { %v5885_v43 = vld [vmem:[%s7379_s6 + $0xb88] sm:$0xf]  ;;  %v5630_v50 = vor.u32 %v6766_v39, %v5629_v36  ;;  %3642 = vmatmul.bf16.vlgmr.msra.gmra.mxu3 %v7499_v41 }
 0x12e   : > { %v6830_v45 = vld [vmem:[%s7379_s6 + $0xba4] sm:$0xf0]  ;;  %3686 = vmatpush.bf16.msrb.mxu3 %v6430_v44 }
 0x12f   : > { %v6141_v46 = vld [vmem:[%s7379_s6 + $0xd88] sm:$0xf]  ;;  %v5886_v51 = vor.u32 %v6830_v45, %v5885_v43  ;;  %3648 = vmatpush.bf16.msrb.mxu0 %v5630_v50 }
 0x130   : > { %v6894_v47 = vld [vmem:[%s7379_s6 + $0xda4] sm:$0xf0] }
 0x131   : > { %v6397_v48 = vld [vmem:[%s7379_s6 + $0xf88] sm:$0xf]  ;;  %v6142_v52 = vor.u32 %v6894_v47, %v6141_v46  ;;  %3661 = vmatpush.bf16.msrb.mxu1 %v5886_v51 }
 0x132   : > { %v6958_v49 = vld [vmem:[%s7379_s6 + $0xfa4] sm:$0xf0] }
 0x133   : > { %v5597_v53 = vld [vmem:[%s7379_s6 + $0x948] sm:$0xf]  ;;  %v6398_v56 = vor.u32 %v6958_v49, %v6397_v48  ;;  %3674 = vmatpush.bf16.msrb.mxu2 %v6142_v52 }
 0x134   : > { %v6758_v54 = vld [vmem:[%s7379_s6 + $0x964] sm:$0xf0] }
 0x135   : > { %v5853_v55 = vld [vmem:[%s7379_s6 + $0xb48] sm:$0xf]  ;;  %v5598_v62 = vor.u32 %v6758_v54, %v5597_v53  ;;  %3687 = vmatpush.bf16.msrb.mxu3 %v6398_v56 }
 0x136   : > { %v6822_v57 = vld [vmem:[%s7379_s6 + $0xb64] sm:$0xf0] }
 0x137   : > { %v6109_v58 = vld [vmem:[%s7379_s6 + $0xd48] sm:$0xf]  ;;  %v5854_v63 = vor.u32 %v6822_v57, %v5853_v55  ;;  %3649 = vmatpush.bf16.msrb.mxu0 %v5598_v62 }
 0x138   : > { %v6886_v59 = vld [vmem:[%s7379_s6 + $0xd64] sm:$0xf0] }
 0x139   : > { %v6365_v60 = vld [vmem:[%s7379_s6 + $0xf48] sm:$0xf]  ;;  %v6110_v0 = vor.u32 %v6886_v59, %v6109_v58  ;;  %3662 = vmatpush.bf16.msrb.mxu1 %v5854_v63  ;;  %v3396_v59 = vpop.f32.mrf.mxu0 }
 0x13a   : > { %v6950_v61 = vld [vmem:[%s7379_s6 + $0xf64] sm:$0xf0] }
 0x13b   : > { %v5565_v1 = vld [vmem:[%s7379_s6 + $0x908] sm:$0xf]  ;;  %v6366_v4 = vor.u32 %v6950_v61, %v6365_v60  ;;  %3675 = vmatpush.bf16.msrb.mxu2 %v6110_v0 }
 0x13c   : > { %v6750_v2 = vld [vmem:[%s7379_s6 + $0x924] sm:$0xf0] }
 0x13d   : > { %v5821_v3 = vld [vmem:[%s7379_s6 + $0xb08] sm:$0xf]  ;;  %v5566_v10 = vor.u32 %v6750_v2, %v5565_v1  ;;  %3688 = vmatpush.bf16.msrb.mxu3 %v6366_v4 }
 0x13e   : > { %v6814_v5 = vld [vmem:[%s7379_s6 + $0xb24] sm:$0xf0] }
 0x13f   : > { %v6077_v6 = vld [vmem:[%s7379_s6 + $0xd08] sm:$0xf]  ;;  %v5822_v11 = vor.u32 %v6814_v5, %v5821_v3  ;;  %3650 = vmatpush.bf16.msrb.mxu0 %v5566_v10 }
 0x140   : > { %v6878_v7 = vld [vmem:[%s7379_s6 + $0xd24] sm:$0xf0] }
 0x141   : > { %v6333_v8 = vld [vmem:[%s7379_s6 + $0xf08] sm:$0xf]  ;;  %v6078_v12 = vor.u32 %v6878_v7, %v6077_v6  ;;  %3663 = vmatpush.bf16.msrb.mxu1 %v5822_v11  ;;  %v6514_v6 = vld [vmem:[%s7379_s6 + $0x1cc] sm:$0xf] }
 0x142   : > { %v6942_v9 = vld [vmem:[%s7379_s6 + $0xf24] sm:$0xf0]  ;;  %v4639_v7 = vld [vmem:[%s7379_s6 + $0x1e8] sm:$0xf0] }
 0x143   : > { %v5533_v13 = vld [vmem:[%s7379_s6 + $0x8c8] sm:$0xf]  ;;  %v6334_v16 = vor.u32 %v6942_v9, %v6333_v8  ;;  %3676 = vmatpush.bf16.msrb.mxu2 %v6078_v12  ;;  %v6578_v8 = vld [vmem:[%s7379_s6 + $0x3cc] sm:$0xf]  ;;  %v3409_v9 = vpop.f32.mrf.mxu1 }
 0x144   : > { %v6742_v14 = vld [vmem:[%s7379_s6 + $0x8e4] sm:$0xf0]  ;;  %v4895_v11 = vld [vmem:[%s7379_s6 + $0x3e8] sm:$0xf0] }
 0x145   : > { %v5789_v15 = vld [vmem:[%s7379_s6 + $0xac8] sm:$0xf]  ;;  %v5534_v22 = vor.u32 %v6742_v14, %v5533_v13  ;;  %3689 = vmatpush.bf16.msrb.mxu3 %v6334_v16  ;;  %v6642_v12 = vld [vmem:[%s7379_s6 + $0x5cc] sm:$0xf] }
 0x146   : > { %v6806_v17 = vld [vmem:[%s7379_s6 + $0xae4] sm:$0xf0]  ;;  %v5151_v13 = vld [vmem:[%s7379_s6 + $0x5e8] sm:$0xf0] }
 0x147   : > { %v6045_v18 = vld [vmem:[%s7379_s6 + $0xcc8] sm:$0xf]  ;;  %v5790_v24 = vor.u32 %v6806_v17, %v5789_v15  ;;  %3651 = vmatpush.bf16.msrb.mxu0 %v5534_v22  ;;  %v6706_v17 = vld [vmem:[%s7379_s6 + $0x7cc] sm:$0xf]  ;;  %v4898_v22 = vor.u32 %v6578_v8, %v4895_v11 }
 0x148   : > { %v6870_v19 = vld [vmem:[%s7379_s6 + $0xce4] sm:$0xf0]  ;;  %v5311_v8 = vld [vmem:[%s7379_s6 + $0x728] sm:$0xf0] }
 0x149   : > { %v6301_v20 = vld [vmem:[%s7379_s6 + $0xec8] sm:$0xf]  ;;  %v6046_v25 = vor.u32 %v6870_v19, %v6045_v18  ;;  %3664 = vmatpush.bf16.msrb.mxu1 %v5790_v24  ;;  %v5407_v18 = vld [vmem:[%s7379_s6 + $0x7e8] sm:$0xf0] }
 0x14a   : > { %v6934_v21 = vld [vmem:[%s7379_s6 + $0xee4] sm:$0xf0]  ;;  %v6506_v24 = vld [vmem:[%s7379_s6 + $0x18c] sm:$0xf] }
 0x14b   : > { %v5501_v23 = vld [vmem:[%s7379_s6 + $0x888] sm:$0xf]  ;;  %v6302_v29 = vor.u32 %v6934_v21, %v6301_v20  ;;  %3677 = vmatpush.bf16.msrb.mxu2 %v6046_v25  ;;  %v4642_v20 = vor.u32 %v6514_v6, %v4639_v7  ;;  %v3422_v21 = vpop.f32.mrf.mxu2  ;;  %v4607_v25 = vld [vmem:[%s7379_s6 + $0x1a8] sm:$0xf0] }
 0x14c   : > { %v6734_v26 = vld [vmem:[%s7379_s6 + $0x8a4] sm:$0xf0]  ;;  %v5055_v6 = vld [vmem:[%s7379_s6 + $0x528] sm:$0xf0] }
 0x14d   : > { %v5757_v27 = vld [vmem:[%s7379_s6 + $0xa88] sm:$0xf]  ;;  %v5502_v43 = vor.u32 %v6734_v26, %v5501_v23  ;;  %3690 = vmatpush.bf16.msrb.mxu3 %v6302_v29  ;;  %v5154_v23 = vor.u32 %v6642_v12, %v5151_v13  ;;  %v6570_v26 = vld [vmem:[%s7379_s6 + $0x38c] sm:$0xf]  ;;  %v5410_v29 = vor.u32 %v6706_v17, %v5407_v18 }
 0x14e   : > { %v6798_v28 = vld [vmem:[%s7379_s6 + $0xaa4] sm:$0xf0]  ;;  %v6682_v7 = vld [vmem:[%s7379_s6 + $0x70c] sm:$0xf] }
 0x14f   : > { %v6013_v30 = vld [vmem:[%s7379_s6 + $0xc88] sm:$0xf]  ;;  %v5758_v45 = vor.u32 %v6798_v28, %v5757_v27  ;;  %3652 = vmatpush.bf16.msrb.mxu0 %v5502_v43  ;;  %v3435_v28 = vpop.f32.mrf.mxu3  ;;  %v6698_v43 = vld [vmem:[%s7379_s6 + $0x78c] sm:$0xf]  ;;  %v5314_v18 = vor.u32 %v6682_v7, %v5311_v8 }
 0x150   : > { %v6862_v31 = vld [vmem:[%s7379_s6 + $0xca4] sm:$0xf0]  ;;  %v6482_v13 = vld [vmem:[%s7379_s6 + $0xcc] sm:$0xf] }
 0x151   : > { %v7791_v35 = vld [vmem:[%s7788_s10] sm:$0xff]  ;;  %v6014_v46 = vor.u32 %v6862_v31, %v6013_v30  ;;  %3665 = vmatpush.bf16.msrb.mxu1 %v5758_v45 }
 0x152   : > { %v6269_v36 = vld [vmem:[%s7379_s6 + $0xe88] sm:$0xf]  ;;  %v811_v49 = vperm.slane %v7791_v35, 0  ;;  %v4863_v30 = vld [vmem:[%s7379_s6 + $0x3a8] sm:$0xf0] }
 0x153   : > { %v6926_v39 = vld [vmem:[%s7379_s6 + $0xea4] sm:$0xf0]  ;;  %3678 = vmatpush.bf16.msrb.mxu2 %v6014_v46  ;;  %v6634_v31 = vld [vmem:[%s7379_s6 + $0x58c] sm:$0xf]  ;;  %v4610_v46 = vor.u32 %v6506_v24, %v4607_v25 }
 0x154   : > { %v5469_v44 = vld [vmem:[%s7379_s6 + $0x848] sm:$0xf]  ;;  %v6270_v50 = vor.u32 %v6926_v39, %v6269_v36  ;;  %v3397_v1 = vadd.f32 %v3396_v59, %v811_v49  ;;  %v5119_v36 = vld [vmem:[%s7379_s6 + $0x5a8] sm:$0xf0]  ;;  %v3398_v39 = vpop.f32.mrf.mxu0 }
 0x155   : > { %v6726_v47 = vld [vmem:[%s7379_s6 + $0x864] sm:$0xf0]  ;;  %v6498_v49 = vld [vmem:[%s7379_s6 + $0x14c] sm:$0xf] }
 0x156   : > { %v5725_v48 = vld [vmem:[%s7379_s6 + $0xa48] sm:$0xf]  ;;  %v5470_v56 = vor.u32 %v6726_v47, %v5469_v44  ;;  %3691 = vmatpush.bf16.msrb.mxu3 %v6270_v50  ;;  %v3410_v14 = vadd.f32 %v3409_v9, %v3397_v1  ;;  %v5375_v44 = vld [vmem:[%s7379_s6 + $0x7a8] sm:$0xf0]  ;;  %v4866_v47 = vor.u32 %v6570_v26, %v4863_v30 }
 0x157   : > { %v6790_v51 = vld [vmem:[%s7379_s6 + $0xa64] sm:$0xf0]  ;;  %v4575_v50 = vld [vmem:[%s7379_s6 + $0x168] sm:$0xf0] }
 0x158   : > { %v5981_v52 = vld [vmem:[%s7379_s6 + $0xc48] sm:$0xf]  ;;  %v5726_v60 = vor.u32 %v6790_v51, %v5725_v48  ;;  %3653 = vmatpush.bf16.msrb.mxu0 %v5470_v56  ;;  %v3423_v27 = vadd.f32 %v3422_v21, %v3410_v14  ;;  %v5122_v48 = vor.u32 %v6634_v31, %v5119_v36  ;;  %v6562_v51 = vld [vmem:[%s7379_s6 + $0x34c] sm:$0xf]  ;;  %v4578_v59 = vor.u32 %v6498_v49, %v4575_v50 }
 0x159   : > { %v6854_v53 = vld [vmem:[%s7379_s6 + $0xc64] sm:$0xf0]  ;;  %v5087_v56 = vld [vmem:[%s7379_s6 + $0x568] sm:$0xf0] }
 0x15a   : > { %v6237_v54 = vld [vmem:[%s7379_s6 + $0xe48] sm:$0xf]  ;;  %v5982_v61 = vor.u32 %v6854_v53, %v5981_v52  ;;  %3666 = vmatpush.bf16.msrb.mxu1 %v5726_v60  ;;  %v3436_v45 = vadd.f32 %v3435_v28, %v3423_v27  ;;  %v3411_v52 = vpop.f32.mrf.mxu1  ;;  %v5378_v53 = vor.u32 %v6698_v43, %v5375_v44  ;;  %v3424_v60 = vpop.f32.mrf.mxu2  ;;  %v6554_v1 = vld [vmem:[%s7379_s6 + $0x30c] sm:$0xf] }
 0x15b   : > { %v6918_v55 = vld [vmem:[%s7379_s6 + $0xe64] sm:$0xf0]  ;;  %v4511_v14 = vld [vmem:[%s7379_s6 + $0xe8] sm:$0xf0] }
 0x15c   : > { %v5437_v57 = vld [vmem:[%s7379_s6 + $0x808] sm:$0xf]  ;;  %v6238_v2 = vor.u32 %v6918_v55, %v6237_v54  ;;  %3679 = vmatpush.bf16.msrb.mxu2 %v5982_v61  ;;  %v4831_v54 = vld [vmem:[%s7379_s6 + $0x368] sm:$0xf0]  ;;  %v4514_v25 = vor.u32 %v6482_v13, %v4511_v14 }
 0x15d   : > { %v6718_v58 = vld [vmem:[%s7379_s6 + $0x824] sm:$0xf0]  ;;  %v6626_v55 = vld [vmem:[%s7379_s6 + $0x54c] sm:$0xf]  ;;  %v4834_v61 = vor.u32 %v6562_v51, %v4831_v54 }
 0x15e   : > { %v5693_v62 = vld [vmem:[%s7379_s6 + $0xa08] sm:$0xf]  ;;  %v5438_v10 = vor.u32 %v6718_v58, %v5437_v57  ;;  %3692 = vmatpush.bf16.msrb.mxu3 %v6238_v2  ;;  %v6690_v57 = vld [vmem:[%s7379_s6 + $0x74c] sm:$0xf]  ;;  %v3437_v2 = vpop.f32.mrf.mxu3 }
 0x15f   : > { %v6782_v63 = vld [vmem:[%s7379_s6 + $0xa24] sm:$0xf0]  ;;  %v5343_v58 = vld [vmem:[%s7379_s6 + $0x768] sm:$0xf0] }
 0x160   : > { %v5949_v0 = vld [vmem:[%s7379_s6 + $0xc08] sm:$0xf]  ;;  %v5694_v15 = vor.u32 %v6782_v63, %v5693_v62  ;;  %3654 = vmatpush.bf16.msrb.mxu0 %v5438_v10  ;;  %v5090_v62 = vor.u32 %v6626_v55, %v5087_v56  ;;  %v6490_v63 = vld [vmem:[%s7379_s6 + $0x10c] sm:$0xf]  ;;  %v3448_v10 = vpop.f32.mrf.mxu0 }
 0x161   : > { %v6846_v3 = vld [vmem:[%s7379_s6 + $0xc24] sm:$0xf0]  ;;  %v5023_v21 = vld [vmem:[%s7379_s6 + $0x4e8] sm:$0xf0] }
 0x162   : > { %v6205_v4 = vld [vmem:[%s7379_s6 + $0xe08] sm:$0xf]  ;;  %v5950_v16 = vor.u32 %v6846_v3, %v5949_v0  ;;  %3667 = vmatpush.bf16.msrb.mxu1 %v5694_v15  ;;  %v4543_v0 = vld [vmem:[%s7379_s6 + $0x128] sm:$0xf0]  ;;  %v5346_v3 = vor.u32 %v6690_v57, %v5343_v58  ;;  %v3461_v17 = vpop.f32.mrf.mxu1  ;;  %v3474_v31 = vpop.f32.mrf.mxu2 }
 0x163   : > { %v6910_v5 = vld [vmem:[%s7379_s6 + $0xe24] sm:$0xf0]  ;;  %3655 = vmatmul.bf16.vlgmr.msrb.gmra.mxu0 %v7543_v37  ;;  %v4546_v9 = vor.u32 %v6490_v63, %v4543_v0  ;;  %v6546_v15 = vld [vmem:[%s7379_s6 + $0x2cc] sm:$0xf] }
 0x164   : > { %v6206_v19 = vor.u32 %v6910_v5, %v6205_v4  ;;  %3680 = vmatpush.bf16.msrb.mxu2 %v5950_v16  ;;  %3699 = vmatpush.bf16.msra.mxu0 %v4642_v20  ;;  %v4799_v4 = vld [vmem:[%s7379_s6 + $0x328] sm:$0xf0]  ;;  %v3449_v16 = vadd.f32 %v3448_v10, %v3436_v45 }
 0x165   : > { %3668 = vmatmul.bf16.vlgmr.msrb.gmra.mxu1 %v7547_v40  ;;  %v6618_v5 = vld [vmem:[%s7379_s6 + $0x50c] sm:$0xf]  ;;  %v4802_v11 = vor.u32 %v6554_v1, %v4799_v4 }
 0x166   : > { %3693 = vmatpush.bf16.msrb.mxu3 %v6206_v19  ;;  %3712 = vmatpush.bf16.msra.mxu1 %v4898_v22  ;;  %v5058_v12 = vor.u32 %v6618_v5, %v5055_v6  ;;  %v4767_v19 = vld [vmem:[%s7379_s6 + $0x2e8] sm:$0xf0]  ;;  %v3462_v24 = vadd.f32 %v3461_v17, %v3449_v16 }
 0x167   : > { %3681 = vmatmul.bf16.vlgmr.msrb.gmra.mxu2 %v7539_v32  ;;  %v6610_v20 = vld [vmem:[%s7379_s6 + $0x4cc] sm:$0xf]  ;;  %v4770_v26 = vor.u32 %v6546_v15, %v4767_v19 }
 0x168   : > { %3725 = vmatpush.bf16.msra.mxu2 %v5154_v23  ;;  %3700 = vmatpush.bf16.msra.mxu0 %v4610_v46  ;;  %v6674_v22 = vld [vmem:[%s7379_s6 + $0x6cc] sm:$0xf]  ;;  %v5026_v27 = vor.u32 %v6610_v20, %v5023_v21  ;;  %v3475_v45 = vadd.f32 %v3474_v31, %v3462_v24  ;;  %v3487_v46 = vpop.f32.mrf.mxu3  ;;  %v3450_v51 = vpop.f32.mrf.mxu0 }
 0x169   : > { %3694 = vmatmul.bf16.vlgmr.msrb.gmra.mxu3 %v7545_v38  ;;  %v5279_v23 = vld [vmem:[%s7379_s6 + $0x6e8] sm:$0xf0] }
 0x16a   : > { %3738 = vmatpush.bf16.msra.mxu3 %v5410_v29  ;;  %3713 = vmatpush.bf16.msra.mxu1 %v4866_v47  ;;  %v6474_v28 = vld [vmem:[%s7379_s6 + $0x8c] sm:$0xf]  ;;  %v5282_v36 = vor.u32 %v6674_v22, %v5279_v23  ;;  %v7864_v50 = vadd.f32 %v3487_v46, %v3475_v45  ;;  %v3463_v57 = vpop.f32.mrf.mxu1  ;;  %v3476_v8 = vpop.f32.mrf.mxu2 }
 0x16b   : > { %v4479_v29 = vld [vmem:[%s7379_s6 + $0xa8] sm:$0xf0] }
 0x16c   : > { %3726 = vmatpush.bf16.msra.mxu2 %v5122_v48  ;;  %3701 = vmatpush.bf16.msra.mxu0 %v4578_v59  ;;  %v6538_v30 = vld [vmem:[%s7379_s6 + $0x28c] sm:$0xf]  ;;  %v4482_v49 = vor.u32 %v6474_v28, %v4479_v29 }
 0x16d   : > { %v4735_v39 = vld [vmem:[%s7379_s6 + $0x2a8] sm:$0xf0] }
 0x16e   : > { %3739 = vmatpush.bf16.msra.mxu3 %v5378_v53  ;;  %3714 = vmatpush.bf16.msra.mxu1 %v4834_v61  ;;  %v6602_v43 = vld [vmem:[%s7379_s6 + $0x48c] sm:$0xf]  ;;  %v4738_v52 = vor.u32 %v6538_v30, %v4735_v39 }
 0x16f   : > { %v4991_v44 = vld [vmem:[%s7379_s6 + $0x4a8] sm:$0xf0] }
 0x170   : > { %3727 = vmatpush.bf16.msra.mxu2 %v5090_v62  ;;  %3702 = vmatpush.bf16.msra.mxu0 %v4546_v9  ;;  %v6666_v47 = vld [vmem:[%s7379_s6 + $0x68c] sm:$0xf]  ;;  %v4994_v53 = vor.u32 %v6602_v43, %v4991_v44  ;;  %v3489_v13 = vpop.f32.mrf.mxu3 }
 0x171   : > { %v5247_v48 = vld [vmem:[%s7379_s6 + $0x6a8] sm:$0xf0] }
 0x172   : > { %3740 = vmatpush.bf16.msra.mxu3 %v5346_v3  ;;  %3715 = vmatpush.bf16.msra.mxu1 %v4802_v11  ;;  %v6466_v54 = vld [vmem:[%s7379_s6 + $0x4c] sm:$0xf]  ;;  %v5250_v58 = vor.u32 %v6666_v47, %v5247_v48 }
 0x173   : > { %v4447_v55 = vld [vmem:[%s7379_s6 + $0x68] sm:$0xf0] }
 0x174   : > { %3728 = vmatpush.bf16.msra.mxu2 %v5058_v12  ;;  %3703 = vmatpush.bf16.msra.mxu0 %v4514_v25  ;;  %v6530_v56 = vld [vmem:[%s7379_s6 + $0x24c] sm:$0xf]  ;;  %v4450_v0 = vor.u32 %v6466_v54, %v4447_v55 }
 0x175   : > { %v4703_v59 = vld [vmem:[%s7379_s6 + $0x268] sm:$0xf0] }
 0x176   : > { %3741 = vmatpush.bf16.msra.mxu3 %v5314_v18  ;;  %3716 = vmatpush.bf16.msra.mxu1 %v4770_v26  ;;  %v6594_v60 = vld [vmem:[%s7379_s6 + $0x44c] sm:$0xf]  ;;  %v4706_v3 = vor.u32 %v6530_v56, %v4703_v59 }
 0x177   : > { %v4959_v61 = vld [vmem:[%s7379_s6 + $0x468] sm:$0xf0] }
 0x178   : > { %3729 = vmatpush.bf16.msra.mxu2 %v5026_v27  ;;  %v6658_v62 = vld [vmem:[%s7379_s6 + $0x64c] sm:$0xf]  ;;  %3704 = vmatpush.bf16.msra.mxu0 %v4482_v49  ;;  %v4962_v4 = vor.u32 %v6594_v60, %v4959_v61 }
 0x179   : > { %v5215_v63 = vld [vmem:[%s7379_s6 + $0x668] sm:$0xf0] }
 0x17a   : > { %3742 = vmatpush.bf16.msra.mxu3 %v5282_v36  ;;  %v6458_v1 = vld [vmem:[%s7379_s6 + $0xc] sm:$0xf]  ;;  %3717 = vmatpush.bf16.msra.mxu1 %v4738_v52  ;;  %v5218_v9 = vor.u32 %v6658_v62, %v5215_v63 }
 0x17b   : > { %v4415_v2 = vld [vmem:[%s7379_s6 + $0x28] sm:$0xf0] }
 0x17c   : > { %3730 = vmatpush.bf16.msra.mxu2 %v4994_v53  ;;  %v6522_v5 = vld [vmem:[%s7379_s6 + $0x20c] sm:$0xf]  ;;  %3705 = vmatpush.bf16.msra.mxu0 %v4450_v0  ;;  %v4418_v17 = vor.u32 %v6458_v1, %v4415_v2  ;;  %v812_v2 = vperm.slane %v7791_v35, 1 }
 0x17d   : > { %v4671_v6 = vld [vmem:[%s7379_s6 + $0x228] sm:$0xf0] }
 0x17e   : > { %v6586_v7 = vld [vmem:[%s7379_s6 + $0x40c] sm:$0xf]  ;;  %3743 = vmatpush.bf16.msra.mxu3 %v5250_v58  ;;  %3718 = vmatpush.bf16.msra.mxu1 %v4706_v3  ;;  %v4674_v21 = vor.u32 %v6522_v5, %v4671_v6 }
 0x17f   : > { %v4927_v10 = vld [vmem:[%s7379_s6 + $0x428] sm:$0xf0] }
 0x180   : > { %v6650_v11 = vld [vmem:[%s7379_s6 + $0x60c] sm:$0xf]  ;;  %3731 = vmatpush.bf16.msra.mxu2 %v4962_v4  ;;  %v4930_v22 = vor.u32 %v6586_v7, %v4927_v10  ;;  %3706 = vmatpush.bf16.msra.mxu0 %v4418_v17  ;;  %v3500_v10 = vpop.f32.mrf.mxu0 }
 0x181   : > { %v5183_v12 = vld [vmem:[%s7379_s6 + $0x628] sm:$0xf0] }
 0x182   : > { %v6770_v14 = vld [vmem:[%s7379_s6 + $0x9cc] sm:$0xf]  ;;  %3744 = vmatpush.bf16.msra.mxu3 %v5218_v9  ;;  %v5186_v25 = vor.u32 %v6650_v11, %v5183_v12  ;;  %3719 = vmatpush.bf16.msra.mxu1 %v4674_v21 }
 0x183   : > { %v5663_v15 = vld [vmem:[%s7379_s6 + $0x9e8] sm:$0xf0]  ;;  %3707 = vmatmul.bf16.vlgmr.msra.gmra.mxu0 %v7494_v34 }
 0x184   : > { %v6834_v16 = vld [vmem:[%s7379_s6 + $0xbcc] sm:$0xf]  ;;  %v5666_v26 = vor.u32 %v6770_v14, %v5663_v15  ;;  %3732 = vmatpush.bf16.msra.mxu2 %v4930_v22  ;;  %v3501_v15 = vadd.f32 %v3500_v10, %v812_v2 }
 0x185   : > { %v5919_v18 = vld [vmem:[%s7379_s6 + $0xbe8] sm:$0xf0]  ;;  %3720 = vmatmul.bf16.vlgmr.msra.gmra.mxu1 %v7501_v42 }
 0x186   : > { %v6898_v19 = vld [vmem:[%s7379_s6 + $0xdcc] sm:$0xf]  ;;  %v5922_v27 = vor.u32 %v6834_v16, %v5919_v18  ;;  %3745 = vmatpush.bf16.msra.mxu3 %v5186_v25  ;;  %3751 = vmatpush.bf16.msrb.mxu0 %v5666_v26  ;;  %v3513_v16 = vpop.f32.mrf.mxu1 }
 0x187   : > { %v6175_v20 = vld [vmem:[%s7379_s6 + $0xde8] sm:$0xf0]  ;;  %3733 = vmatmul.bf16.vlgmr.msra.gmra.mxu2 %v7492_v33 }
 0x188   : > { %v6962_v23 = vld [vmem:[%s7379_s6 + $0xfcc] sm:$0xf]  ;;  %v6178_v28 = vor.u32 %v6898_v19, %v6175_v20  ;;  %3764 = vmatpush.bf16.msrb.mxu1 %v5922_v27 }
 0x189   : > { %v6431_v24 = vld [vmem:[%s7379_s6 + $0xfe8] sm:$0xf0]  ;;  %3746 = vmatmul.bf16.vlgmr.msra.gmra.mxu3 %v7499_v41 }
 0x18a   : > { %v6762_v29 = vld [vmem:[%s7379_s6 + $0x98c] sm:$0xf]  ;;  %v6434_v36 = vor.u32 %v6962_v23, %v6431_v24  ;;  %3777 = vmatpush.bf16.msrb.mxu2 %v6178_v28  ;;  %v3514_v23 = vadd.f32 %v3513_v16, %v3501_v15  ;;  %v4901_v15 = vld [vmem:[%s7379_s6 + $0x3d0] sm:$0xf] }
 0x18b   : > { %v5631_v30 = vld [vmem:[%s7379_s6 + $0x9a8] sm:$0xf0] }
 0x18c   : > { %v6826_v31 = vld [vmem:[%s7379_s6 + $0xb8c] sm:$0xf]  ;;  %v5634_v47 = vor.u32 %v6762_v29, %v5631_v30  ;;  %3790 = vmatpush.bf16.msrb.mxu3 %v6434_v36  ;;  %v3526_v30 = vpop.f32.mrf.mxu2 }
 0x18d   : > { %v5887_v39 = vld [vmem:[%s7379_s6 + $0xba8] sm:$0xf0] }
 0x18e   : > { %v6890_v43 = vld [vmem:[%s7379_s6 + $0xd8c] sm:$0xf]  ;;  %v5890_v48 = vor.u32 %v6826_v31, %v5887_v39  ;;  %3752 = vmatpush.bf16.msrb.mxu0 %v5634_v47 }
 0x18f   : > { %v6143_v44 = vld [vmem:[%s7379_s6 + $0xda8] sm:$0xf0] }
 0x190   : > { %v6954_v45 = vld [vmem:[%s7379_s6 + $0xf8c] sm:$0xf]  ;;  %v6146_v49 = vor.u32 %v6890_v43, %v6143_v44  ;;  %3765 = vmatpush.bf16.msrb.mxu1 %v5890_v48  ;;  %v3527_v44 = vadd.f32 %v3526_v30, %v3514_v23  ;;  %v6711_v23 = vld [vmem:[%s7379_s6 + $0x7ec] sm:$0xf0] }
 0x191   : > { %v6399_v46 = vld [vmem:[%s7379_s6 + $0xfa8] sm:$0xf0]  ;;  %v4869_v30 = vld [vmem:[%s7379_s6 + $0x390] sm:$0xf] }
 0x192   : > { %v6754_v51 = vld [vmem:[%s7379_s6 + $0x94c] sm:$0xf]  ;;  %v6402_v54 = vor.u32 %v6954_v45, %v6399_v46  ;;  %3778 = vmatpush.bf16.msrb.mxu2 %v6146_v49  ;;  %v3539_v45 = vpop.f32.mrf.mxu3 }
 0x193   : > { %v5599_v52 = vld [vmem:[%s7379_s6 + $0x968] sm:$0xf0]  ;;  %v7935_v49 = vadd.f32 %v3539_v45, %v3527_v44  ;;  %v5381_v44 = vld [vmem:[%s7379_s6 + $0x790] sm:$0xf] }
 0x194   : > { %v6818_v53 = vld [vmem:[%s7379_s6 + $0xb4c] sm:$0xf]  ;;  %v5602_v60 = vor.u32 %v6754_v51, %v5599_v52  ;;  %3791 = vmatpush.bf16.msrb.mxu3 %v6402_v54  ;;  %v3502_v51 = vpop.f32.mrf.mxu0  ;;  %v6703_v45 = vld [vmem:[%s7379_s6 + $0x7ac] sm:$0xf0] }
 0x195   : > { %v5855_v55 = vld [vmem:[%s7379_s6 + $0xb68] sm:$0xf0]  ;;  %v4581_v51 = vld [vmem:[%s7379_s6 + $0x150] sm:$0xf] }
 0x196   : > { %v6882_v56 = vld [vmem:[%s7379_s6 + $0xd4c] sm:$0xf]  ;;  %v5858_v62 = vor.u32 %v6818_v53, %v5855_v55  ;;  %3753 = vmatpush.bf16.msrb.mxu0 %v5602_v60 }
 0x197   : > { %v6111_v57 = vld [vmem:[%s7379_s6 + $0xd68] sm:$0xf0] }
 0x198   : > { %v6946_v58 = vld [vmem:[%s7379_s6 + $0xf4c] sm:$0xf]  ;;  %v6114_v63 = vor.u32 %v6882_v56, %v6111_v57  ;;  %3766 = vmatpush.bf16.msrb.mxu1 %v5858_v62  ;;  %v3515_v57 = vpop.f32.mrf.mxu1 }
 0x199   : > { %v6367_v59 = vld [vmem:[%s7379_s6 + $0xf68] sm:$0xf0]  ;;  %v6631_v57 = vld [vmem:[%s7379_s6 + $0x56c] sm:$0xf0] }
 0x19a   : > { %v6746_v61 = vld [vmem:[%s7379_s6 + $0x90c] sm:$0xf]  ;;  %v6370_v3 = vor.u32 %v6946_v58, %v6367_v59  ;;  %3779 = vmatpush.bf16.msrb.mxu2 %v6114_v63 }
 0x19b   : > { %v5567_v0 = vld [vmem:[%s7379_s6 + $0x928] sm:$0xf0] }
 0x19c   : > { %v6810_v1 = vld [vmem:[%s7379_s6 + $0xb0c] sm:$0xf]  ;;  %v5570_v9 = vor.u32 %v6746_v61, %v5567_v0  ;;  %3792 = vmatpush.bf16.msrb.mxu3 %v6370_v3 }
 0x19d   : > { %v5823_v4 = vld [vmem:[%s7379_s6 + $0xb28] sm:$0xf0] }
 0x19e   : > { %v6874_v5 = vld [vmem:[%s7379_s6 + $0xd0c] sm:$0xf]  ;;  %v5826_v35 = vor.u32 %v6810_v1, %v5823_v4  ;;  %3754 = vmatpush.bf16.msrb.mxu0 %v5570_v9 }
 0x19f   : > { %v6079_v6 = vld [vmem:[%s7379_s6 + $0xd28] sm:$0xf0] }
 0x1a0   : > { %v6938_v7 = vld [vmem:[%s7379_s6 + $0xf0c] sm:$0xf]  ;;  %v6082_v11 = vor.u32 %v6874_v5, %v6079_v6  ;;  %3767 = vmatpush.bf16.msrb.mxu1 %v5826_v35 }
 0x1a1   : > { %v6335_v8 = vld [vmem:[%s7379_s6 + $0xf28] sm:$0xf0] }
 0x1a2   : > { %v6738_v12 = vld [vmem:[%s7379_s6 + $0x8cc] sm:$0xf]  ;;  %v6338_v17 = vor.u32 %v6938_v7, %v6335_v8  ;;  %3780 = vmatpush.bf16.msrb.mxu2 %v6082_v11  ;;  %v3528_v8 = vpop.f32.mrf.mxu2 }
 0x1a3   : > { %v5535_v13 = vld [vmem:[%s7379_s6 + $0x8e8] sm:$0xf0] }
 0x1a4   : > { %v6802_v14 = vld [vmem:[%s7379_s6 + $0xacc] sm:$0xf]  ;;  %v5538_v24 = vor.u32 %v6738_v12, %v5535_v13  ;;  %3793 = vmatpush.bf16.msrb.mxu3 %v6338_v17  ;;  %v3541_v12 = vpop.f32.mrf.mxu3  ;;  %v4645_v13 = vld [vmem:[%s7379_s6 + $0x1d0] sm:$0xf] }
 0x1a5   : > { %v5791_v18 = vld [vmem:[%s7379_s6 + $0xae8] sm:$0xf0]  ;;  %v6583_v17 = vld [vmem:[%s7379_s6 + $0x3ec] sm:$0xf0]  ;;  %v3565_v12 = vpop.f32.mrf.mxu1 }
 0x1a6   : > { %v6866_v19 = vld [vmem:[%s7379_s6 + $0xccc] sm:$0xf]  ;;  %v5794_v25 = vor.u32 %v6802_v14, %v5791_v18  ;;  %3755 = vmatpush.bf16.msrb.mxu0 %v5538_v24  ;;  %v6519_v14 = vld [vmem:[%s7379_s6 + $0x1ec] sm:$0xf0] }
 0x1a7   : > { %v6047_v20 = vld [vmem:[%s7379_s6 + $0xce8] sm:$0xf0]  ;;  %v5157_v18 = vld [vmem:[%s7379_s6 + $0x5d0] sm:$0xf] }
 0x1a8   : > { %v6930_v21 = vld [vmem:[%s7379_s6 + $0xecc] sm:$0xf]  ;;  %v6050_v26 = vor.u32 %v6866_v19, %v6047_v20  ;;  %3768 = vmatpush.bf16.msrb.mxu1 %v5794_v25  ;;  %v6647_v19 = vld [vmem:[%s7379_s6 + $0x5ec] sm:$0xf0]  ;;  %v4646_v25 = vor.u32 %v6519_v14, %v4645_v13 }
 0x1a9   : > { %v6303_v22 = vld [vmem:[%s7379_s6 + $0xee8] sm:$0xf0]  ;;  %v4517_v13 = vld [vmem:[%s7379_s6 + $0xd0] sm:$0xf] }
 0x1aa   : > { %v6730_v27 = vld [vmem:[%s7379_s6 + $0x88c] sm:$0xf]  ;;  %v6306_v31 = vor.u32 %v6930_v21, %v6303_v22  ;;  %3781 = vmatpush.bf16.msrb.mxu2 %v6050_v26  ;;  %v5413_v22 = vld [vmem:[%s7379_s6 + $0x7d0] sm:$0xf]  ;;  %v4902_v26 = vor.u32 %v6583_v17, %v4901_v15 }
 0x1ab   : > { %v5503_v28 = vld [vmem:[%s7379_s6 + $0x8a8] sm:$0xf0]  ;;  %v6487_v14 = vld [vmem:[%s7379_s6 + $0xec] sm:$0xf0] }
 0x1ac   : > { %v6794_v29 = vld [vmem:[%s7379_s6 + $0xa8c] sm:$0xf]  ;;  %v5506_v48 = vor.u32 %v6730_v27, %v5503_v28  ;;  %3794 = vmatpush.bf16.msrb.mxu3 %v6306_v31  ;;  %v5158_v27 = vor.u32 %v6647_v19, %v5157_v18  ;;  %v4613_v28 = vld [vmem:[%s7379_s6 + $0x190] sm:$0xf]  ;;  %v5414_v31 = vor.u32 %v6711_v23, %v5413_v22 }
 0x1ad   : > { %v5759_v36 = vld [vmem:[%s7379_s6 + $0xaa8] sm:$0xf0]  ;;  %v4773_v15 = vld [vmem:[%s7379_s6 + $0x2d0] sm:$0xf] }
 0x1ae   : > { %v6858_v39 = vld [vmem:[%s7379_s6 + $0xc8c] sm:$0xf]  ;;  %v5762_v52 = vor.u32 %v6794_v29, %v5759_v36  ;;  %3756 = vmatpush.bf16.msrb.mxu0 %v5506_v48  ;;  %v6511_v29 = vld [vmem:[%s7379_s6 + $0x1ac] sm:$0xf0] }
 0x1af   : > { %v6015_v43 = vld [vmem:[%s7379_s6 + $0xca8] sm:$0xf0]  ;;  %v6575_v36 = vld [vmem:[%s7379_s6 + $0x3ac] sm:$0xf0] }
 0x1b0   : > { %v6922_v46 = vld [vmem:[%s7379_s6 + $0xe8c] sm:$0xf]  ;;  %v6018_v53 = vor.u32 %v6858_v39, %v6015_v43  ;;  %3769 = vmatpush.bf16.msrb.mxu1 %v5762_v52  ;;  %v5125_v39 = vld [vmem:[%s7379_s6 + $0x590] sm:$0xf] }
 0x1b1   : > { %v6271_v47 = vld [vmem:[%s7379_s6 + $0xea8] sm:$0xf0]  ;;  %v6639_v43 = vld [vmem:[%s7379_s6 + $0x5ac] sm:$0xf0] }
 0x1b2   : > { %v6722_v54 = vld [vmem:[%s7379_s6 + $0x84c] sm:$0xf]  ;;  %v6274_v58 = vor.u32 %v6922_v46, %v6271_v47  ;;  %3782 = vmatpush.bf16.msrb.mxu2 %v6018_v53  ;;  %v4614_v46 = vor.u32 %v6511_v29, %v4613_v28  ;;  %v4870_v47 = vor.u32 %v6575_v36, %v4869_v30  ;;  %v5126_v48 = vor.u32 %v6639_v43, %v5125_v39  ;;  %v6503_v52 = vld [vmem:[%s7379_s6 + $0x16c] sm:$0xf0] }
 0x1b3   : > { %v5471_v55 = vld [vmem:[%s7379_s6 + $0x868] sm:$0xf0]  ;;  %v4837_v53 = vld [vmem:[%s7379_s6 + $0x350] sm:$0xf] }
 0x1b4   : > { %v6786_v56 = vld [vmem:[%s7379_s6 + $0xa4c] sm:$0xf]  ;;  %v5474_v0 = vor.u32 %v6722_v54, %v5471_v55  ;;  %3795 = vmatpush.bf16.msrb.mxu3 %v6274_v58  ;;  %v5382_v54 = vor.u32 %v6703_v45, %v5381_v44  ;;  %v6567_v55 = vld [vmem:[%s7379_s6 + $0x36c] sm:$0xf0] }
 0x1b5   : > { %v5727_v59 = vld [vmem:[%s7379_s6 + $0xa68] sm:$0xf0]  ;;  %v5349_v58 = vld [vmem:[%s7379_s6 + $0x750] sm:$0xf] }
 0x1b6   : > { %v6850_v60 = vld [vmem:[%s7379_s6 + $0xc4c] sm:$0xf]  ;;  %v5730_v3 = vor.u32 %v6786_v56, %v5727_v59  ;;  %3757 = vmatpush.bf16.msrb.mxu0 %v5474_v0  ;;  %v5093_v56 = vld [vmem:[%s7379_s6 + $0x550] sm:$0xf] }
 0x1b7   : > { %v5983_v61 = vld [vmem:[%s7379_s6 + $0xc68] sm:$0xf0]  ;;  %v6695_v59 = vld [vmem:[%s7379_s6 + $0x76c] sm:$0xf0] }
 0x1b8   : > { %v6914_v62 = vld [vmem:[%s7379_s6 + $0xe4c] sm:$0xf]  ;;  %v5986_v4 = vor.u32 %v6850_v60, %v5983_v61  ;;  %3770 = vmatpush.bf16.msrb.mxu1 %v5730_v3  ;;  %v4582_v60 = vor.u32 %v6503_v52, %v4581_v51  ;;  %v4838_v61 = vor.u32 %v6567_v55, %v4837_v53  ;;  %v6495_v0 = vld [vmem:[%s7379_s6 + $0x12c] sm:$0xf0] }
 0x1b9   : > { %v6239_v63 = vld [vmem:[%s7379_s6 + $0xe68] sm:$0xf0]  ;;  %v6559_v3 = vld [vmem:[%s7379_s6 + $0x32c] sm:$0xf0] }
 0x1ba   : > { %v6714_v1 = vld [vmem:[%s7379_s6 + $0x80c] sm:$0xf]  ;;  %v6242_v9 = vor.u32 %v6914_v62, %v6239_v63  ;;  %3783 = vmatpush.bf16.msrb.mxu2 %v5986_v4  ;;  %v5094_v62 = vor.u32 %v6631_v57, %v5093_v56  ;;  %v4549_v63 = vld [vmem:[%s7379_s6 + $0x110] sm:$0xf]  ;;  %v3567_v57 = vpop.f32.mrf.mxu1 }
 0x1bb   : > { %v5439_v2 = vld [vmem:[%s7379_s6 + $0x828] sm:$0xf0]  ;;  %v5061_v4 = vld [vmem:[%s7379_s6 + $0x510] sm:$0xf]  ;;  %v4550_v8 = vor.u32 %v6495_v0, %v4549_v63  ;;  %v4219_v0 = vmax.f32 %v7864_v50, 0.0 }
 0x1bc   : > { %v6778_v5 = vld [vmem:[%s7379_s6 + $0xa0c] sm:$0xf]  ;;  %v5442_v16 = vor.u32 %v6714_v1, %v5439_v2  ;;  %3796 = vmatpush.bf16.msrb.mxu3 %v6242_v9  ;;  %v4805_v1 = vld [vmem:[%s7379_s6 + $0x310] sm:$0xf]  ;;  %v5350_v2 = vor.u32 %v6695_v59, %v5349_v58  ;;  %v3552_v9 = vpop.f32.mrf.mxu0 }
 0x1bd   : > { %v5695_v6 = vld [vmem:[%s7379_s6 + $0xa28] sm:$0xf0]  ;;  %v6551_v17 = vld [vmem:[%s7379_s6 + $0x2ec] sm:$0xf0] }
 0x1be   : > { %v6842_v7 = vld [vmem:[%s7379_s6 + $0xc0c] sm:$0xf]  ;;  %v5698_v20 = vor.u32 %v6778_v5, %v5695_v6  ;;  %3758 = vmatpush.bf16.msrb.mxu0 %v5442_v16  ;;  %v6623_v5 = vld [vmem:[%s7379_s6 + $0x52c] sm:$0xf0]  ;;  %v4774_v23 = vor.u32 %v6551_v17, %v4773_v15 }
 0x1bf   : > { %v5951_v10 = vld [vmem:[%s7379_s6 + $0xc28] sm:$0xf0]  ;;  %v5317_v6 = vld [vmem:[%s7379_s6 + $0x710] sm:$0xf] }
 0x1c0   : > { %v6906_v35 = vld [vmem:[%s7379_s6 + $0xe0c] sm:$0xf]  ;;  %v5954_v21 = vor.u32 %v6842_v7, %v5951_v10  ;;  %3771 = vmatpush.bf16.msrb.mxu1 %v5698_v20  ;;  %v6687_v7 = vld [vmem:[%s7379_s6 + $0x72c] sm:$0xf0]  ;;  %v4806_v10 = vor.u32 %v6559_v3, %v4805_v1 }
 0x1c1   : > { %v6207_v11 = vld [vmem:[%s7379_s6 + $0xe28] sm:$0xf0]  ;;  %3759 = vmatmul.bf16.vlgmr.msrb.gmra.mxu0 %v7543_v37  ;;  %v5318_v16 = vor.u32 %v6687_v7, %v5317_v6  ;;  %v5029_v18 = vld [vmem:[%s7379_s6 + $0x4d0] sm:$0xf] }
 0x1c2   : > { %v6210_v24 = vor.u32 %v6906_v35, %v6207_v11  ;;  %3784 = vmatpush.bf16.msrb.mxu2 %v5954_v21  ;;  %3803 = vmatpush.bf16.msra.mxu0 %v4646_v25  ;;  %v5062_v35 = vor.u32 %v6623_v5, %v5061_v4  ;;  %v3553_v11 = vadd.f32 %v3552_v9, %v7935_v49  ;;  %v6615_v19 = vld [vmem:[%s7379_s6 + $0x4ec] sm:$0xf0]  ;;  %v3578_v25 = vpop.f32.mrf.mxu2 }
 0x1c3   : > { %3772 = vmatmul.bf16.vlgmr.msrb.gmra.mxu1 %v7547_v40  ;;  %v5285_v21 = vld [vmem:[%s7379_s6 + $0x6d0] sm:$0xf]  ;;  %v4518_v49 = vor.u32 %v6487_v14, %v4517_v13 }
 0x1c4   : > { %3797 = vmatpush.bf16.msrb.mxu3 %v6210_v24  ;;  %3816 = vmatpush.bf16.msra.mxu1 %v4902_v26  ;;  %v3566_v20 = vadd.f32 %v3565_v12, %v3553_v11  ;;  %v6679_v22 = vld [vmem:[%s7379_s6 + $0x6ec] sm:$0xf0]  ;;  %v5030_v24 = vor.u32 %v6615_v19, %v5029_v18  ;;  %v3554_v51 = vpop.f32.mrf.mxu0 }
 0x1c5   : > { %3785 = vmatmul.bf16.vlgmr.msrb.gmra.mxu2 %v7539_v32  ;;  %v4485_v26 = vld [vmem:[%s7379_s6 + $0x90] sm:$0xf]  ;;  %v5286_v29 = vor.u32 %v6679_v22, %v5285_v21 }
 0x1c6   : > { %3829 = vmatpush.bf16.msra.mxu2 %v5158_v27  ;;  %3804 = vmatpush.bf16.msra.mxu0 %v4614_v46  ;;  %v6479_v27 = vld [vmem:[%s7379_s6 + $0xac] sm:$0xf0]  ;;  %v3579_v30 = vadd.f32 %v3578_v25, %v3566_v20 }
 0x1c7   : > { %3798 = vmatmul.bf16.vlgmr.msrb.gmra.mxu3 %v7545_v38  ;;  %v4741_v28 = vld [vmem:[%s7379_s6 + $0x290] sm:$0xf] }
 0x1c8   : > { %3842 = vmatpush.bf16.msra.mxu3 %v5414_v31  ;;  %3817 = vmatpush.bf16.msra.mxu1 %v4870_v47  ;;  %v3591_v31 = vpop.f32.mrf.mxu3  ;;  %v6543_v36 = vld [vmem:[%s7379_s6 + $0x2ac] sm:$0xf0]  ;;  %v4486_v47 = vor.u32 %v6479_v27, %v4485_v26 }
 0x1c9   : > { %v4997_v39 = vld [vmem:[%s7379_s6 + $0x490] sm:$0xf]  ;;  %v3592_v46 = vadd.f32 %v3591_v31, %v3579_v30  ;;  %v4742_v52 = vor.u32 %v6543_v36, %v4741_v28 }
 0x1ca   : > { %3830 = vmatpush.bf16.msra.mxu2 %v5126_v48  ;;  %3805 = vmatpush.bf16.msra.mxu0 %v4582_v60  ;;  %v6607_v43 = vld [vmem:[%s7379_s6 + $0x4ac] sm:$0xf0]  ;;  %v3580_v9 = vpop.f32.mrf.mxu2 }
 0x1cb   : > { %v5253_v44 = vld [vmem:[%s7379_s6 + $0x690] sm:$0xf]  ;;  %v4998_v53 = vor.u32 %v6607_v43, %v4997_v39  ;;  %v4220_v58 = vmax.f32 %v3592_v46, 0.0 }
 0x1cc   : > { %3843 = vmatpush.bf16.msra.mxu3 %v5382_v54  ;;  %3818 = vmatpush.bf16.msra.mxu1 %v4838_v61  ;;  %v6671_v45 = vld [vmem:[%s7379_s6 + $0x6ac] sm:$0xf0] }
 0x1cd   : > { %v4453_v48 = vld [vmem:[%s7379_s6 + $0x50] sm:$0xf]  ;;  %v5254_v59 = vor.u32 %v6671_v45, %v5253_v44  ;;  %v4235_v1 = vrot.slane %v4220_v58, 6 }
 0x1ce   : > { %3831 = vmatpush.bf16.msra.mxu2 %v5094_v62  ;;  %3806 = vmatpush.bf16.msra.mxu0 %v4550_v8  ;;  %v6471_v54 = vld [vmem:[%s7379_s6 + $0x6c] sm:$0xf0] }
 0x1cf   : > { %v4709_v55 = vld [vmem:[%s7379_s6 + $0x250] sm:$0xf] }
 0x1d0   : > { %3844 = vmatpush.bf16.msra.mxu3 %v5350_v2  ;;  %3819 = vmatpush.bf16.msra.mxu1 %v4806_v10  ;;  %v6535_v56 = vld [vmem:[%s7379_s6 + $0x26c] sm:$0xf0]  ;;  %v4454_v2 = vor.u32 %v6471_v54, %v4453_v48  ;;  %v8021_v10 = vsel %vm4241_vm0, %v4219_v0, %v4235_v1  ;;  %v3593_v14 = vpop.f32.mrf.mxu3 }
 0x1d1   : > { %v4965_v60 = vld [vmem:[%s7379_s6 + $0x450] sm:$0xf]  ;;  %v4710_v5 = vor.u32 %v6535_v56, %v4709_v55 }
 0x1d2   : > { %3832 = vmatpush.bf16.msra.mxu2 %v5062_v35  ;;  %3807 = vmatpush.bf16.msra.mxu0 %v4518_v49  ;;  %v6599_v61 = vld [vmem:[%s7379_s6 + $0x46c] sm:$0xf0] }
 0x1d3   : > { %v5221_v62 = vld [vmem:[%s7379_s6 + $0x650] sm:$0xf]  ;;  %v4966_v6 = vor.u32 %v6599_v61, %v4965_v60 }
 0x1d4   : > { %3845 = vmatpush.bf16.msra.mxu3 %v5318_v16  ;;  %3820 = vmatpush.bf16.msra.mxu1 %v4774_v23  ;;  %v6663_v63 = vld [vmem:[%s7379_s6 + $0x66c] sm:$0xf0] }
 0x1d5   : > { %v4421_v3 = vld [vmem:[%s7379_s6 + $0x10] sm:$0xf]  ;;  %v5222_v35 = vor.u32 %v6663_v63, %v5221_v62 }
 0x1d6   : > { %3833 = vmatpush.bf16.msra.mxu2 %v5030_v24  ;;  %3808 = vmatpush.bf16.msra.mxu0 %v4486_v47  ;;  %v6463_v4 = vld [vmem:[%s7379_s6 + $0x2c] sm:$0xf0] }
 0x1d7   : > { %v4677_v7 = vld [vmem:[%s7379_s6 + $0x210] sm:$0xf]  ;;  %v4422_v18 = vor.u32 %v6463_v4, %v4421_v3  ;;  %v8058_v3 = vld [vmem:[%s7788_s10] sm:$0xff] }
 0x1d8   : > { %3846 = vmatpush.bf16.msra.mxu3 %v5286_v29  ;;  %3821 = vmatpush.bf16.msra.mxu1 %v4742_v52  ;;  %v6527_v8 = vld [vmem:[%s7379_s6 + $0x22c] sm:$0xf0]  ;;  %v813_v4 = vperm.slane %v8058_v3, 2 }
 0x1d9   : > { %v4933_v50 = vld [vmem:[%s7379_s6 + $0x410] sm:$0xf]  ;;  %v4678_v22 = vor.u32 %v6527_v8, %v4677_v7 }
 0x1da   : > { %3834 = vmatpush.bf16.msra.mxu2 %v4998_v53  ;;  %v6591_v11 = vld [vmem:[%s7379_s6 + $0x42c] sm:$0xf0]  ;;  %3809 = vmatpush.bf16.msra.mxu0 %v4454_v2 }
 0x1db   : > { %v5189_v12 = vld [vmem:[%s7379_s6 + $0x610] sm:$0xf]  ;;  %v4934_v49 = vor.u32 %v6591_v11, %v4933_v50  ;;  %v3604_v11 = vpop.f32.mrf.mxu0 }
 0x1dc   : > { %3847 = vmatpush.bf16.msra.mxu3 %v5254_v59  ;;  %v6655_v13 = vld [vmem:[%s7379_s6 + $0x62c] sm:$0xf0]  ;;  %3822 = vmatpush.bf16.msra.mxu1 %v4710_v5 }
 0x1dd   : > { %v5669_v15 = vld [vmem:[%s7379_s6 + $0x9d0] sm:$0xf]  ;;  %v5190_v25 = vor.u32 %v6655_v13, %v5189_v12 }
 0x1de   : > { %v6775_v16 = vld [vmem:[%s7379_s6 + $0x9ec] sm:$0xf0]  ;;  %3835 = vmatpush.bf16.msra.mxu2 %v4966_v6  ;;  %3810 = vmatpush.bf16.msra.mxu0 %v4422_v18  ;;  %v3617_v18 = vpop.f32.mrf.mxu1 }
 0x1df   : > { %v5925_v17 = vld [vmem:[%s7379_s6 + $0xbd0] sm:$0xf]  ;;  %v5670_v26 = vor.u32 %v6775_v16, %v5669_v15 }
 0x1e0   : > { %v6839_v19 = vld [vmem:[%s7379_s6 + $0xbec] sm:$0xf0]  ;;  %3848 = vmatpush.bf16.msra.mxu3 %v5222_v35  ;;  %3823 = vmatpush.bf16.msra.mxu1 %v4678_v22 }
 0x1e1   : > { %v6181_v20 = vld [vmem:[%s7379_s6 + $0xdd0] sm:$0xf]  ;;  %v5926_v27 = vor.u32 %v6839_v19, %v5925_v17  ;;  %3811 = vmatmul.bf16.vlgmr.msra.gmra.mxu0 %v7494_v34  ;;  %v3605_v17 = vadd.f32 %v3604_v11, %v813_v4 }
 0x1e2   : > { %v6903_v21 = vld [vmem:[%s7379_s6 + $0xdec] sm:$0xf0]  ;;  %3836 = vmatpush.bf16.msra.mxu2 %v4934_v49  ;;  %3855 = vmatpush.bf16.msrb.mxu0 %v5670_v26 }
 0x1e3   : > { %v6437_v23 = vld [vmem:[%s7379_s6 + $0xfd0] sm:$0xf]  ;;  %v6182_v28 = vor.u32 %v6903_v21, %v6181_v20  ;;  %3824 = vmatmul.bf16.vlgmr.msra.gmra.mxu1 %v7501_v42 }
 0x1e4   : > { %v6967_v24 = vld [vmem:[%s7379_s6 + $0xfec] sm:$0xf0]  ;;  %3849 = vmatpush.bf16.msra.mxu3 %v5190_v25  ;;  %3868 = vmatpush.bf16.msrb.mxu1 %v5926_v27 }
 0x1e5   : > { %v5637_v29 = vld [vmem:[%s7379_s6 + $0x990] sm:$0xf]  ;;  %v6438_v36 = vor.u32 %v6967_v24, %v6437_v23  ;;  %3837 = vmatmul.bf16.vlgmr.msra.gmra.mxu2 %v7492_v33  ;;  %v3618_v24 = vadd.f32 %v3617_v18, %v3605_v17  ;;  %v4647_v17 = vld [vmem:[%s7379_s6 + $0x1f0] sm:$0xf0] }
 0x1e6   : > { %v6767_v30 = vld [vmem:[%s7379_s6 + $0x9ac] sm:$0xf0]  ;;  %3881 = vmatpush.bf16.msrb.mxu2 %v6182_v28  ;;  %v6579_v18 = vld [vmem:[%s7379_s6 + $0x3d4] sm:$0xf] }
 0x1e7   : > { %v5893_v31 = vld [vmem:[%s7379_s6 + $0xb90] sm:$0xf]  ;;  %v5638_v47 = vor.u32 %v6767_v30, %v5637_v29  ;;  %3850 = vmatmul.bf16.vlgmr.msra.gmra.mxu3 %v7499_v41 }
 0x1e8   : > { %v6831_v39 = vld [vmem:[%s7379_s6 + $0xbac] sm:$0xf0]  ;;  %3894 = vmatpush.bf16.msrb.mxu3 %v6438_v36 }
 0x1e9   : > { %v6149_v43 = vld [vmem:[%s7379_s6 + $0xd90] sm:$0xf]  ;;  %v5894_v48 = vor.u32 %v6831_v39, %v5893_v31  ;;  %3856 = vmatpush.bf16.msrb.mxu0 %v5638_v47  ;;  %v3630_v31 = vpop.f32.mrf.mxu2 }
 0x1ea   : > { %v6895_v44 = vld [vmem:[%s7379_s6 + $0xdac] sm:$0xf0] }
 0x1eb   : > { %v6405_v45 = vld [vmem:[%s7379_s6 + $0xf90] sm:$0xf]  ;;  %v6150_v51 = vor.u32 %v6895_v44, %v6149_v43  ;;  %3869 = vmatpush.bf16.msrb.mxu1 %v5894_v48 }
 0x1ec   : > { %v6959_v46 = vld [vmem:[%s7379_s6 + $0xfac] sm:$0xf0] }
 0x1ed   : > { %v5605_v52 = vld [vmem:[%s7379_s6 + $0x950] sm:$0xf]  ;;  %v6406_v55 = vor.u32 %v6959_v46, %v6405_v45  ;;  %3882 = vmatpush.bf16.msrb.mxu2 %v6150_v51  ;;  %v3631_v45 = vadd.f32 %v3630_v31, %v3618_v24  ;;  %v3643_v46 = vpop.f32.mrf.mxu3  ;;  %v6707_v24 = vld [vmem:[%s7379_s6 + $0x7d4] sm:$0xf] }
 0x1ee   : > { %v6759_v53 = vld [vmem:[%s7379_s6 + $0x96c] sm:$0xf0]  ;;  %v4615_v31 = vld [vmem:[%s7379_s6 + $0x1b0] sm:$0xf0] }
 0x1ef   : > { %v5861_v54 = vld [vmem:[%s7379_s6 + $0xb50] sm:$0xf]  ;;  %v5606_v61 = vor.u32 %v6759_v53, %v5605_v52  ;;  %3895 = vmatpush.bf16.msrb.mxu3 %v6406_v55  ;;  %v8082_v52 = vadd.f32 %v3643_v46, %v3631_v45  ;;  %v3606_v53 = vpop.f32.mrf.mxu0  ;;  %v5127_v45 = vld [vmem:[%s7379_s6 + $0x5b0] sm:$0xf0] }
 0x1f0   : > { %v6823_v56 = vld [vmem:[%s7379_s6 + $0xb6c] sm:$0xf0]  ;;  %v6699_v46 = vld [vmem:[%s7379_s6 + $0x794] sm:$0xf] }
 0x1f1   : > { %v6117_v57 = vld [vmem:[%s7379_s6 + $0xd50] sm:$0xf]  ;;  %v5862_v63 = vor.u32 %v6823_v56, %v5861_v54  ;;  %3857 = vmatpush.bf16.msrb.mxu0 %v5606_v61 }
 0x1f2   : > { %v6887_v58 = vld [vmem:[%s7379_s6 + $0xd6c] sm:$0xf0] }
 0x1f3   : > { %v6373_v59 = vld [vmem:[%s7379_s6 + $0xf50] sm:$0xf]  ;;  %v6118_v0 = vor.u32 %v6887_v58, %v6117_v57  ;;  %3870 = vmatpush.bf16.msrb.mxu1 %v5862_v63 }
 0x1f4   : > { %v6951_v60 = vld [vmem:[%s7379_s6 + $0xf6c] sm:$0xf0] }
 0x1f5   : > { %v5573_v62 = vld [vmem:[%s7379_s6 + $0x910] sm:$0xf]  ;;  %v6374_v5 = vor.u32 %v6951_v60, %v6373_v59  ;;  %3883 = vmatpush.bf16.msrb.mxu2 %v6118_v0  ;;  %v3619_v59 = vpop.f32.mrf.mxu1 }
 0x1f6   : > { %v6751_v1 = vld [vmem:[%s7379_s6 + $0x92c] sm:$0xf0]  ;;  %v6627_v59 = vld [vmem:[%s7379_s6 + $0x554] sm:$0xf] }
 0x1f7   : > { %v5829_v2 = vld [vmem:[%s7379_s6 + $0xb10] sm:$0xf]  ;;  %v5574_v35 = vor.u32 %v6751_v1, %v5573_v62  ;;  %3896 = vmatpush.bf16.msrb.mxu3 %v6374_v5 }
 0x1f8   : > { %v6815_v6 = vld [vmem:[%s7379_s6 + $0xb2c] sm:$0xf0] }
 0x1f9   : > { %v6085_v7 = vld [vmem:[%s7379_s6 + $0xd10] sm:$0xf]  ;;  %v5830_v12 = vor.u32 %v6815_v6, %v5829_v2  ;;  %3858 = vmatpush.bf16.msrb.mxu0 %v5574_v35  ;;  %v3632_v35 = vpop.f32.mrf.mxu2 }
 0x1fa   : > { %v6879_v8 = vld [vmem:[%s7379_s6 + $0xd2c] sm:$0xf0]  ;;  %v5319_v35 = vld [vmem:[%s7379_s6 + $0x730] sm:$0xf0] }
 0x1fb   : > { %v6341_v50 = vld [vmem:[%s7379_s6 + $0xf10] sm:$0xf]  ;;  %v6086_v13 = vor.u32 %v6879_v8, %v6085_v7  ;;  %3871 = vmatpush.bf16.msrb.mxu1 %v5830_v12 }
 0x1fc   : > { %v6943_v9 = vld [vmem:[%s7379_s6 + $0xf2c] sm:$0xf0] }
 0x1fd   : > { %v5541_v14 = vld [vmem:[%s7379_s6 + $0x8d0] sm:$0xf]  ;;  %v6342_v19 = vor.u32 %v6943_v9, %v6341_v50  ;;  %3884 = vmatpush.bf16.msrb.mxu2 %v6086_v13 }
 0x1fe   : > { %v6743_v15 = vld [vmem:[%s7379_s6 + $0x8ec] sm:$0xf0] }
 0x1ff   : > { %v5797_v16 = vld [vmem:[%s7379_s6 + $0xad0] sm:$0xf]  ;;  %v5542_v25 = vor.u32 %v6743_v15, %v5541_v14  ;;  %3897 = vmatpush.bf16.msrb.mxu3 %v6342_v19  ;;  %v3645_v15 = vpop.f32.mrf.mxu3 }
 0x200   : > { %v6807_v20 = vld [vmem:[%s7379_s6 + $0xaec] sm:$0xf0]  ;;  %v6483_v15 = vld [vmem:[%s7379_s6 + $0xd4] sm:$0xf] }
 0x201   : > { %v6053_v21 = vld [vmem:[%s7379_s6 + $0xcd0] sm:$0xf]  ;;  %v5798_v26 = vor.u32 %v6807_v20, %v5797_v16  ;;  %3859 = vmatpush.bf16.msrb.mxu0 %v5542_v25  ;;  %v6515_v16 = vld [vmem:[%s7379_s6 + $0x1d4] sm:$0xf] }
 0x202   : > { %v6871_v22 = vld [vmem:[%s7379_s6 + $0xcec] sm:$0xf0]  ;;  %v4903_v20 = vld [vmem:[%s7379_s6 + $0x3f0] sm:$0xf0] }
 0x203   : > { %v6309_v49 = vld [vmem:[%s7379_s6 + $0xed0] sm:$0xf]  ;;  %v6054_v27 = vor.u32 %v6871_v22, %v6053_v21  ;;  %3872 = vmatpush.bf16.msrb.mxu1 %v5798_v26  ;;  %v6643_v21 = vld [vmem:[%s7379_s6 + $0x5d4] sm:$0xf] }
 0x204   : > { %v6935_v23 = vld [vmem:[%s7379_s6 + $0xeec] sm:$0xf0]  ;;  %v5159_v22 = vld [vmem:[%s7379_s6 + $0x5f0] sm:$0xf0] }
 0x205   : > { %v5509_v28 = vld [vmem:[%s7379_s6 + $0x890] sm:$0xf]  ;;  %v6310_v36 = vor.u32 %v6935_v23, %v6309_v49  ;;  %3885 = vmatpush.bf16.msrb.mxu2 %v6054_v27  ;;  %v5415_v25 = vld [vmem:[%s7379_s6 + $0x7f0] sm:$0xf0]  ;;  %v4650_v27 = vor.u32 %v6515_v16, %v4647_v17 }
 0x206   : > { %v6735_v29 = vld [vmem:[%s7379_s6 + $0x8ac] sm:$0xf0]  ;;  %v4519_v16 = vld [vmem:[%s7379_s6 + $0xf0] sm:$0xf0] }
 0x207   : > { %v5765_v30 = vld [vmem:[%s7379_s6 + $0xa90] sm:$0xf]  ;;  %v5510_v51 = vor.u32 %v6735_v29, %v5509_v28  ;;  %3898 = vmatpush.bf16.msrb.mxu3 %v6310_v36  ;;  %v4906_v28 = vor.u32 %v6579_v18, %v4903_v20  ;;  %v5162_v29 = vor.u32 %v6643_v21, %v5159_v22  ;;  %v6571_v36 = vld [vmem:[%s7379_s6 + $0x394] sm:$0xf]  ;;  %v8141_v18 = vpop.f32.mrf.mxu1 }
 0x208   : > { %v6799_v39 = vld [vmem:[%s7379_s6 + $0xaac] sm:$0xf0]  ;;  %v6547_v17 = vld [vmem:[%s7379_s6 + $0x2d4] sm:$0xf] }
 0x209   : > { %v6021_v43 = vld [vmem:[%s7379_s6 + $0xc90] sm:$0xf]  ;;  %v5766_v54 = vor.u32 %v6799_v39, %v5765_v30  ;;  %3860 = vmatpush.bf16.msrb.mxu0 %v5510_v51  ;;  %v6507_v30 = vld [vmem:[%s7379_s6 + $0x194] sm:$0xf]  ;;  %v5418_v39 = vor.u32 %v6707_v24, %v5415_v25  ;;  %v4522_v24 = vor.u32 %v6483_v15, %v4519_v16 }
 0x20a   : > { %v6863_v44 = vld [vmem:[%s7379_s6 + $0xcac] sm:$0xf0]  ;;  %v4775_v20 = vld [vmem:[%s7379_s6 + $0x2f0] sm:$0xf0] }
 0x20b   : > { %v6277_v47 = vld [vmem:[%s7379_s6 + $0xe90] sm:$0xf]  ;;  %v6022_v55 = vor.u32 %v6863_v44, %v6021_v43  ;;  %3873 = vmatpush.bf16.msrb.mxu1 %v5766_v54  ;;  %v4871_v43 = vld [vmem:[%s7379_s6 + $0x3b0] sm:$0xf0]  ;;  %v4778_v25 = vor.u32 %v6547_v17, %v4775_v20 }
 0x20c   : > { %v6927_v48 = vld [vmem:[%s7379_s6 + $0xeac] sm:$0xf0]  ;;  %v6635_v44 = vld [vmem:[%s7379_s6 + $0x594] sm:$0xf]  ;;  %v4874_v51 = vor.u32 %v6571_v36, %v4871_v43 }
 0x20d   : > { %v5477_v56 = vld [vmem:[%s7379_s6 + $0x850] sm:$0xf]  ;;  %v6278_v60 = vor.u32 %v6927_v48, %v6277_v47  ;;  %3886 = vmatpush.bf16.msrb.mxu2 %v6022_v55  ;;  %v5383_v47 = vld [vmem:[%s7379_s6 + $0x7b0] sm:$0xf0]  ;;  %v4618_v48 = vor.u32 %v6507_v30, %v4615_v31  ;;  %v5130_v53 = vor.u32 %v6635_v44, %v5127_v45  ;;  %v8151_v30 = vpop.f32.mrf.mxu2  ;;  %v8156_v44 = vpop.f32.mrf.mxu3 }
 0x20e   : > { %v6727_v57 = vld [vmem:[%s7379_s6 + $0x86c] sm:$0xf0]  ;;  %v6499_v54 = vld [vmem:[%s7379_s6 + $0x154] sm:$0xf] }
 0x20f   : > { %v5733_v58 = vld [vmem:[%s7379_s6 + $0xa50] sm:$0xf]  ;;  %v5478_v2 = vor.u32 %v6727_v57, %v5477_v56  ;;  %3899 = vmatpush.bf16.msrb.mxu3 %v6278_v60  ;;  %v4583_v55 = vld [vmem:[%s7379_s6 + $0x170] sm:$0xf0]  ;;  %v5386_v57 = vor.u32 %v6699_v46, %v5383_v47 }
 0x210   : > { %v6791_v61 = vld [vmem:[%s7379_s6 + $0xa6c] sm:$0xf0]  ;;  %v6563_v56 = vld [vmem:[%s7379_s6 + $0x354] sm:$0xf] }
 0x211   : > { %v5989_v62 = vld [vmem:[%s7379_s6 + $0xc50] sm:$0xf]  ;;  %v5734_v6 = vor.u32 %v6791_v61, %v5733_v58  ;;  %3861 = vmatpush.bf16.msrb.mxu0 %v5478_v2  ;;  %v4839_v58 = vld [vmem:[%s7379_s6 + $0x370] sm:$0xf0] }
 0x212   : > { %v6855_v63 = vld [vmem:[%s7379_s6 + $0xc6c] sm:$0xf0]  ;;  %v5095_v60 = vld [vmem:[%s7379_s6 + $0x570] sm:$0xf0] }
 0x213   : > { %v6245_v0 = vld [vmem:[%s7379_s6 + $0xe50] sm:$0xf]  ;;  %v5990_v7 = vor.u32 %v6855_v63, %v5989_v62  ;;  %3874 = vmatpush.bf16.msrb.mxu1 %v5734_v6  ;;  %v6691_v61 = vld [vmem:[%s7379_s6 + $0x754] sm:$0xf]  ;;  %v4586_v63 = vor.u32 %v6499_v54, %v4583_v55 }
 0x214   : > { %v6919_v1 = vld [vmem:[%s7379_s6 + $0xe6c] sm:$0xf0]  ;;  %v5351_v62 = vld [vmem:[%s7379_s6 + $0x770] sm:$0xf0] }
 0x215   : > { %v5445_v4 = vld [vmem:[%s7379_s6 + $0x810] sm:$0xf]  ;;  %v6246_v11 = vor.u32 %v6919_v1, %v6245_v0  ;;  %3887 = vmatpush.bf16.msrb.mxu2 %v5990_v7  ;;  %v4842_v0 = vor.u32 %v6563_v56, %v4839_v58  ;;  %v5098_v1 = vor.u32 %v6627_v59, %v5095_v60  ;;  %v6491_v2 = vld [vmem:[%s7379_s6 + $0x114] sm:$0xf]  ;;  %v5354_v6 = vor.u32 %v6691_v61, %v5351_v62 }
 0x216   : > { %v6719_v5 = vld [vmem:[%s7379_s6 + $0x82c] sm:$0xf0]  ;;  %v4807_v7 = vld [vmem:[%s7379_s6 + $0x330] sm:$0xf0] }
 0x217   : > { %v5701_v8 = vld [vmem:[%s7379_s6 + $0xa10] sm:$0xf]  ;;  %v5446_v19 = vor.u32 %v6719_v5, %v5445_v4  ;;  %3900 = vmatpush.bf16.msrb.mxu3 %v6246_v11  ;;  %v4551_v4 = vld [vmem:[%s7379_s6 + $0x130] sm:$0xf0] }
 0x218   : > { %v6783_v50 = vld [vmem:[%s7379_s6 + $0xa2c] sm:$0xf0]  ;;  %v6555_v5 = vld [vmem:[%s7379_s6 + $0x314] sm:$0xf]  ;;  %v4554_v11 = vor.u32 %v6491_v2, %v4551_v4 }
 0x219   : > { %v5957_v9 = vld [vmem:[%s7379_s6 + $0xc10] sm:$0xf]  ;;  %v5702_v49 = vor.u32 %v6783_v50, %v5701_v8  ;;  %3862 = vmatpush.bf16.msrb.mxu0 %v5446_v19  ;;  %v6619_v8 = vld [vmem:[%s7379_s6 + $0x514] sm:$0xf] }
 0x21a   : > { %v6847_v12 = vld [vmem:[%s7379_s6 + $0xc2c] sm:$0xf0]  ;;  %v5063_v50 = vld [vmem:[%s7379_s6 + $0x530] sm:$0xf0] }
 0x21b   : > { %v6213_v13 = vld [vmem:[%s7379_s6 + $0xe10] sm:$0xf]  ;;  %v5958_v23 = vor.u32 %v6847_v12, %v5957_v9  ;;  %3875 = vmatpush.bf16.msrb.mxu1 %v5702_v49  ;;  %v6683_v9 = vld [vmem:[%s7379_s6 + $0x714] sm:$0xf]  ;;  %v8136_v12 = vpop.f32.mrf.mxu0 }
 0x21c   : > { %v6911_v14 = vld [vmem:[%s7379_s6 + $0xe2c] sm:$0xf0]  ;;  %3863 = vmatmul.bf16.vlgmr.msrb.gmra.mxu0 %v7543_v37  ;;  %v5322_v19 = vor.u32 %v6683_v9, %v5319_v35  ;;  %v6611_v21 = vld [vmem:[%s7379_s6 + $0x4d4] sm:$0xf] }
 0x21d   : > { %v6214_v26 = vor.u32 %v6911_v14, %v6213_v13  ;;  %3888 = vmatpush.bf16.msrb.mxu2 %v5958_v23  ;;  %3907 = vmatpush.bf16.msra.mxu0 %v4650_v27  ;;  %v4810_v13 = vor.u32 %v6555_v5, %v4807_v7  ;;  %v5066_v14 = vor.u32 %v6619_v8, %v5063_v50  ;;  %v5031_v22 = vld [vmem:[%s7379_s6 + $0x4f0] sm:$0xf0]  ;;  %v3684_v50 = vpop.f32.mrf.mxu2 }
 0x21e   : > { %3876 = vmatmul.bf16.vlgmr.msrb.gmra.mxu1 %v7547_v40  ;;  %v6675_v49 = vld [vmem:[%s7379_s6 + $0x6d4] sm:$0xf] }
 0x21f   : > { %3901 = vmatpush.bf16.msrb.mxu3 %v6214_v26  ;;  %3920 = vmatpush.bf16.msra.mxu1 %v4906_v28  ;;  %v5287_v23 = vld [vmem:[%s7379_s6 + $0x6f0] sm:$0xf0]  ;;  %v5034_v26 = vor.u32 %v6611_v21, %v5031_v22 }
 0x220   : > { %3889 = vmatmul.bf16.vlgmr.msrb.gmra.mxu2 %v7539_v32  ;;  %v6475_v27 = vld [vmem:[%s7379_s6 + $0x94] sm:$0xf]  ;;  %v5290_v31 = vor.u32 %v6675_v49, %v5287_v23 }
 0x221   : > { %3933 = vmatpush.bf16.msra.mxu2 %v5162_v29  ;;  %3908 = vmatpush.bf16.msra.mxu0 %v4618_v48  ;;  %v4487_v28 = vld [vmem:[%s7379_s6 + $0xb0] sm:$0xf0] }
 0x222   : > { %3902 = vmatmul.bf16.vlgmr.msrb.gmra.mxu3 %v7545_v38  ;;  %v6539_v29 = vld [vmem:[%s7379_s6 + $0x294] sm:$0xf]  ;;  %v4490_v47 = vor.u32 %v6475_v27, %v4487_v28 }
 0x223   : > { %3946 = vmatpush.bf16.msra.mxu3 %v5418_v39  ;;  %3921 = vmatpush.bf16.msra.mxu1 %v4874_v51  ;;  %v4743_v36 = vld [vmem:[%s7379_s6 + $0x2b0] sm:$0xf0]  ;;  %v3658_v48 = vpop.f32.mrf.mxu0 }
 0x224   : > { %v6603_v39 = vld [vmem:[%s7379_s6 + $0x494] sm:$0xf]  ;;  %v4746_v51 = vor.u32 %v6539_v29, %v4743_v36 }
 0x225   : > { %3934 = vmatpush.bf16.msra.mxu2 %v5130_v53  ;;  %3909 = vmatpush.bf16.msra.mxu0 %v4586_v63  ;;  %v4999_v43 = vld [vmem:[%s7379_s6 + $0x4b0] sm:$0xf0] }
 0x226   : > { %v6667_v45 = vld [vmem:[%s7379_s6 + $0x694] sm:$0xf]  ;;  %v5002_v53 = vor.u32 %v6603_v39, %v4999_v43 }
 0x227   : > { %3947 = vmatpush.bf16.msra.mxu3 %v5386_v57  ;;  %3922 = vmatpush.bf16.msra.mxu1 %v4842_v0  ;;  %v5255_v46 = vld [vmem:[%s7379_s6 + $0x6b0] sm:$0xf0]  ;;  %v3671_v57 = vpop.f32.mrf.mxu1 }
 0x228   : > { %v6467_v54 = vld [vmem:[%s7379_s6 + $0x54] sm:$0xf]  ;;  %v5258_v58 = vor.u32 %v6667_v45, %v5255_v46 }
 0x229   : > { %3935 = vmatpush.bf16.msra.mxu2 %v5098_v1  ;;  %3910 = vmatpush.bf16.msra.mxu0 %v4554_v11  ;;  %v4455_v55 = vld [vmem:[%s7379_s6 + $0x70] sm:$0xf0] }
 0x22a   : > { %v6531_v56 = vld [vmem:[%s7379_s6 + $0x254] sm:$0xf]  ;;  %v4458_v0 = vor.u32 %v6467_v54, %v4455_v55 }
 0x22b   : > { %3948 = vmatpush.bf16.msra.mxu3 %v5354_v6  ;;  %3923 = vmatpush.bf16.msra.mxu1 %v4810_v13  ;;  %v4711_v59 = vld [vmem:[%s7379_s6 + $0x270] sm:$0xf0] }
 0x22c   : > { %v6595_v60 = vld [vmem:[%s7379_s6 + $0x454] sm:$0xf]  ;;  %v4714_v4 = vor.u32 %v6531_v56, %v4711_v59 }
 0x22d   : > { %3936 = vmatpush.bf16.msra.mxu2 %v5066_v14  ;;  %3911 = vmatpush.bf16.msra.mxu0 %v4522_v24  ;;  %v4967_v61 = vld [vmem:[%s7379_s6 + $0x470] sm:$0xf0]  ;;  %v3697_v14 = vpop.f32.mrf.mxu3 }
 0x22e   : > { %v6659_v62 = vld [vmem:[%s7379_s6 + $0x654] sm:$0xf]  ;;  %v4970_v5 = vor.u32 %v6595_v60, %v4967_v61 }
 0x22f   : > { %3949 = vmatpush.bf16.msra.mxu3 %v5322_v19  ;;  %3924 = vmatpush.bf16.msra.mxu1 %v4778_v25  ;;  %v5223_v63 = vld [vmem:[%s7379_s6 + $0x670] sm:$0xf0] }
 0x230   : > { %v6459_v1 = vld [vmem:[%s7379_s6 + $0x14] sm:$0xf]  ;;  %v5226_v9 = vor.u32 %v6659_v62, %v5223_v63 }
 0x231   : > { %3937 = vmatpush.bf16.msra.mxu2 %v5034_v26  ;;  %3912 = vmatpush.bf16.msra.mxu0 %v4490_v47  ;;  %v4423_v2 = vld [vmem:[%s7379_s6 + $0x30] sm:$0xf0] }
 0x232   : > { %v6523_v6 = vld [vmem:[%s7379_s6 + $0x214] sm:$0xf]  ;;  %v4426_v19 = vor.u32 %v6459_v1, %v4423_v2 }
 0x233   : > { %3950 = vmatpush.bf16.msra.mxu3 %v5290_v31  ;;  %3925 = vmatpush.bf16.msra.mxu1 %v4746_v51  ;;  %v4679_v7 = vld [vmem:[%s7379_s6 + $0x230] sm:$0xf0] }
 0x234   : > { %v6587_v8 = vld [vmem:[%s7379_s6 + $0x414] sm:$0xf]  ;;  %v4682_v49 = vor.u32 %v6523_v6, %v4679_v7 }
 0x235   : > { %3938 = vmatpush.bf16.msra.mxu2 %v5002_v53  ;;  %v4935_v35 = vld [vmem:[%s7379_s6 + $0x430] sm:$0xf0]  ;;  %3913 = vmatpush.bf16.msra.mxu0 %v4458_v0 }
 0x236   : > { %v6651_v11 = vld [vmem:[%s7379_s6 + $0x614] sm:$0xf]  ;;  %v4938_v23 = vor.u32 %v6587_v8, %v4935_v35 }
 0x237   : > { %3951 = vmatpush.bf16.msra.mxu3 %v5258_v58  ;;  %v5191_v13 = vld [vmem:[%s7379_s6 + $0x630] sm:$0xf0]  ;;  %3926 = vmatpush.bf16.msra.mxu1 %v4714_v4 }
 0x238   : > { %v6771_v15 = vld [vmem:[%s7379_s6 + $0x9d4] sm:$0xf]  ;;  %v5194_v26 = vor.u32 %v6651_v11, %v5191_v13 }
 0x239   : > { %v5671_v16 = vld [vmem:[%s7379_s6 + $0x9f0] sm:$0xf0]  ;;  %3939 = vmatpush.bf16.msra.mxu2 %v4970_v5  ;;  %3914 = vmatpush.bf16.msra.mxu0 %v4426_v19 }
 0x23a   : > { %v6835_v17 = vld [vmem:[%s7379_s6 + $0xbd4] sm:$0xf]  ;;  %v5674_v27 = vor.u32 %v6771_v15, %v5671_v16  ;;  %v8212_v15 = vpop.f32.mrf.mxu0 }
 0x23b   : > { %v5927_v20 = vld [vmem:[%s7379_s6 + $0xbf0] sm:$0xf0]  ;;  %3952 = vmatpush.bf16.msra.mxu3 %v5226_v9  ;;  %3927 = vmatpush.bf16.msra.mxu1 %v4682_v49 }
 0x23c   : > { %v6899_v21 = vld [vmem:[%s7379_s6 + $0xdd4] sm:$0xf]  ;;  %v5930_v28 = vor.u32 %v6835_v17, %v5927_v20  ;;  %3915 = vmatmul.bf16.vlgmr.msra.gmra.mxu0 %v7494_v34 }
 0x23d   : > { %v6183_v22 = vld [vmem:[%s7379_s6 + $0xdf0] sm:$0xf0]  ;;  %3940 = vmatpush.bf16.msra.mxu2 %v4938_v23  ;;  %3959 = vmatpush.bf16.msrb.mxu0 %v5674_v27 }
 0x23e   : > { %v6963_v24 = vld [vmem:[%s7379_s6 + $0xfd4] sm:$0xf]  ;;  %v6186_v29 = vor.u32 %v6899_v21, %v6183_v22  ;;  %3928 = vmatmul.bf16.vlgmr.msra.gmra.mxu1 %v7501_v42  ;;  %v8217_v22 = vpop.f32.mrf.mxu1 }
 0x23f   : > { %v6439_v25 = vld [vmem:[%s7379_s6 + $0xff0] sm:$0xf0]  ;;  %3953 = vmatpush.bf16.msra.mxu3 %v5194_v26  ;;  %3972 = vmatpush.bf16.msrb.mxu1 %v5930_v28 }
 0x240   : > { %v6763_v31 = vld [vmem:[%s7379_s6 + $0x994] sm:$0xf]  ;;  %v6442_v43 = vor.u32 %v6963_v24, %v6439_v25  ;;  %3941 = vmatmul.bf16.vlgmr.msra.gmra.mxu2 %v7492_v33 }
 0x241   : > { %v5639_v36 = vld [vmem:[%s7379_s6 + $0x9b0] sm:$0xf0]  ;;  %3985 = vmatpush.bf16.msrb.mxu2 %v6186_v29 }
 0x242   : > { %v6827_v39 = vld [vmem:[%s7379_s6 + $0xb94] sm:$0xf]  ;;  %v5642_v53 = vor.u32 %v6763_v31, %v5639_v36  ;;  %3954 = vmatmul.bf16.vlgmr.msra.gmra.mxu3 %v7499_v41 }
 0x243   : > { %v5895_v45 = vld [vmem:[%s7379_s6 + $0xbb0] sm:$0xf0]  ;;  %3998 = vmatpush.bf16.msrb.mxu3 %v6442_v43 }
 0x244   : > { %v6891_v46 = vld [vmem:[%s7379_s6 + $0xd94] sm:$0xf]  ;;  %v5898_v54 = vor.u32 %v6827_v39, %v5895_v45  ;;  %3960 = vmatpush.bf16.msrb.mxu0 %v5642_v53  ;;  %v8227_v45 = vpop.f32.mrf.mxu2  ;;  %v8232_v53 = vpop.f32.mrf.mxu3 }
 0x245   : > { %v6151_v47 = vld [vmem:[%s7379_s6 + $0xdb0] sm:$0xf0] }
 0x246   : > { %v6955_v48 = vld [vmem:[%s7379_s6 + $0xf94] sm:$0xf]  ;;  %v6154_v55 = vor.u32 %v6891_v46, %v6151_v47  ;;  %3973 = vmatpush.bf16.msrb.mxu1 %v5898_v54 }
 0x247   : > { %v6407_v51 = vld [vmem:[%s7379_s6 + $0xfb0] sm:$0xf0] }
 0x248   : > { %v6755_v56 = vld [vmem:[%s7379_s6 + $0x954] sm:$0xf]  ;;  %v6410_v59 = vor.u32 %v6955_v48, %v6407_v51  ;;  %3986 = vmatpush.bf16.msrb.mxu2 %v6154_v55 }
 0x249   : > { %v5607_v57 = vld [vmem:[%s7379_s6 + $0x970] sm:$0xf0] }
 0x24a   : > { %v6819_v58 = vld [vmem:[%s7379_s6 + $0xb54] sm:$0xf]  ;;  %v5610_v1 = vor.u32 %v6755_v56, %v5607_v57  ;;  %3999 = vmatpush.bf16.msrb.mxu3 %v6410_v59  ;;  %v3710_v57 = vpop.f32.mrf.mxu0 }
 0x24b   : > { %v5863_v60 = vld [vmem:[%s7379_s6 + $0xb70] sm:$0xf0]  ;;  %v4877_v57 = vld [vmem:[%s7379_s6 + $0x398] sm:$0xf] }
 0x24c   : > { %v6883_v61 = vld [vmem:[%s7379_s6 + $0xd54] sm:$0xf]  ;;  %v5866_v2 = vor.u32 %v6819_v58, %v5863_v60  ;;  %3961 = vmatpush.bf16.msrb.mxu0 %v5610_v1 }
 0x24d   : > { %v6119_v62 = vld [vmem:[%s7379_s6 + $0xd70] sm:$0xf0] }
 0x24e   : > { %v6947_v63 = vld [vmem:[%s7379_s6 + $0xf54] sm:$0xf]  ;;  %v6122_v4 = vor.u32 %v6883_v61, %v6119_v62  ;;  %3974 = vmatpush.bf16.msrb.mxu1 %v5866_v2 }
 0x24f   : > { %v6375_v0 = vld [vmem:[%s7379_s6 + $0xf70] sm:$0xf0] }
 0x250   : > { %v6747_v5 = vld [vmem:[%s7379_s6 + $0x914] sm:$0xf]  ;;  %v6378_v8 = vor.u32 %v6947_v63, %v6375_v0  ;;  %3987 = vmatpush.bf16.msrb.mxu2 %v6122_v4  ;;  %v3723_v63 = vpop.f32.mrf.mxu1 }
 0x251   : > { %v5575_v6 = vld [vmem:[%s7379_s6 + $0x930] sm:$0xf0]  ;;  %v5389_v63 = vld [vmem:[%s7379_s6 + $0x798] sm:$0xf] }
 0x252   : > { %v6811_v7 = vld [vmem:[%s7379_s6 + $0xb14] sm:$0xf]  ;;  %v5578_v14 = vor.u32 %v6747_v5, %v5575_v6  ;;  %4000 = vmatpush.bf16.msrb.mxu3 %v6378_v8 }
 0x253   : > { %v5831_v50 = vld [vmem:[%s7379_s6 + $0xb30] sm:$0xf0] }
 0x254   : > { %v6875_v9 = vld [vmem:[%s7379_s6 + $0xd14] sm:$0xf]  ;;  %v5834_v16 = vor.u32 %v6811_v7, %v5831_v50  ;;  %3962 = vmatpush.bf16.msrb.mxu0 %v5578_v14  ;;  %v814_v7 = vperm.slane %v8058_v3, 3  ;;  %v3736_v3 = vpop.f32.mrf.mxu2 }
 0x255   : > { %v6087_v35 = vld [vmem:[%s7379_s6 + $0xd30] sm:$0xf0]  ;;  %v6496_v3 = vld [vmem:[%s7379_s6 + $0x134] sm:$0xf0] }
 0x256   : > { %v6939_v11 = vld [vmem:[%s7379_s6 + $0xf14] sm:$0xf]  ;;  %v6090_v17 = vor.u32 %v6875_v9, %v6087_v35  ;;  %3975 = vmatpush.bf16.msrb.mxu1 %v5834_v16 }
 0x257   : > { %v6343_v13 = vld [vmem:[%s7379_s6 + $0xf30] sm:$0xf0] }
 0x258   : > { %v6739_v19 = vld [vmem:[%s7379_s6 + $0x8d4] sm:$0xf]  ;;  %v6346_v49 = vor.u32 %v6939_v11, %v6343_v13  ;;  %3988 = vmatpush.bf16.msrb.mxu2 %v6090_v17 }
 0x259   : > { %v5543_v20 = vld [vmem:[%s7379_s6 + $0x8f0] sm:$0xf0] }
 0x25a   : > { %v6803_v21 = vld [vmem:[%s7379_s6 + $0xad4] sm:$0xf]  ;;  %v5546_v28 = vor.u32 %v6739_v19, %v5543_v20  ;;  %4001 = vmatpush.bf16.msrb.mxu3 %v6346_v49  ;;  %v3749_v49 = vpop.f32.mrf.mxu3 }
 0x25b   : > { %v5799_v23 = vld [vmem:[%s7379_s6 + $0xaf0] sm:$0xf0]  ;;  %v6624_v49 = vld [vmem:[%s7379_s6 + $0x534] sm:$0xf0] }
 0x25c   : > { %v6867_v24 = vld [vmem:[%s7379_s6 + $0xcd4] sm:$0xf]  ;;  %v5802_v29 = vor.u32 %v6803_v21, %v5799_v23  ;;  %3963 = vmatpush.bf16.msrb.mxu0 %v5546_v28  ;;  %v3709_v23 = vadd.f32 %v8212_v15, %v814_v7  ;;  %v6584_v28 = vld [vmem:[%s7379_s6 + $0x3f4] sm:$0xf0] }
 0x25d   : > { %v6055_v25 = vld [vmem:[%s7379_s6 + $0xcf0] sm:$0xf0]  ;;  %v6712_v15 = vld [vmem:[%s7379_s6 + $0x7f4] sm:$0xf0] }
 0x25e   : > { %v6931_v26 = vld [vmem:[%s7379_s6 + $0xed4] sm:$0xf]  ;;  %v6058_v31 = vor.u32 %v6867_v24, %v6055_v25  ;;  %3976 = vmatpush.bf16.msrb.mxu1 %v5802_v29  ;;  %v4653_v24 = vld [vmem:[%s7379_s6 + $0x1d8] sm:$0xf] }
 0x25f   : > { %v6311_v27 = vld [vmem:[%s7379_s6 + $0xef0] sm:$0xf0]  ;;  %v6520_v25 = vld [vmem:[%s7379_s6 + $0x1f4] sm:$0xf0] }
 0x260   : > { %v6731_v36 = vld [vmem:[%s7379_s6 + $0x894] sm:$0xf]  ;;  %v6314_v46 = vor.u32 %v6931_v26, %v6311_v27  ;;  %3989 = vmatpush.bf16.msrb.mxu2 %v6058_v31  ;;  %v4909_v26 = vld [vmem:[%s7379_s6 + $0x3d8] sm:$0xf] }
 0x261   : > { %v5511_v39 = vld [vmem:[%s7379_s6 + $0x8b0] sm:$0xf0]  ;;  %v5165_v29 = vld [vmem:[%s7379_s6 + $0x5d8] sm:$0xf] }
 0x262   : > { %v6795_v43 = vld [vmem:[%s7379_s6 + $0xa94] sm:$0xf]  ;;  %v5514_v56 = vor.u32 %v6731_v36, %v5511_v39  ;;  %4002 = vmatpush.bf16.msrb.mxu3 %v6314_v46  ;;  %v6648_v31 = vld [vmem:[%s7379_s6 + $0x5f4] sm:$0xf0] }
 0x263   : > { %v5767_v47 = vld [vmem:[%s7379_s6 + $0xab0] sm:$0xf0]  ;;  %v6568_v7 = vld [vmem:[%s7379_s6 + $0x374] sm:$0xf0] }
 0x264   : > { %v6859_v48 = vld [vmem:[%s7379_s6 + $0xc94] sm:$0xf]  ;;  %v5770_v58 = vor.u32 %v6795_v43, %v5767_v47  ;;  %3964 = vmatpush.bf16.msrb.mxu0 %v5514_v56  ;;  %v5421_v43 = vld [vmem:[%s7379_s6 + $0x7d8] sm:$0xf]  ;;  %v4654_v47 = vor.u32 %v6520_v25, %v4653_v24 }
 0x265   : > { %v6023_v51 = vld [vmem:[%s7379_s6 + $0xcb0] sm:$0xf0]  ;;  %v6512_v56 = vld [vmem:[%s7379_s6 + $0x1b4] sm:$0xf0] }
 0x266   : > { %v6923_v54 = vld [vmem:[%s7379_s6 + $0xe94] sm:$0xf]  ;;  %v6026_v59 = vor.u32 %v6859_v48, %v6023_v51  ;;  %3977 = vmatpush.bf16.msrb.mxu1 %v5770_v58  ;;  %v3722_v48 = vadd.f32 %v8217_v22, %v3709_v23  ;;  %v4910_v51 = vor.u32 %v6584_v28, %v4909_v26  ;;  %v5422_v58 = vor.u32 %v6712_v15, %v5421_v43  ;;  %v6704_v22 = vld [vmem:[%s7379_s6 + $0x7b4] sm:$0xf0]  ;;  %v3760_v26 = vpop.f32.mrf.mxu0 }
 0x267   : > { %v6279_v55 = vld [vmem:[%s7379_s6 + $0xeb0] sm:$0xf0]  ;;  %v5325_v24 = vld [vmem:[%s7379_s6 + $0x718] sm:$0xf] }
 0x268   : > { %v6723_v60 = vld [vmem:[%s7379_s6 + $0x854] sm:$0xf]  ;;  %v6282_v0 = vor.u32 %v6923_v54, %v6279_v55  ;;  %3990 = vmatpush.bf16.msrb.mxu2 %v6026_v59  ;;  %v5166_v54 = vor.u32 %v6648_v31, %v5165_v29  ;;  %v4621_v55 = vld [vmem:[%s7379_s6 + $0x198] sm:$0xf]  ;;  %v3773_v31 = vpop.f32.mrf.mxu1 }
 0x269   : > { %v5479_v61 = vld [vmem:[%s7379_s6 + $0x870] sm:$0xf0]  ;;  %v6576_v59 = vld [vmem:[%s7379_s6 + $0x3b4] sm:$0xf0] }
 0x26a   : > { %v6787_v62 = vld [vmem:[%s7379_s6 + $0xa54] sm:$0xf]  ;;  %v5482_v8 = vor.u32 %v6723_v60, %v5479_v61  ;;  %4003 = vmatpush.bf16.msrb.mxu3 %v6282_v0  ;;  %v5133_v60 = vld [vmem:[%s7379_s6 + $0x598] sm:$0xf]  ;;  %v4622_v0 = vor.u32 %v6512_v56, %v4621_v55 }
 0x26b   : > { %v5735_v1 = vld [vmem:[%s7379_s6 + $0xa70] sm:$0xf0]  ;;  %v6640_v61 = vld [vmem:[%s7379_s6 + $0x5b4] sm:$0xf0] }
 0x26c   : > { %v6851_v2 = vld [vmem:[%s7379_s6 + $0xc54] sm:$0xf]  ;;  %v5738_v35 = vor.u32 %v6787_v62, %v5735_v1  ;;  %3965 = vmatpush.bf16.msrb.mxu0 %v5482_v8  ;;  %v3657_v62 = vadd.f32 %v8136_v12, %v8082_v52  ;;  %v3735_v1 = vadd.f32 %v8227_v45, %v3722_v48  ;;  %v6504_v52 = vld [vmem:[%s7379_s6 + $0x174] sm:$0xf0] }
 0x26d   : > { %v5991_v4 = vld [vmem:[%s7379_s6 + $0xc70] sm:$0xf0]  ;;  %v4845_v12 = vld [vmem:[%s7379_s6 + $0x358] sm:$0xf] }
 0x26e   : > { %v6915_v5 = vld [vmem:[%s7379_s6 + $0xe54] sm:$0xf]  ;;  %v5994_v11 = vor.u32 %v6851_v2, %v5991_v4  ;;  %3978 = vmatpush.bf16.msrb.mxu1 %v5738_v35  ;;  %v4878_v2 = vor.u32 %v6576_v59, %v4877_v57  ;;  %v5134_v4 = vor.u32 %v6640_v61, %v5133_v60  ;;  %v5101_v8 = vld [vmem:[%s7379_s6 + $0x558] sm:$0xf]  ;;  %v3786_v59 = vpop.f32.mrf.mxu2 }
 0x26f   : > { %v6247_v6 = vld [vmem:[%s7379_s6 + $0xe70] sm:$0xf0]  ;;  %v5357_v45 = vld [vmem:[%s7379_s6 + $0x758] sm:$0xf] }
 0x270   : > { %v6715_v50 = vld [vmem:[%s7379_s6 + $0x814] sm:$0xf]  ;;  %v6250_v17 = vor.u32 %v6915_v5, %v6247_v6  ;;  %3991 = vmatpush.bf16.msrb.mxu2 %v5994_v11  ;;  %v4589_v5 = vld [vmem:[%s7379_s6 + $0x158] sm:$0xf]  ;;  %v5390_v6 = vor.u32 %v6704_v22, %v5389_v63  ;;  %v3799_v22 = vpop.f32.mrf.mxu3 }
 0x271   : > { %v5447_v9 = vld [vmem:[%s7379_s6 + $0x830] sm:$0xf0]  ;;  %v6696_v35 = vld [vmem:[%s7379_s6 + $0x774] sm:$0xf0]  ;;  %v4590_v11 = vor.u32 %v6504_v52, %v4589_v5 }
 0x272   : > { %v6779_v13 = vld [vmem:[%s7379_s6 + $0xa14] sm:$0xf]  ;;  %v5450_v27 = vor.u32 %v6715_v50, %v5447_v9  ;;  %4004 = vmatpush.bf16.msrb.mxu3 %v6250_v17  ;;  %v6632_v50 = vld [vmem:[%s7379_s6 + $0x574] sm:$0xf0]  ;;  %v3670_v9 = vadd.f32 %v8141_v18, %v3657_v62  ;;  %v4846_v18 = vor.u32 %v6568_v7, %v4845_v12 }
 0x273   : > { %v5703_v14 = vld [vmem:[%s7379_s6 + $0xa30] sm:$0xf0]  ;;  %v4813_v17 = vld [vmem:[%s7379_s6 + $0x318] sm:$0xf] }
 0x274   : > { %v6843_v16 = vld [vmem:[%s7379_s6 + $0xc14] sm:$0xf]  ;;  %v5706_v36 = vor.u32 %v6779_v13, %v5703_v14  ;;  %3966 = vmatpush.bf16.msrb.mxu0 %v5450_v27  ;;  %v3748_v13 = vadd.f32 %v8232_v53, %v3735_v1  ;;  %v5102_v14 = vor.u32 %v6632_v50, %v5101_v8  ;;  %v3683_v23 = vadd.f32 %v8151_v30, %v3670_v9  ;;  %v6688_v53 = vld [vmem:[%s7379_s6 + $0x734] sm:$0xf0]  ;;  %v3762_v8 = vpop.f32.mrf.mxu0 }
 0x275   : > { %v5959_v19 = vld [vmem:[%s7379_s6 + $0xc30] sm:$0xf0]  ;;  %v4781_v43 = vld [vmem:[%s7379_s6 + $0x2d8] sm:$0xf]  ;;  %v5326_v30 = vor.u32 %v6688_v53, %v5325_v24 }
 0x276   : > { %v6907_v20 = vld [vmem:[%s7379_s6 + $0xe14] sm:$0xf]  ;;  %v5962_v39 = vor.u32 %v6843_v16, %v5959_v19  ;;  %3979 = vmatpush.bf16.msrb.mxu1 %v5706_v36  ;;  %v4557_v16 = vld [vmem:[%s7379_s6 + $0x118] sm:$0xf]  ;;  %v5358_v19 = vor.u32 %v6696_v35, %v5357_v45  ;;  %v3761_v29 = vadd.f32 %v3760_v26, %v3748_v13  ;;  %v3696_v48 = vadd.f32 %v8156_v44, %v3683_v23  ;;  %v3775_v13 = vpop.f32.mrf.mxu1 }
 0x277   : > { %v6215_v21 = vld [vmem:[%s7379_s6 + $0xe30] sm:$0xf0]  ;;  %3967 = vmatmul.bf16.vlgmr.msrb.gmra.mxu0 %v7543_v37  ;;  %v4558_v25 = vor.u32 %v6496_v3, %v4557_v16  ;;  %v4525_v36 = vld [vmem:[%s7379_s6 + $0xd8] sm:$0xf] }
 0x278   : > { %v6218_v46 = vor.u32 %v6907_v20, %v6215_v21  ;;  %3992 = vmatpush.bf16.msrb.mxu2 %v5962_v39  ;;  %4011 = vmatpush.bf16.msra.mxu0 %v4654_v47  ;;  %v6560_v20 = vld [vmem:[%s7379_s6 + $0x334] sm:$0xf0] }
 0x279   : > { %3980 = vmatmul.bf16.vlgmr.msrb.gmra.mxu1 %v7547_v40  ;;  %v5069_v21 = vld [vmem:[%s7379_s6 + $0x518] sm:$0xf]  ;;  %v4814_v27 = vor.u32 %v6560_v20, %v4813_v17 }
 0x27a   : > { %4005 = vmatpush.bf16.msrb.mxu3 %v6218_v46  ;;  %4024 = vmatpush.bf16.msra.mxu1 %v4910_v51  ;;  %v5070_v28 = vor.u32 %v6624_v49, %v5069_v21  ;;  %v6488_v39 = vld [vmem:[%s7379_s6 + $0xf4] sm:$0xf0]  ;;  %v3774_v51 = vadd.f32 %v3773_v31, %v3761_v29  ;;  %v3788_v29 = vpop.f32.mrf.mxu2 }
 0x27b   : > { %3993 = vmatmul.bf16.vlgmr.msrb.gmra.mxu2 %v7539_v32  ;;  %v6552_v15 = vld [vmem:[%s7379_s6 + $0x2f4] sm:$0xf0]  ;;  %v4526_v56 = vor.u32 %v6488_v39, %v4525_v36 }
 0x27c   : > { %4037 = vmatpush.bf16.msra.mxu2 %v5166_v54  ;;  %4012 = vmatpush.bf16.msra.mxu0 %v4622_v0  ;;  %v5037_v46 = vld [vmem:[%s7379_s6 + $0x4d8] sm:$0xf]  ;;  %v4782_v57 = vor.u32 %v6552_v15, %v4781_v43  ;;  %v3787_v63 = vadd.f32 %v3786_v59, %v3774_v51  ;;  %v3801_v15 = vpop.f32.mrf.mxu3 }
 0x27d   : > { %4006 = vmatmul.bf16.vlgmr.msrb.gmra.mxu3 %v7545_v38  ;;  %v6616_v47 = vld [vmem:[%s7379_s6 + $0x4f4] sm:$0xf0] }
 0x27e   : > { %4050 = vmatpush.bf16.msra.mxu3 %v5422_v58  ;;  %4025 = vmatpush.bf16.msra.mxu1 %v4878_v2  ;;  %v5293_v54 = vld [vmem:[%s7379_s6 + $0x6d8] sm:$0xf]  ;;  %v5038_v58 = vor.u32 %v6616_v47, %v5037_v46  ;;  %v3800_v12 = vadd.f32 %v3799_v22, %v3787_v63 }
 0x27f   : > { %v6680_v55 = vld [vmem:[%s7379_s6 + $0x6f4] sm:$0xf0] }
 0x280   : > { %4038 = vmatpush.bf16.msra.mxu2 %v5134_v4  ;;  %4013 = vmatpush.bf16.msra.mxu0 %v4590_v11  ;;  %v4493_v60 = vld [vmem:[%s7379_s6 + $0x98] sm:$0xf]  ;;  %v5294_v62 = vor.u32 %v6680_v55, %v5293_v54  ;;  %v4221_v4 = vmax.f32 %v3696_v48, 0.0 }
 0x281   : > { %v6480_v61 = vld [vmem:[%s7379_s6 + $0xb4] sm:$0xf0] }
 0x282   : > { %4051 = vmatpush.bf16.msra.mxu3 %v5390_v6  ;;  %4026 = vmatpush.bf16.msra.mxu1 %v4846_v18  ;;  %v4749_v44 = vld [vmem:[%s7379_s6 + $0x298] sm:$0xf]  ;;  %v4494_v6 = vor.u32 %v6480_v61, %v4493_v60  ;;  %v4222_v18 = vmax.f32 %v3800_v12, 0.0  ;;  %v4236_v17 = vrot.slane %v4221_v4, 4 }
 0x283   : > { %v6544_v0 = vld [vmem:[%s7379_s6 + $0x2b4] sm:$0xf0] }
 0x284   : > { %4039 = vmatpush.bf16.msra.mxu2 %v5102_v14  ;;  %4014 = vmatpush.bf16.msra.mxu0 %v4558_v25  ;;  %v5005_v1 = vld [vmem:[%s7379_s6 + $0x498] sm:$0xf]  ;;  %v4750_v50 = vor.u32 %v6544_v0, %v4749_v44  ;;  %v4237_v21 = vrot.slane %v4222_v18, 2 }
 0x285   : > { %v6608_v2 = vld [vmem:[%s7379_s6 + $0x4b4] sm:$0xf0] }
 0x286   : > { %4052 = vmatpush.bf16.msra.mxu3 %v5358_v19  ;;  %4027 = vmatpush.bf16.msra.mxu1 %v4814_v27  ;;  %v5261_v5 = vld [vmem:[%s7379_s6 + $0x698] sm:$0xf]  ;;  %v5006_v9 = vor.u32 %v6608_v2, %v5005_v1  ;;  %v4244_v31 = vsel %vm4243_vm1, %v4236_v17, %v4237_v21 }
 0x287   : > { %v6672_v52 = vld [vmem:[%s7379_s6 + $0x6b4] sm:$0xf0]  ;;  %v4246_v46 = vsel %vm4245_vm2, %v8021_v10, %v4244_v31 }
 0x288   : > { %4040 = vmatpush.bf16.msra.mxu2 %v5070_v28  ;;  %4015 = vmatpush.bf16.msra.mxu0 %v4526_v56  ;;  %v4461_v7 = vld [vmem:[%s7379_s6 + $0x58] sm:$0xf]  ;;  %v5262_v14 = vor.u32 %v6672_v52, %v5261_v5  ;;  %4252 = vst [vmem:[%s8342_s27] sm:$0xff] %v4246_v46 }
 0x289   : > { %v6472_v45 = vld [vmem:[%s7379_s6 + $0x74] sm:$0xf0] }
 0x28a   : > { %4053 = vmatpush.bf16.msra.mxu3 %v5326_v30  ;;  %4028 = vmatpush.bf16.msra.mxu1 %v4782_v57  ;;  %v4717_v35 = vld [vmem:[%s7379_s6 + $0x258] sm:$0xf]  ;;  %v4462_v49 = vor.u32 %v6472_v45, %v4461_v7 }
 0x28b   : > { %v6536_v11 = vld [vmem:[%s7379_s6 + $0x274] sm:$0xf0] }
 0x28c   : > { %4041 = vmatpush.bf16.msra.mxu2 %v5038_v58  ;;  %v4973_v16 = vld [vmem:[%s7379_s6 + $0x458] sm:$0xf]  ;;  %4016 = vmatpush.bf16.msra.mxu0 %v4494_v6  ;;  %v4718_v53 = vor.u32 %v6536_v11, %v4717_v35 }
 0x28d   : > { %v6600_v3 = vld [vmem:[%s7379_s6 + $0x474] sm:$0xf0] }
 0x28e   : > { %4054 = vmatpush.bf16.msra.mxu3 %v5294_v62  ;;  %v5229_v19 = vld [vmem:[%s7379_s6 + $0x658] sm:$0xf]  ;;  %4029 = vmatpush.bf16.msra.mxu1 %v4750_v50  ;;  %v4974_v25 = vor.u32 %v6600_v3, %v4973_v16 }
 0x28f   : > { %v6664_v20 = vld [vmem:[%s7379_s6 + $0x674] sm:$0xf0] }
 0x290   : > { %v4429_v23 = vld [vmem:[%s7379_s6 + $0x18] sm:$0xf]  ;;  %4042 = vmatpush.bf16.msra.mxu2 %v5006_v9  ;;  %v5230_v36 = vor.u32 %v6664_v20, %v5229_v19  ;;  %4017 = vmatpush.bf16.msra.mxu0 %v4462_v49 }
 0x291   : > { %v6464_v24 = vld [vmem:[%s7379_s6 + $0x34] sm:$0xf0] }
 0x292   : > { %v4685_v26 = vld [vmem:[%s7379_s6 + $0x218] sm:$0xf]  ;;  %4055 = vmatpush.bf16.msra.mxu3 %v5262_v14  ;;  %v4430_v54 = vor.u32 %v6464_v24, %v4429_v23  ;;  %4030 = vmatpush.bf16.msra.mxu1 %v4718_v53  ;;  %v8371_v24 = vld [vmem:[%s7788_s10] sm:$0xff] }
 0x293   : > { %v6528_v27 = vld [vmem:[%s7379_s6 + $0x234] sm:$0xf0]  ;;  %v815_v53 = vperm.slane %v8371_v24, 4 }
 0x294   : > { %v4941_v28 = vld [vmem:[%s7379_s6 + $0x418] sm:$0xf]  ;;  %4043 = vmatpush.bf16.msra.mxu2 %v4974_v25  ;;  %v4686_v10 = vor.u32 %v6528_v27, %v4685_v26  ;;  %4018 = vmatpush.bf16.msra.mxu0 %v4430_v54 }
 0x295   : > { %v6592_v39 = vld [vmem:[%s7379_s6 + $0x434] sm:$0xf0] }
 0x296   : > { %v5197_v43 = vld [vmem:[%s7379_s6 + $0x618] sm:$0xf]  ;;  %v4942_v58 = vor.u32 %v6592_v39, %v4941_v28  ;;  %4056 = vmatpush.bf16.msra.mxu3 %v5230_v36  ;;  %4031 = vmatpush.bf16.msra.mxu1 %v4686_v10  ;;  %v3812_v39 = vpop.f32.mrf.mxu0 }
 0x297   : > { %v6656_v30 = vld [vmem:[%s7379_s6 + $0x634] sm:$0xf0]  ;;  %4019 = vmatmul.bf16.vlgmr.msra.gmra.mxu0 %v7494_v34 }
 0x298   : > { %v5677_v47 = vld [vmem:[%s7379_s6 + $0x9d8] sm:$0xf]  ;;  %v5198_v61 = vor.u32 %v6656_v30, %v5197_v43  ;;  %4044 = vmatpush.bf16.msra.mxu2 %v4942_v58 }
 0x299   : > { %v6776_v48 = vld [vmem:[%s7379_s6 + $0x9f4] sm:$0xf0]  ;;  %4032 = vmatmul.bf16.vlgmr.msra.gmra.mxu1 %v7501_v42 }
 0x29a   : > { %v5933_v51 = vld [vmem:[%s7379_s6 + $0xbd8] sm:$0xf]  ;;  %v5678_v44 = vor.u32 %v6776_v48, %v5677_v47  ;;  %4057 = vmatpush.bf16.msra.mxu3 %v5198_v61  ;;  %v3813_v48 = vadd.f32 %v3812_v39, %v815_v53 }
 0x29b   : > { %v6840_v55 = vld [vmem:[%s7379_s6 + $0xbf4] sm:$0xf0]  ;;  %4045 = vmatmul.bf16.vlgmr.msra.gmra.mxu2 %v7492_v33 }
 0x29c   : > { %v6189_v56 = vld [vmem:[%s7379_s6 + $0xdd8] sm:$0xf]  ;;  %v5934_v62 = vor.u32 %v6840_v55, %v5933_v51  ;;  %4063 = vmatpush.bf16.msrb.mxu0 %v5678_v44  ;;  %v3825_v51 = vpop.f32.mrf.mxu1 }
 0x29d   : > { %v6904_v57 = vld [vmem:[%s7379_s6 + $0xdf4] sm:$0xf0]  ;;  %4058 = vmatmul.bf16.vlgmr.msra.gmra.mxu3 %v7499_v41 }
 0x29e   : > { %v6445_v59 = vld [vmem:[%s7379_s6 + $0xfd8] sm:$0xf]  ;;  %v6190_v63 = vor.u32 %v6904_v57, %v6189_v56  ;;  %4076 = vmatpush.bf16.msrb.mxu1 %v5934_v62 }
 0x29f   : > { %v6968_v60 = vld [vmem:[%s7379_s6 + $0xff4] sm:$0xf0] }
 0x2a0   : > { %v5645_v22 = vld [vmem:[%s7379_s6 + $0x998] sm:$0xf]  ;;  %v6446_v2 = vor.u32 %v6968_v60, %v6445_v59  ;;  %4089 = vmatpush.bf16.msrb.mxu2 %v6190_v63  ;;  %v3826_v59 = vadd.f32 %v3825_v51, %v3813_v48  ;;  %v6580_v48 = vld [vmem:[%s7379_s6 + $0x3dc] sm:$0xf] }
 0x2a1   : > { %v6768_v0 = vld [vmem:[%s7379_s6 + $0x9b4] sm:$0xf0] }
 0x2a2   : > { %v5901_v1 = vld [vmem:[%s7379_s6 + $0xb98] sm:$0xf]  ;;  %v5646_v7 = vor.u32 %v6768_v0, %v5645_v22  ;;  %4102 = vmatpush.bf16.msrb.mxu3 %v6446_v2  ;;  %v3838_v0 = vpop.f32.mrf.mxu2 }
 0x2a3   : > { %v6832_v4 = vld [vmem:[%s7379_s6 + $0xbb4] sm:$0xf0] }
 0x2a4   : > { %v6157_v5 = vld [vmem:[%s7379_s6 + $0xd98] sm:$0xf]  ;;  %v5902_v8 = vor.u32 %v6832_v4, %v5901_v1  ;;  %4064 = vmatpush.bf16.msrb.mxu0 %v5646_v7 }
 0x2a5   : > { %v6896_v52 = vld [vmem:[%s7379_s6 + $0xdb4] sm:$0xf0] }
 0x2a6   : > { %v6413_v12 = vld [vmem:[%s7379_s6 + $0xf98] sm:$0xf]  ;;  %v6158_v50 = vor.u32 %v6896_v52, %v6157_v5  ;;  %4077 = vmatpush.bf16.msrb.mxu1 %v5902_v8  ;;  %v3839_v52 = vadd.f32 %v3838_v0, %v3826_v59  ;;  %v5423_v59 = vld [vmem:[%s7379_s6 + $0x7f8] sm:$0xf0] }
 0x2a7   : > { %v6960_v6 = vld [vmem:[%s7379_s6 + $0xfb4] sm:$0xf0]  ;;  %v6572_v0 = vld [vmem:[%s7379_s6 + $0x39c] sm:$0xf] }
 0x2a8   : > { %v5613_v9 = vld [vmem:[%s7379_s6 + $0x958] sm:$0xf]  ;;  %v6414_v11 = vor.u32 %v6960_v6, %v6413_v12  ;;  %4090 = vmatpush.bf16.msrb.mxu2 %v6158_v50  ;;  %v3851_v12 = vpop.f32.mrf.mxu3 }
 0x2a9   : > { %v6760_v45 = vld [vmem:[%s7379_s6 + $0x974] sm:$0xf0]  ;;  %v8395_v50 = vadd.f32 %v3851_v12, %v3839_v52  ;;  %v6700_v52 = vld [vmem:[%s7379_s6 + $0x79c] sm:$0xf] }
 0x2aa   : > { %v5869_v35 = vld [vmem:[%s7379_s6 + $0xb58] sm:$0xf]  ;;  %v5614_v17 = vor.u32 %v6760_v45, %v5613_v9  ;;  %4103 = vmatpush.bf16.msrb.mxu3 %v6414_v11  ;;  %v3814_v9 = vpop.f32.mrf.mxu0  ;;  %v5391_v12 = vld [vmem:[%s7379_s6 + $0x7b8] sm:$0xf0] }
 0x2ab   : > { %v6824_v13 = vld [vmem:[%s7379_s6 + $0xb74] sm:$0xf0]  ;;  %v6500_v9 = vld [vmem:[%s7379_s6 + $0x15c] sm:$0xf] }
 0x2ac   : > { %v6125_v18 = vld [vmem:[%s7379_s6 + $0xd58] sm:$0xf]  ;;  %v5870_v20 = vor.u32 %v6824_v13, %v5869_v35  ;;  %4065 = vmatpush.bf16.msrb.mxu0 %v5614_v17 }
 0x2ad   : > { %v6888_v14 = vld [vmem:[%s7379_s6 + $0xd74] sm:$0xf0] }
 0x2ae   : > { %v6381_v16 = vld [vmem:[%s7379_s6 + $0xf58] sm:$0xf]  ;;  %v6126_v21 = vor.u32 %v6888_v14, %v6125_v18  ;;  %4078 = vmatpush.bf16.msrb.mxu1 %v5870_v20  ;;  %v3827_v14 = vpop.f32.mrf.mxu1 }
 0x2af   : > { %v6952_v3 = vld [vmem:[%s7379_s6 + $0xf74] sm:$0xf0]  ;;  %v5103_v14 = vld [vmem:[%s7379_s6 + $0x578] sm:$0xf0] }
 0x2b0   : > { %v5581_v19 = vld [vmem:[%s7379_s6 + $0x918] sm:$0xf]  ;;  %v6382_v25 = vor.u32 %v6952_v3, %v6381_v16  ;;  %4091 = vmatpush.bf16.msrb.mxu2 %v6126_v21 }
 0x2b1   : > { %v6752_v49 = vld [vmem:[%s7379_s6 + $0x934] sm:$0xf0] }
 0x2b2   : > { %v5837_v23 = vld [vmem:[%s7379_s6 + $0xb18] sm:$0xf]  ;;  %v5582_v36 = vor.u32 %v6752_v49, %v5581_v19  ;;  %4104 = vmatpush.bf16.msrb.mxu3 %v6382_v25 }
 0x2b3   : > { %v6816_v26 = vld [vmem:[%s7379_s6 + $0xb34] sm:$0xf0] }
 0x2b4   : > { %v6093_v27 = vld [vmem:[%s7379_s6 + $0xd18] sm:$0xf]  ;;  %v5838_v43 = vor.u32 %v6816_v26, %v5837_v23  ;;  %4066 = vmatpush.bf16.msrb.mxu0 %v5582_v36 }
 0x2b5   : > { %v6880_v28 = vld [vmem:[%s7379_s6 + $0xd34] sm:$0xf0] }
 0x2b6   : > { %v6349_v29 = vld [vmem:[%s7379_s6 + $0xf18] sm:$0xf]  ;;  %v6094_v30 = vor.u32 %v6880_v28, %v6093_v27  ;;  %4079 = vmatpush.bf16.msrb.mxu1 %v5838_v43 }
 0x2b7   : > { %v6944_v31 = vld [vmem:[%s7379_s6 + $0xf34] sm:$0xf0] }
 0x2b8   : > { %v5549_v15 = vld [vmem:[%s7379_s6 + $0x8d8] sm:$0xf]  ;;  %v6350_v54 = vor.u32 %v6944_v31, %v6349_v29  ;;  %4092 = vmatpush.bf16.msrb.mxu2 %v6094_v30  ;;  %v3840_v31 = vpop.f32.mrf.mxu2 }
 0x2b9   : > { %v6744_v46 = vld [vmem:[%s7379_s6 + $0x8f4] sm:$0xf0] }
 0x2ba   : > { %v5805_v47 = vld [vmem:[%s7379_s6 + $0xad8] sm:$0xf]  ;;  %v5550_v60 = vor.u32 %v6744_v46, %v5549_v15  ;;  %4105 = vmatpush.bf16.msrb.mxu3 %v6350_v54  ;;  %v3853_v15 = vpop.f32.mrf.mxu3  ;;  %v6516_v46 = vld [vmem:[%s7379_s6 + $0x1dc] sm:$0xf] }
 0x2bb   : > { %v6808_v55 = vld [vmem:[%s7379_s6 + $0xaf4] sm:$0xf0]  ;;  %v4911_v54 = vld [vmem:[%s7379_s6 + $0x3f8] sm:$0xf0] }
 0x2bc   : > { %v6061_v56 = vld [vmem:[%s7379_s6 + $0xcd8] sm:$0xf]  ;;  %v5806_v61 = vor.u32 %v6808_v55, %v5805_v47  ;;  %4067 = vmatpush.bf16.msrb.mxu0 %v5550_v60  ;;  %v4655_v47 = vld [vmem:[%s7379_s6 + $0x1f8] sm:$0xf0] }
 0x2bd   : > { %v6872_v57 = vld [vmem:[%s7379_s6 + $0xcf4] sm:$0xf0]  ;;  %v6644_v55 = vld [vmem:[%s7379_s6 + $0x5dc] sm:$0xf] }
 0x2be   : > { %v6317_v10 = vld [vmem:[%s7379_s6 + $0xed8] sm:$0xf]  ;;  %v6062_v44 = vor.u32 %v6872_v57, %v6061_v56  ;;  %4080 = vmatpush.bf16.msrb.mxu1 %v5806_v61  ;;  %v5167_v56 = vld [vmem:[%s7379_s6 + $0x5f8] sm:$0xf0]  ;;  %v4658_v61 = vor.u32 %v6516_v46, %v4655_v47 }
 0x2bf   : > { %v6936_v58 = vld [vmem:[%s7379_s6 + $0xef4] sm:$0xf0]  ;;  %v4527_v15 = vld [vmem:[%s7379_s6 + $0xf8] sm:$0xf0] }
 0x2c0   : > { %v5517_v62 = vld [vmem:[%s7379_s6 + $0x898] sm:$0xf]  ;;  %v6318_v1 = vor.u32 %v6936_v58, %v6317_v10  ;;  %4093 = vmatpush.bf16.msrb.mxu2 %v6062_v44  ;;  %v6708_v58 = vld [vmem:[%s7379_s6 + $0x7dc] sm:$0xf]  ;;  %v4914_v44 = vor.u32 %v6580_v48, %v4911_v54  ;;  %v3877_v48 = vpop.f32.mrf.mxu1 }
 0x2c1   : > { %v6736_v63 = vld [vmem:[%s7379_s6 + $0x8b4] sm:$0xf0]  ;;  %v6548_v46 = vld [vmem:[%s7379_s6 + $0x2dc] sm:$0xf] }
 0x2c2   : > { %v5773_v22 = vld [vmem:[%s7379_s6 + $0xa98] sm:$0xf]  ;;  %v5518_v8 = vor.u32 %v6736_v63, %v5517_v62  ;;  %4106 = vmatpush.bf16.msrb.mxu3 %v6318_v1  ;;  %v5170_v62 = vor.u32 %v6644_v55, %v5167_v56  ;;  %v6508_v63 = vld [vmem:[%s7379_s6 + $0x19c] sm:$0xf]  ;;  %v5426_v1 = vor.u32 %v6708_v58, %v5423_v59 }
 0x2c3   : > { %v6800_v2 = vld [vmem:[%s7379_s6 + $0xab4] sm:$0xf0]  ;;  %v4783_v54 = vld [vmem:[%s7379_s6 + $0x2f8] sm:$0xf0] }
 0x2c4   : > { %v6029_v4 = vld [vmem:[%s7379_s6 + $0xc98] sm:$0xf]  ;;  %v5774_v45 = vor.u32 %v6800_v2, %v5773_v22  ;;  %4068 = vmatpush.bf16.msrb.mxu0 %v5518_v8  ;;  %v4623_v22 = vld [vmem:[%s7379_s6 + $0x1b8] sm:$0xf0] }
 0x2c5   : > { %v6864_v5 = vld [vmem:[%s7379_s6 + $0xcb4] sm:$0xf0]  ;;  %v4879_v2 = vld [vmem:[%s7379_s6 + $0x3b8] sm:$0xf0] }
 0x2c6   : > { %v6285_v6 = vld [vmem:[%s7379_s6 + $0xe98] sm:$0xf]  ;;  %v6030_v35 = vor.u32 %v6864_v5, %v6029_v4  ;;  %4081 = vmatpush.bf16.msrb.mxu1 %v5774_v45  ;;  %v6636_v4 = vld [vmem:[%s7379_s6 + $0x59c] sm:$0xf] }
 0x2c7   : > { %v6928_v7 = vld [vmem:[%s7379_s6 + $0xeb4] sm:$0xf0]  ;;  %v5135_v5 = vld [vmem:[%s7379_s6 + $0x5b8] sm:$0xf0] }
 0x2c8   : > { %v5485_v11 = vld [vmem:[%s7379_s6 + $0x858] sm:$0xf]  ;;  %v6286_v16 = vor.u32 %v6928_v7, %v6285_v6  ;;  %4094 = vmatpush.bf16.msrb.mxu2 %v6030_v35  ;;  %v4626_v6 = vor.u32 %v6508_v63, %v4623_v22  ;;  %v4882_v7 = vor.u32 %v6572_v0, %v4879_v2  ;;  %v5138_v8 = vor.u32 %v6636_v4, %v5135_v5  ;;  %v4591_v45 = vld [vmem:[%s7379_s6 + $0x178] sm:$0xf0]  ;;  %v3890_v63 = vpop.f32.mrf.mxu2  ;;  %v3903_v5 = vpop.f32.mrf.mxu3 }
 0x2c9   : > { %v6728_v13 = vld [vmem:[%s7379_s6 + $0x874] sm:$0xf0]  ;;  %v6564_v35 = vld [vmem:[%s7379_s6 + $0x35c] sm:$0xf] }
 0x2ca   : > { %v5741_v18 = vld [vmem:[%s7379_s6 + $0xa58] sm:$0xf]  ;;  %v5486_v49 = vor.u32 %v6728_v13, %v5485_v11  ;;  %4107 = vmatpush.bf16.msrb.mxu3 %v6286_v16  ;;  %v5394_v11 = vor.u32 %v6700_v52, %v5391_v12  ;;  %v4847_v13 = vld [vmem:[%s7379_s6 + $0x378] sm:$0xf0] }
 0x2cb   : > { %v6792_v3 = vld [vmem:[%s7379_s6 + $0xa74] sm:$0xf0]  ;;  %v6692_v16 = vld [vmem:[%s7379_s6 + $0x75c] sm:$0xf] }
 0x2cc   : > { %v5997_v17 = vld [vmem:[%s7379_s6 + $0xc58] sm:$0xf]  ;;  %v5742_v25 = vor.u32 %v6792_v3, %v5741_v18  ;;  %4069 = vmatpush.bf16.msrb.mxu0 %v5486_v49  ;;  %v6628_v18 = vld [vmem:[%s7379_s6 + $0x55c] sm:$0xf] }
 0x2cd   : > { %v6856_v19 = vld [vmem:[%s7379_s6 + $0xc74] sm:$0xf0]  ;;  %v5359_v3 = vld [vmem:[%s7379_s6 + $0x778] sm:$0xf0] }
 0x2ce   : > { %v6253_v20 = vld [vmem:[%s7379_s6 + $0xe58] sm:$0xf]  ;;  %v5998_v26 = vor.u32 %v6856_v19, %v5997_v17  ;;  %4082 = vmatpush.bf16.msrb.mxu1 %v5742_v25  ;;  %v4594_v17 = vor.u32 %v6500_v9, %v4591_v45  ;;  %v4850_v19 = vor.u32 %v6564_v35, %v4847_v13  ;;  %v4559_v49 = vld [vmem:[%s7379_s6 + $0x138] sm:$0xf0] }
 0x2cf   : > { %v6920_v21 = vld [vmem:[%s7379_s6 + $0xe74] sm:$0xf0]  ;;  %v4815_v25 = vld [vmem:[%s7379_s6 + $0x338] sm:$0xf0] }
 0x2d0   : > { %v5453_v23 = vld [vmem:[%s7379_s6 + $0x818] sm:$0xf]  ;;  %v6254_v36 = vor.u32 %v6920_v21, %v6253_v20  ;;  %4095 = vmatpush.bf16.msrb.mxu2 %v5998_v26  ;;  %v5106_v20 = vor.u32 %v6628_v18, %v5103_v14  ;;  %v6492_v21 = vld [vmem:[%s7379_s6 + $0x11c] sm:$0xf]  ;;  %v3879_v18 = vpop.f32.mrf.mxu1 }
 0x2d1   : > { %v6720_v53 = vld [vmem:[%s7379_s6 + $0x834] sm:$0xf0]  ;;  %v6620_v26 = vld [vmem:[%s7379_s6 + $0x51c] sm:$0xf]  ;;  %v4562_v31 = vor.u32 %v6492_v21, %v4559_v49 }
 0x2d2   : > { %v5709_v27 = vld [vmem:[%s7379_s6 + $0xa18] sm:$0xf]  ;;  %v5454_v51 = vor.u32 %v6720_v53, %v5453_v23  ;;  %4108 = vmatpush.bf16.msrb.mxu3 %v6254_v36  ;;  %v6556_v23 = vld [vmem:[%s7379_s6 + $0x31c] sm:$0xf]  ;;  %v5362_v53 = vor.u32 %v6692_v16, %v5359_v3  ;;  %v3864_v36 = vpop.f32.mrf.mxu0 }
 0x2d3   : > { %v6784_v28 = vld [vmem:[%s7379_s6 + $0xa34] sm:$0xf0]  ;;  %v3865_v47 = vadd.f32 %v3864_v36, %v8395_v50  ;;  %v6612_v55 = vld [vmem:[%s7379_s6 + $0x4dc] sm:$0xf]  ;;  %v4786_v50 = vor.u32 %v6548_v46, %v4783_v54 }
 0x2d4   : > { %v5965_v29 = vld [vmem:[%s7379_s6 + $0xc18] sm:$0xf]  ;;  %v5710_v57 = vor.u32 %v6784_v28, %v5709_v27  ;;  %4070 = vmatpush.bf16.msrb.mxu0 %v5454_v51  ;;  %v5071_v27 = vld [vmem:[%s7379_s6 + $0x538] sm:$0xf0] }
 0x2d5   : > { %v6848_v39 = vld [vmem:[%s7379_s6 + $0xc34] sm:$0xf0]  ;;  %v6684_v28 = vld [vmem:[%s7379_s6 + $0x71c] sm:$0xf]  ;;  %v3878_v58 = vadd.f32 %v3877_v48, %v3865_v47 }
 0x2d6   : > { %v6221_v43 = vld [vmem:[%s7379_s6 + $0xe18] sm:$0xf]  ;;  %v5966_v10 = vor.u32 %v6848_v39, %v5965_v29  ;;  %4083 = vmatpush.bf16.msrb.mxu1 %v5710_v57  ;;  %v5327_v29 = vld [vmem:[%s7379_s6 + $0x738] sm:$0xf0]  ;;  %v4818_v39 = vor.u32 %v6556_v23, %v4815_v25 }
 0x2d7   : > { %v6912_v30 = vld [vmem:[%s7379_s6 + $0xe34] sm:$0xf0]  ;;  %4071 = vmatmul.bf16.vlgmr.msrb.gmra.mxu0 %v7543_v37  ;;  %v5330_v51 = vor.u32 %v6684_v28, %v5327_v29  ;;  %v5039_v56 = vld [vmem:[%s7379_s6 + $0x4f8] sm:$0xf0]  ;;  %v3891_v4 = vadd.f32 %v3890_v63, %v3878_v58  ;;  %v3892_v29 = vpop.f32.mrf.mxu2 }
 0x2d8   : > { %v6222_v60 = vor.u32 %v6912_v30, %v6221_v43  ;;  %4096 = vmatpush.bf16.msrb.mxu2 %v5966_v10  ;;  %4115 = vmatpush.bf16.msra.mxu0 %v4658_v61  ;;  %v5074_v43 = vor.u32 %v6620_v26, %v5071_v27  ;;  %v6484_v30 = vld [vmem:[%s7379_s6 + $0xdc] sm:$0xf] }
 0x2d9   : > { %4084 = vmatmul.bf16.vlgmr.msrb.gmra.mxu1 %v7547_v40  ;;  %v6676_v57 = vld [vmem:[%s7379_s6 + $0x6dc] sm:$0xf]  ;;  %v4530_v59 = vor.u32 %v6484_v30, %v4527_v15  ;;  %v3905_v30 = vpop.f32.mrf.mxu3 }
 0x2da   : > { %4109 = vmatpush.bf16.msrb.mxu3 %v6222_v60  ;;  %4128 = vmatpush.bf16.msra.mxu1 %v4914_v44  ;;  %v5295_v10 = vld [vmem:[%s7379_s6 + $0x6f8] sm:$0xf0]  ;;  %v5042_v60 = vor.u32 %v6612_v55, %v5039_v56  ;;  %v3929_v30 = vpop.f32.mrf.mxu1 }
 0x2db   : > { %4097 = vmatmul.bf16.vlgmr.msrb.gmra.mxu2 %v7539_v32  ;;  %v6476_v61 = vld [vmem:[%s7379_s6 + $0x9c] sm:$0xf]  ;;  %v5298_v22 = vor.u32 %v6676_v57, %v5295_v10 }
 0x2dc   : > { %4141 = vmatpush.bf16.msra.mxu2 %v5170_v62  ;;  %4116 = vmatpush.bf16.msra.mxu0 %v4626_v6  ;;  %v4495_v44 = vld [vmem:[%s7379_s6 + $0xb8] sm:$0xf0] }
 0x2dd   : > { %4110 = vmatmul.bf16.vlgmr.msrb.gmra.mxu3 %v7545_v38  ;;  %v6540_v62 = vld [vmem:[%s7379_s6 + $0x29c] sm:$0xf]  ;;  %v4498_v6 = vor.u32 %v6476_v61, %v4495_v44 }
 0x2de   : > { %4154 = vmatpush.bf16.msra.mxu3 %v5426_v1  ;;  %4129 = vmatpush.bf16.msra.mxu1 %v4882_v7  ;;  %v4751_v0 = vld [vmem:[%s7379_s6 + $0x2b8] sm:$0xf0]  ;;  %v8466_v7 = vadd.f32 %v3903_v5, %v3891_v4 }
 0x2df   : > { %v6604_v1 = vld [vmem:[%s7379_s6 + $0x49c] sm:$0xf]  ;;  %v4754_v9 = vor.u32 %v6540_v62, %v4751_v0 }
 0x2e0   : > { %4142 = vmatpush.bf16.msra.mxu2 %v5138_v8  ;;  %4117 = vmatpush.bf16.msra.mxu0 %v4594_v17  ;;  %v5007_v2 = vld [vmem:[%s7379_s6 + $0x4b8] sm:$0xf0]  ;;  %v3866_v8 = vpop.f32.mrf.mxu0 }
 0x2e1   : > { %v6668_v52 = vld [vmem:[%s7379_s6 + $0x69c] sm:$0xf]  ;;  %v5010_v45 = vor.u32 %v6604_v1, %v5007_v2 }
 0x2e2   : > { %4155 = vmatpush.bf16.msra.mxu3 %v5394_v11  ;;  %4130 = vmatpush.bf16.msra.mxu1 %v4850_v19  ;;  %v5263_v12 = vld [vmem:[%s7379_s6 + $0x6b8] sm:$0xf0] }
 0x2e3   : > { %v6468_v35 = vld [vmem:[%s7379_s6 + $0x5c] sm:$0xf]  ;;  %v5266_v14 = vor.u32 %v6668_v52, %v5263_v12 }
 0x2e4   : > { %4143 = vmatpush.bf16.msra.mxu2 %v5106_v20  ;;  %4118 = vmatpush.bf16.msra.mxu0 %v4562_v31  ;;  %v4463_v11 = vld [vmem:[%s7379_s6 + $0x78] sm:$0xf0] }
 0x2e5   : > { %v6532_v13 = vld [vmem:[%s7379_s6 + $0x25c] sm:$0xf]  ;;  %v4466_v21 = vor.u32 %v6468_v35, %v4463_v11 }
 0x2e6   : > { %4156 = vmatpush.bf16.msra.mxu3 %v5362_v53  ;;  %4131 = vmatpush.bf16.msra.mxu1 %v4818_v39  ;;  %v4719_v16 = vld [vmem:[%s7379_s6 + $0x278] sm:$0xf0] }
 0x2e7   : > { %v6596_v3 = vld [vmem:[%s7379_s6 + $0x45c] sm:$0xf]  ;;  %v4722_v53 = vor.u32 %v6532_v13, %v4719_v16 }
 0x2e8   : > { %4144 = vmatpush.bf16.msra.mxu2 %v5074_v43  ;;  %4119 = vmatpush.bf16.msra.mxu0 %v4530_v59  ;;  %v4975_v17 = vld [vmem:[%s7379_s6 + $0x478] sm:$0xf0] }
 0x2e9   : > { %v6660_v19 = vld [vmem:[%s7379_s6 + $0x65c] sm:$0xf]  ;;  %v4978_v25 = vor.u32 %v6596_v3, %v4975_v17 }
 0x2ea   : > { %4157 = vmatpush.bf16.msra.mxu3 %v5330_v51  ;;  %4132 = vmatpush.bf16.msra.mxu1 %v4786_v50  ;;  %v5231_v20 = vld [vmem:[%s7379_s6 + $0x678] sm:$0xf0] }
 0x2eb   : > { %v6460_v49 = vld [vmem:[%s7379_s6 + $0x1c] sm:$0xf]  ;;  %v5234_v31 = vor.u32 %v6660_v19, %v5231_v20 }
 0x2ec   : > { %4145 = vmatpush.bf16.msra.mxu2 %v5042_v60  ;;  %4120 = vmatpush.bf16.msra.mxu0 %v4498_v6  ;;  %v4431_v23 = vld [vmem:[%s7379_s6 + $0x38] sm:$0xf0] }
 0x2ed   : > { %v6524_v26 = vld [vmem:[%s7379_s6 + $0x21c] sm:$0xf]  ;;  %v4434_v48 = vor.u32 %v6460_v49, %v4431_v23 }
 0x2ee   : > { %4158 = vmatpush.bf16.msra.mxu3 %v5298_v22  ;;  %4133 = vmatpush.bf16.msra.mxu1 %v4754_v9  ;;  %v4687_v27 = vld [vmem:[%s7379_s6 + $0x238] sm:$0xf0] }
 0x2ef   : > { %v6588_v28 = vld [vmem:[%s7379_s6 + $0x41c] sm:$0xf]  ;;  %v4690_v56 = vor.u32 %v6524_v26, %v4687_v27  ;;  %v3916_v27 = vpop.f32.mrf.mxu0 }
 0x2f0   : > { %4146 = vmatpush.bf16.msra.mxu2 %v5010_v45  ;;  %v4943_v36 = vld [vmem:[%s7379_s6 + $0x438] sm:$0xf0]  ;;  %4121 = vmatpush.bf16.msra.mxu0 %v4466_v21 }
 0x2f1   : > { %v6652_v39 = vld [vmem:[%s7379_s6 + $0x61c] sm:$0xf]  ;;  %v4946_v57 = vor.u32 %v6588_v28, %v4943_v36 }
 0x2f2   : > { %4159 = vmatpush.bf16.msra.mxu3 %v5266_v14  ;;  %v5199_v43 = vld [vmem:[%s7379_s6 + $0x638] sm:$0xf0]  ;;  %4134 = vmatpush.bf16.msra.mxu1 %v4722_v53 }
 0x2f3   : > { %v6772_v15 = vld [vmem:[%s7379_s6 + $0x9dc] sm:$0xf]  ;;  %v5202_v59 = vor.u32 %v6652_v39, %v5199_v43 }
 0x2f4   : > { %v5679_v46 = vld [vmem:[%s7379_s6 + $0x9f8] sm:$0xf0]  ;;  %4147 = vmatpush.bf16.msra.mxu2 %v4978_v25  ;;  %4122 = vmatpush.bf16.msra.mxu0 %v4434_v48 }
 0x2f5   : > { %v6836_v47 = vld [vmem:[%s7379_s6 + $0xbdc] sm:$0xf]  ;;  %v5682_v50 = vor.u32 %v6772_v15, %v5679_v46 }
 0x2f6   : > { %v5935_v51 = vld [vmem:[%s7379_s6 + $0xbf8] sm:$0xf0]  ;;  %4160 = vmatpush.bf16.msra.mxu3 %v5234_v31  ;;  %4135 = vmatpush.bf16.msra.mxu1 %v4690_v56 }
 0x2f7   : > { %v6900_v54 = vld [vmem:[%s7379_s6 + $0xddc] sm:$0xf]  ;;  %v5938_v60 = vor.u32 %v6836_v47, %v5935_v51  ;;  %4123 = vmatmul.bf16.vlgmr.msra.gmra.mxu0 %v7494_v34  ;;  %v816_v34 = vperm.slane %v8371_v24, 5 }
 0x2f8   : > { %v6191_v55 = vld [vmem:[%s7379_s6 + $0xdf8] sm:$0xf0]  ;;  %4148 = vmatpush.bf16.msra.mxu2 %v4946_v57  ;;  %4167 = vmatpush.bf16.msrb.mxu0 %v5682_v50 }
 0x2f9   : > { %v6964_v10 = vld [vmem:[%s7379_s6 + $0xfdc] sm:$0xf]  ;;  %v6194_v61 = vor.u32 %v6900_v54, %v6191_v55  ;;  %4136 = vmatmul.bf16.vlgmr.msra.gmra.mxu1 %v7501_v42  ;;  %v3917_v43 = vadd.f32 %v3916_v27, %v816_v34 }
 0x2fa   : > { %v6447_v58 = vld [vmem:[%s7379_s6 + $0xff8] sm:$0xf0]  ;;  %4161 = vmatpush.bf16.msra.mxu3 %v5202_v59  ;;  %4180 = vmatpush.bf16.msrb.mxu1 %v5938_v60  ;;  %v3942_v60 = vpop.f32.mrf.mxu2 }
 0x2fb   : > { %v6764_v44 = vld [vmem:[%s7379_s6 + $0x99c] sm:$0xf]  ;;  %v6450_v22 = vor.u32 %v6964_v10, %v6447_v58  ;;  %4149 = vmatmul.bf16.vlgmr.msra.gmra.mxu2 %v7492_v33  ;;  %v3930_v55 = vadd.f32 %v3929_v30, %v3917_v43 }
 0x2fc   : > { %v5647_v62 = vld [vmem:[%s7379_s6 + $0x9b8] sm:$0xf0]  ;;  %4193 = vmatpush.bf16.msrb.mxu2 %v6194_v61 }
 0x2fd   : > { %v6828_v63 = vld [vmem:[%s7379_s6 + $0xb9c] sm:$0xf]  ;;  %v5650_v52 = vor.u32 %v6764_v44, %v5647_v62  ;;  %4162 = vmatmul.bf16.vlgmr.msra.gmra.mxu3 %v7499_v41 }
 0x2fe   : > { %v5903_v0 = vld [vmem:[%s7379_s6 + $0xbb8] sm:$0xf0]  ;;  %4206 = vmatpush.bf16.msrb.mxu3 %v6450_v22  ;;  %v3943_v22 = vadd.f32 %v3942_v60, %v3930_v55 }
 0x2ff   : > { %v6892_v1 = vld [vmem:[%s7379_s6 + $0xd9c] sm:$0xf]  ;;  %v5906_v12 = vor.u32 %v6828_v63, %v5903_v0  ;;  %4168 = vmatpush.bf16.msrb.mxu0 %v5650_v52  ;;  %v3955_v0 = vpop.f32.mrf.mxu3  ;;  %v3918_v52 = vpop.f32.mrf.mxu0 }
 0x300   : > { %v6159_v2 = vld [vmem:[%s7379_s6 + $0xdb8] sm:$0xf0] }
 0x301   : > { %v6956_v4 = vld [vmem:[%s7379_s6 + $0xf9c] sm:$0xf]  ;;  %v6162_v6 = vor.u32 %v6892_v1, %v6159_v2  ;;  %4181 = vmatpush.bf16.msrb.mxu1 %v5906_v12 }
 0x302   : > { %v6415_v5 = vld [vmem:[%s7379_s6 + $0xfb8] sm:$0xf0] }
 0x303   : > { %v6756_v8 = vld [vmem:[%s7379_s6 + $0x95c] sm:$0xf]  ;;  %v6418_v35 = vor.u32 %v6956_v4, %v6415_v5  ;;  %4194 = vmatpush.bf16.msrb.mxu2 %v6162_v6  ;;  %v3956_v5 = vadd.f32 %v3955_v0, %v3943_v22 }
 0x304   : > { %v5615_v9 = vld [vmem:[%s7379_s6 + $0x978] sm:$0xf0] }
 0x305   : > { %v6820_v45 = vld [vmem:[%s7379_s6 + $0xb5c] sm:$0xf]  ;;  %v5618_v3 = vor.u32 %v6756_v8, %v5615_v9  ;;  %4207 = vmatpush.bf16.msrb.mxu3 %v6418_v35  ;;  %v3931_v35 = vpop.f32.mrf.mxu1 }
 0x306   : > { %v5871_v11 = vld [vmem:[%s7379_s6 + $0xb78] sm:$0xf0] }
 0x307   : > { %v6884_v13 = vld [vmem:[%s7379_s6 + $0xd5c] sm:$0xf]  ;;  %v5874_v17 = vor.u32 %v6820_v45, %v5871_v11  ;;  %4169 = vmatpush.bf16.msrb.mxu0 %v5618_v3 }
 0x308   : > { %v6127_v18 = vld [vmem:[%s7379_s6 + $0xd78] sm:$0xf0] }
 0x309   : > { %v6948_v14 = vld [vmem:[%s7379_s6 + $0xf5c] sm:$0xf]  ;;  %v6130_v19 = vor.u32 %v6884_v13, %v6127_v18  ;;  %4182 = vmatpush.bf16.msrb.mxu1 %v5874_v17 }
 0x30a   : > { %v6383_v16 = vld [vmem:[%s7379_s6 + $0xf78] sm:$0xf0] }
 0x30b   : > { %v6748_v33 = vld [vmem:[%s7379_s6 + $0x91c] sm:$0xf]  ;;  %v6386_v41 = vor.u32 %v6948_v14, %v6383_v16  ;;  %4195 = vmatpush.bf16.msrb.mxu2 %v6130_v19 }
 0x30c   : > { %v5583_v20 = vld [vmem:[%s7379_s6 + $0x938] sm:$0xf0] }
 0x30d   : > { %v6812_v21 = vld [vmem:[%s7379_s6 + $0xb1c] sm:$0xf]  ;;  %v5586_v26 = vor.u32 %v6748_v33, %v5583_v20  ;;  %4208 = vmatpush.bf16.msrb.mxu3 %v6386_v41  ;;  %v3944_v41 = vpop.f32.mrf.mxu2  ;;  %v3981_v30 = vpop.f32.mrf.mxu1 }
 0x30e   : > { %v5839_v49 = vld [vmem:[%s7379_s6 + $0xb38] sm:$0xf0] }
 0x30f   : > { %v6876_v23 = vld [vmem:[%s7379_s6 + $0xd1c] sm:$0xf]  ;;  %v5842_v28 = vor.u32 %v6812_v21, %v5839_v49  ;;  %4170 = vmatpush.bf16.msrb.mxu0 %v5586_v26 }
 0x310   : > { %v6095_v53 = vld [vmem:[%s7379_s6 + $0xd38] sm:$0xf0] }
 0x311   : > { %v6940_v25 = vld [vmem:[%s7379_s6 + $0xf1c] sm:$0xf]  ;;  %v6098_v29 = vor.u32 %v6876_v23, %v6095_v53  ;;  %4183 = vmatpush.bf16.msrb.mxu1 %v5842_v28 }
 0x312   : > { %v6351_v42 = vld [vmem:[%s7379_s6 + $0xf38] sm:$0xf0] }
 0x313   : > { %v6740_v31 = vld [vmem:[%s7379_s6 + $0x8dc] sm:$0xf]  ;;  %v6354_v15 = vor.u32 %v6940_v25, %v6351_v42  ;;  %4196 = vmatpush.bf16.msrb.mxu2 %v6098_v29  ;;  %v3957_v42 = vpop.f32.mrf.mxu3 }
 0x314   : > { %v5551_v36 = vld [vmem:[%s7379_s6 + $0x8f8] sm:$0xf0] }
 0x315   : > { %v6804_v39 = vld [vmem:[%s7379_s6 + $0xadc] sm:$0xf]  ;;  %v5554_v56 = vor.u32 %v6740_v31, %v5551_v36  ;;  %4209 = vmatpush.bf16.msrb.mxu3 %v6354_v15  ;;  %v3983_v55 = vpop.f32.mrf.mxu1 }
 0x316   : > { %v5807_v46 = vld [vmem:[%s7379_s6 + $0xaf8] sm:$0xf0] }
 0x317   : > { %v6868_v47 = vld [vmem:[%s7379_s6 + $0xcdc] sm:$0xf]  ;;  %v5810_v57 = vor.u32 %v6804_v39, %v5807_v46  ;;  %4171 = vmatpush.bf16.msrb.mxu0 %v5554_v56  ;;  %v3968_v39 = vpop.f32.mrf.mxu0  ;;  %v3994_v46 = vpop.f32.mrf.mxu2 }
 0x318   : > { %v6063_v48 = vld [vmem:[%s7379_s6 + $0xcf8] sm:$0xf0]  ;;  %v3969_v43 = vadd.f32 %v3968_v39, %v3956_v5 }
 0x319   : > { %v6932_v51 = vld [vmem:[%s7379_s6 + $0xedc] sm:$0xf]  ;;  %v6066_v10 = vor.u32 %v6868_v47, %v6063_v48  ;;  %4184 = vmatpush.bf16.msrb.mxu1 %v5810_v57  ;;  %v4223_v57 = vmax.f32 %v8466_v7, 0.0 }
 0x31a   : > { %v6319_v54 = vld [vmem:[%s7379_s6 + $0xef8] sm:$0xf0]  ;;  %v3982_v15 = vadd.f32 %v3981_v30, %v3969_v43 }
 0x31b   : > { %v6732_v58 = vld [vmem:[%s7379_s6 + $0x89c] sm:$0xf]  ;;  %v6322_v61 = vor.u32 %v6932_v51, %v6319_v54  ;;  %4197 = vmatpush.bf16.msrb.mxu2 %v6066_v10  ;;  %v4007_v48 = vpop.f32.mrf.mxu3 }
 0x31c   : > { %v5519_v59 = vld [vmem:[%s7379_s6 + $0x8b8] sm:$0xf0]  ;;  %v3995_v47 = vadd.f32 %v3994_v46, %v3982_v15 }
 0x31d   : > { %v6796_v50 = vld [vmem:[%s7379_s6 + $0xa9c] sm:$0xf]  ;;  %v5522_v4 = vor.u32 %v6732_v58, %v5519_v59  ;;  %4210 = vmatpush.bf16.msrb.mxu3 %v6322_v61 }
 0x31e   : > { %v5775_v44 = vld [vmem:[%s7379_s6 + $0xab8] sm:$0xf0]  ;;  %v4008_v51 = vadd.f32 %v4007_v48, %v3995_v47 }
 0x31f   : > { %v6860_v62 = vld [vmem:[%s7379_s6 + $0xc9c] sm:$0xf]  ;;  %v5778_v12 = vor.u32 %v6796_v50, %v5775_v44  ;;  %4172 = vmatpush.bf16.msrb.mxu0 %v5522_v4  ;;  %v3970_v54 = vpop.f32.mrf.mxu0  ;;  %v3996_v10 = vpop.f32.mrf.mxu2 }
 0x320   : > { %v6031_v63 = vld [vmem:[%s7379_s6 + $0xcb8] sm:$0xf0]  ;;  %v4224_v56 = vmax.f32 %v4008_v51, 0.0  ;;  %v4033_v50 = vpop.f32.mrf.mxu1 }
 0x321   : > { %v6924_v1 = vld [vmem:[%s7379_s6 + $0xe9c] sm:$0xf]  ;;  %v6034_v6 = vor.u32 %v6860_v62, %v6031_v63  ;;  %4185 = vmatpush.bf16.msrb.mxu1 %v5778_v12 }
 0x322   : > { %v6287_v2 = vld [vmem:[%s7379_s6 + $0xeb8] sm:$0xf0] }
 0x323   : > { %v6724_v8 = vld [vmem:[%s7379_s6 + $0x85c] sm:$0xf]  ;;  %v6290_v11 = vor.u32 %v6924_v1, %v6287_v2  ;;  %4198 = vmatpush.bf16.msrb.mxu2 %v6034_v6 }
 0x324   : > { %v5487_v9 = vld [vmem:[%s7379_s6 + $0x878] sm:$0xf0] }
 0x325   : > { %v6788_v45 = vld [vmem:[%s7379_s6 + $0xa5c] sm:$0xf]  ;;  %v5490_v33 = vor.u32 %v6724_v8, %v5487_v9  ;;  %4211 = vmatpush.bf16.msrb.mxu3 %v6290_v11 }
 0x326   : > { %v5743_v13 = vld [vmem:[%s7379_s6 + $0xa78] sm:$0xf0] }
 0x327   : > { %v6852_v18 = vld [vmem:[%s7379_s6 + $0xc5c] sm:$0xf]  ;;  %v5746_v17 = vor.u32 %v6788_v45, %v5743_v13  ;;  %4173 = vmatpush.bf16.msrb.mxu0 %v5490_v33  ;;  %v4020_v58 = vpop.f32.mrf.mxu0  ;;  %v4046_v61 = vpop.f32.mrf.mxu2 }
 0x328   : > { %v5999_v14 = vld [vmem:[%s7379_s6 + $0xc78] sm:$0xf0]  ;;  %v4035_v0 = vpop.f32.mrf.mxu1 }
 0x329   : > { %v6916_v16 = vld [vmem:[%s7379_s6 + $0xe5c] sm:$0xf]  ;;  %v6002_v19 = vor.u32 %v6852_v18, %v5999_v14  ;;  %4186 = vmatpush.bf16.msrb.mxu1 %v5746_v17 }
 0x32a   : > { %v6255_v3 = vld [vmem:[%s7379_s6 + $0xe78] sm:$0xf0] }
 0x32b   : > { %v6716_v20 = vld [vmem:[%s7379_s6 + $0x81c] sm:$0xf]  ;;  %v6258_v49 = vor.u32 %v6916_v16, %v6255_v3  ;;  %4199 = vmatpush.bf16.msrb.mxu2 %v6002_v19  ;;  %v818_v16 = vperm.slane %v8371_v24, 7 }
 0x32c   : > { %v5455_v21 = vld [vmem:[%s7379_s6 + $0x838] sm:$0xf0] }
 0x32d   : > { %v6780_v34 = vld [vmem:[%s7379_s6 + $0xa1c] sm:$0xf]  ;;  %v5458_v28 = vor.u32 %v6716_v20, %v5455_v21  ;;  %4212 = vmatpush.bf16.msrb.mxu3 %v6258_v49 }
 0x32e   : > { %v5711_v23 = vld [vmem:[%s7379_s6 + $0xa38] sm:$0xf0] }
 0x32f   : > { %v6844_v53 = vld [vmem:[%s7379_s6 + $0xc1c] sm:$0xf]  ;;  %v5714_v29 = vor.u32 %v6780_v34, %v5711_v23  ;;  %4174 = vmatpush.bf16.msrb.mxu0 %v5458_v28  ;;  %v4022_v22 = vpop.f32.mrf.mxu0  ;;  %v4048_v1 = vpop.f32.mrf.mxu2 }
 0x330   : > { %v5967_v25 = vld [vmem:[%s7379_s6 + $0xc38] sm:$0xf0] }
 0x331   : > { %v6908_v26 = vld [vmem:[%s7379_s6 + $0xe1c] sm:$0xf]  ;;  %v5970_v31 = vor.u32 %v6844_v53, %v5967_v25  ;;  %4187 = vmatpush.bf16.msrb.mxu1 %v5714_v29 }
 0x332   : > { %v6223_v27 = vld [vmem:[%s7379_s6 + $0xe38] sm:$0xf0]  ;;  %4175 = vmatmul.bf16.vlgmr.msrb.gmra.mxu0 %v7543_v37  ;;  %v4238_v37 = vrot.slane %v4224_v56, 6 }
 0x333   : > { %v6226_v36 = vor.u32 %v6908_v26, %v6223_v27  ;;  %4200 = vmatpush.bf16.msrb.mxu2 %v5970_v31 }
 0x334   : > { %4188 = vmatmul.bf16.vlgmr.msrb.gmra.mxu1 %v7547_v40  ;;  %v8559_v40 = vsel %vm4241_vm0, %v4223_v57, %v4238_v37 }
 0x335   : > { %4213 = vmatpush.bf16.msrb.mxu3 %v6226_v36 }
 0x336   : > { %4201 = vmatmul.bf16.vlgmr.msrb.gmra.mxu2 %v7539_v32  ;;  %v4009_v32 = vpop.f32.mrf.mxu3 }
 0x338   : > { %4214 = vmatmul.bf16.vlgmr.msrb.gmra.mxu3 %v7545_v38  ;;  %v817_v38 = vperm.slane %v8371_v24, 6 }
 0x33a   : > { %v4021_v59 = vadd.f32 %v4020_v58, %v817_v38 }
 0x33c   : > { %v4034_v60 = vadd.f32 %v4033_v50, %v4021_v59 }
 0x33e   : > { %v4047_v44 = vadd.f32 %v4046_v61, %v4034_v60  ;;  %v4059_v62 = vpop.f32.mrf.mxu3 }
 0x340   : > { %v4060_v63 = vadd.f32 %v4059_v62, %v4047_v44 }
 0x346   : > { %v4061_v7 = vpop.f32.mrf.mxu3 }
 0x354   : > { %v4072_v2 = vpop.f32.mrf.mxu0 }
 0x355   : > { %v4073_v20 = vadd.f32 %v4072_v2, %v4060_v63 }
 0x356   : > { %v4085_v4 = vpop.f32.mrf.mxu1 }
 0x357   : > { %v4086_v34 = vadd.f32 %v4085_v4, %v4073_v20 }
 0x35c   : > { %v4074_v12 = vpop.f32.mrf.mxu0 }
 0x35e   : > { %v4098_v5 = vpop.f32.mrf.mxu2  ;;  %v4087_v6 = vpop.f32.mrf.mxu1 }
 0x35f   : > { %v4099_v53 = vadd.f32 %v4098_v5, %v4086_v34 }
 0x360   : > { %v4111_v52 = vpop.f32.mrf.mxu3 }
 0x361   : > { %v4112_v42 = vadd.f32 %v4111_v52, %v4099_v53 }
 0x363   : > { %v4225_v36 = vmax.f32 %v4112_v42, 0.0 }
 0x365   : > { %v4239_v30 = vrot.slane %v4225_v36, 4 }
 0x366   : > { %v4100_v8 = vpop.f32.mrf.mxu2 }
 0x368   : > { %v4113_v9 = vpop.f32.mrf.mxu3 }
 0x374   : > { %v4124_v45 = vpop.f32.mrf.mxu0 }
 0x375   : > { %v4125_v17 = vadd.f32 %v4124_v45, %v818_v16 }
 0x376   : > { %v4137_v35 = vpop.f32.mrf.mxu1 }
 0x377   : > { %v4138_v19 = vadd.f32 %v4137_v35, %v4125_v17 }
 0x37c   : > { %v4126_v18 = vpop.f32.mrf.mxu0 }
 0x37e   : > { %v4150_v11 = vpop.f32.mrf.mxu2  ;;  %v4139_v14 = vpop.f32.mrf.mxu1 }
 0x37f   : > { %v4151_v21 = vadd.f32 %v4150_v11, %v4138_v19 }
 0x380   : > { %v4163_v13 = vpop.f32.mrf.mxu3 }
 0x381   : > { %v4164_v41 = vadd.f32 %v4163_v13, %v4151_v21 }
 0x386   : > { %v4152_v3 = vpop.f32.mrf.mxu2 }
 0x388   : > { %v4165_v33 = vpop.f32.mrf.mxu3 }
 0x3af   : > { %v4176_v49 = vpop.f32.mrf.mxu0 }
 0x3b0   : > { %v4177_v25 = vadd.f32 %v4176_v49, %v4164_v41 }
 0x3b1   : > { %v4189_v23 = vpop.f32.mrf.mxu1 }
 0x3b2   : > { %v4190_v26 = vadd.f32 %v4189_v23, %v4177_v25 }
 0x3b7   : > { %v4178_v29 = vpop.f32.mrf.mxu0 }
 0x3b9   : > { %v4202_v27 = vpop.f32.mrf.mxu2  ;;  %v4191_v31 = vpop.f32.mrf.mxu1 }
 0x3ba   : > { %v4203_v28 = vadd.f32 %v4202_v27, %v4190_v26 }
 0x3bb   : > { %v4215_v24 = vpop.f32.mrf.mxu3 }
 0x3bc   : > { %v4216_v39 = vadd.f32 %v4215_v24, %v4203_v28 }
 0x3be   : > { %v4226_v43 = vmax.f32 %v4216_v39, 0.0 }
 0x3c0   : > { %v4240_v15 = vrot.slane %v4226_v43, 2 }
 0x3c1   : > { %v4204_v46 = vpop.f32.mrf.mxu2 }
 0x3c2   : > { %v4248_v47 = vsel %vm4243_vm1, %v4239_v30, %v4240_v15 }
 0x3c3   : > { %v4217_v48 = vpop.f32.mrf.mxu3  ;;  %v4249_v51 = vsel %vm4245_vm2, %v8559_v40, %v4248_v47 }
 0x3c4   : > { %4253 = vst [vmem:[%s8342_s27 + $0x8] sm:$0xff] %v4249_v51 }
 0x3c5   : > { %7169 = shalt.err (!%p7166_p13)
}
 0x3c6   : > { %6978 = dma.vmem_to_hbm [thread:$0]  (%p7341_p0), %s4271_s9, 256, %s4273_s11, %s4255_s15  }
 0x3c7 PF: > { %s4284_s28 = sand.u32 1, %s7208_s12   ;;  %p6992_p4 = pnand %p4392_p3, %p7345_p2 }
 0x3c8   : > { %s4285_s10 = scalar_lea.sflag [#allocation4], %s4284_s28 }
 0x3c9   : > { %p6993_p5 = pneg %p6992_p4 }
 0x3cb   : > { %7203 = dma.done.wait (%p6993_p5), %s4285_s10, 256  }
 0x3cc   : > { %7205 = vsyncadd (%p6993_p5), %s4285_s10, 4294967040  ;;  %s20_s17 = sadd.s32 1, %s7228_s17   ;;  %s8616_s12 = smov %s7212_s13 }
 0x3cd   : > { %p17_p1 = scmp.ge.s32.totalorder %s20_s17, 4   ;;  %s8617_s13 = smov %s7216_s14 }
 0x3ce   : > { %s8618_s14 = smov %s7305_s25  ;;  %s8619_s15 = smov %s7224_s16 }
 0x3cf   : > { %s8620_s16 = smov %s8622_s18  ;;  %19 = sbr.rel (!%p17_p1) target bundleno = 7 (0x7), region = 95 }
 0x3d4   :  { %4291 = vsyncpa [#allocation3], 1 }
 0x3d5   :  { %4293 = vsyncpa [#allocation3 + $0x1], 1 }
 0x3d6   :  { %4294 = vsyncpa [#allocation6], 1 }
 0x3d7   :  { %4296 = vsyncpa [#allocation6 + $0x1], 1 }
 0x3d8   :  { %4297 = vsyncpa [#allocation4], 1 }
 0x3d9   :  { %4299 = vsyncpa [#allocation4 + $0x1], 1 }

</bundles_post_ra>
